<compile_context>
chip_gen: v7x
topology: tpu7x:2x2x1
jax: 0.10.0
libtpu: 0.0.40
codegen_flags: <defaults>
</compile_context>

<pallas_src>
import functools

import numpy as np
import jax
import jax.numpy as jnp
from jax.experimental import pallas as pl
from jax.experimental.pallas import tpu as pltpu

# Static skeleton definition copied from VarLoss.__init__.
_SKELETON_IDX = [
    [[0, 1], [1, 2], [3, 4], [4, 5]],
    [[10, 11], [11, 12], [13, 14], [14, 15]],
    [[2, 6], [3, 6]],
    [[12, 8], [13, 8]],
]
_SKELETON_WEIGHT = [
    [1.0085885098415446, 1, 1, 1.0085885098415446],
    [1.1375361376887123, 1, 1, 1.1375361376887123],
    [1, 1],
    [1, 1],
]

_LANE = 128  # TPU lane width; also used to pad the bone/group matrices.


def _skeleton_constants(num_joints, pad=_LANE):
    """One-hot selection / grouping matrices for the skeleton bones (lane-padded)."""
    bones = []
    for g, group in enumerate(_SKELETON_IDX):
        for j, (a, b) in enumerate(group):
            bones.append((a, b, float(_SKELETON_WEIGHT[g][j]), g))
    sel1 = np.zeros((num_joints, pad), np.float32)   # selects joint id1 per bone
    sel2 = np.zeros((num_joints, pad), np.float32)   # selects joint id2 per bone
    bw = np.zeros((1, pad), np.float32)              # per-bone weight
    grp = np.zeros((pad, pad), np.float32)           # bone -> group membership
    for j, (a, b, w, g) in enumerate(bones):
        sel1[a, j] = 1.0
        sel2[b, j] = 1.0
        bw[0, j] = w
        grp[j, g] = 1.0
    return sel1, sel2, bw, grp, np.ascontiguousarray(grp.T)


def _fusion_loss_kernel(feat_ref, row_ref, col_ref, target_ref, mask_ref,
                        gtx_ref, gty_ref, sel1_ref, sel2_ref, bw_ref,
                        grp_ref, grpT_ref, out_ref, *, reg_weight, var_weight):
    f32 = jnp.float32
    hi = jax.lax.Precision.HIGHEST

    feat = feat_ref[0].astype(f32)            # (S, 128)  depth map tile (native dtype in HBM/VMEM)
    S = feat.shape[0]
    row = row_ref[0]                          # (1, K) int32  = ind // 128
    col = col_ref[0]                          # (1, K) int32  = ind %  128
    target = target_ref[0]                    # (1, K) f32  (== "visible" in VarLoss)
    mask = mask_ref[0]                        # (1, K) f32
    K = target.shape[1]

    # ---- gather: pred[0, k] = feat[row[k], col[k]] -----------------------
    # stage 1: lane selection via a tiny matmul  H[s, k] = feat[s, col[k]]
    lane_iota = jax.lax.broadcasted_iota(jnp.int32, (_LANE, K), 0)
    colselT = (lane_iota == col).astype(f32)                          # (128, K)
    H = jnp.dot(feat, colselT, precision=hi, preferred_element_type=f32)  # (S, K)
    # stage 2: sublane selection via masked reduce
    sub_iota = jax.lax.broadcasted_iota(jnp.int32, (S, K), 0)
    rowselT = (sub_iota == row).astype(f32)                           # (S, K)
    pred = jnp.sum(H * rowselT, axis=0, keepdims=True)                # (1, K)

    mask_sum = jnp.sum(mask)                                          # scalar

    # ---- reg_loss partial: masked smooth-L1 sum (normalised later in JAX) ----
    if reg_weight > 0:
        d = (pred - target) * mask
        ad = jnp.abs(d)
        sl1_sum = jnp.sum(jnp.where(ad < 1.0, 0.5 * d * d, ad - 0.5))
    else:
        sl1_sum = f32(0.0)

    # ---- VarLoss partial (only counts for unsupervised samples) ----------
    if var_weight > 0:
        gtx = gtx_ref[0]                       # (1, K)
        gty = gty_ref[0]                       # (1, K)
        sel1 = sel1_ref[...]                   # (K, 128)
        sel2 = sel2_ref[...]                   # (K, 128)
        bw = bw_ref[...]                       # (1, 128)
        grp = grp_ref[...]                     # (128, 128)
        grpT = grpT_ref[...]                   # (128, 128)

        def sel(x, s):
            return jnp.dot(x, s, precision=hi, preferred_element_type=f32)

        v1, v2 = sel(target, sel1), sel(target, sel2)    # (1, 128), padded lanes = 0
        p1, p2 = sel(pred, sel1), sel(pred, sel2)
        x1, x2 = sel(gtx, sel1), sel(gtx, sel2)
        y1, y2 = sel(gty, sel1), sel(gty, sel2)

        valid = jnp.logical_and(v1 > 0.5, v2 > 0.5).astype(f32)       # padded bones -> 0
        dist = jnp.sqrt((x1 - x2) ** 2 + (y1 - y2) ** 2 + (p1 - p2) ** 2)
        l = dist * bw * valid                                         # bone lengths (0 on padding)

        numg = jnp.dot(valid, grp, precision=hi, preferred_element_type=f32)  # per-group count
        sumL = jnp.dot(l, grp, precision=hi, preferred_element_type=f32)
        Eg = jnp.where(numg >= 0.5, sumL / jnp.maximum(numg, 1.0), 0.0)       # per-group mean
        Eb = jnp.dot(Eg, grpT, precision=hi, preferred_element_type=f32)      # back to per-bone
        numb = jnp.maximum(jnp.dot(numg, grpT, precision=hi,
                                   preferred_element_type=f32), 1.0)

        contrib = jnp.where(l > 0.0, (l - Eb) ** 2 / 2.0 / numb, 0.0)
        unsup = (mask_sum == 0.0).astype(f32)
        var_part = jnp.sum(contrib) * unsup
    else:
        var_part = f32(0.0)

    # ---- emit per-sample partials into a lane-dense (1,128) output -------
    li = jax.lax.broadcasted_iota(jnp.int32, (1, _LANE), 1)
    out_ref[0] = (jnp.where(li == 0, sl1_sum, 0.0)
                  + jnp.where(li == 1, mask_sum, 0.0)
                  + jnp.where(li == 2, var_part, 0.0)).astype(out_ref.dtype)


def fusion_loss(output, mask, ind, target, gt_2d, reg_weight=1.0, var_weight=0.01):
    B, C, H, W = output.shape
    assert C == 1
    K = ind.shape[1]
    HW = H * W
    S = pl.cdiv(HW, _LANE)

    # permute(0,2,3,1) with C==1 is a pure reshape; keep the NATIVE dtype.
    feat = output.reshape(B, HW)
    if S * _LANE != HW:
        feat = jnp.pad(feat, ((0, 0), (0, S * _LANE - HW)))
    feat = feat.reshape(B, S, _LANE)

    ind32 = ind.astype(jnp.int32)
    row = (ind32 // _LANE).reshape(B, 1, K)
    col = (ind32 % _LANE).reshape(B, 1, K)
    target3 = target.reshape(B, 1, K).astype(jnp.float32)
    mask3 = mask.reshape(B, 1, K).astype(jnp.float32)
    xy = gt_2d.reshape(B, K, 2).astype(jnp.float32)
    gtx = xy[:, :, 0].reshape(B, 1, K)
    gty = xy[:, :, 1].reshape(B, 1, K)

    sel1, sel2, bw, grp, grpT = _skeleton_constants(K)

    kernel = functools.partial(_fusion_loss_kernel,
                               reg_weight=float(reg_weight),
                               var_weight=float(var_weight))

    small_spec = pl.BlockSpec((1, 1, K), lambda b: (b, 0, 0))

    def const_spec(shape):
        return pl.BlockSpec(shape, lambda b: (0, 0))   # fetched once (block idx constant)

    parts = pl.pallas_call(
        kernel,
        out_shape=jax.ShapeDtypeStruct((B, 1, _LANE), jnp.float32),
        grid=(B,),
        in_specs=[
            pl.BlockSpec((1, S, _LANE), lambda b: (b, 0, 0)),   # feat (double-buffered)
            small_spec, small_spec, small_spec, small_spec,     # row, col, target, mask
            small_spec, small_spec,                             # gtx, gty
            const_spec((K, _LANE)), const_spec((K, _LANE)),     # sel1, sel2
            const_spec((1, _LANE)),                             # bone weights
            const_spec((_LANE, _LANE)), const_spec((_LANE, _LANE)),  # grp, grpT
        ],
        out_specs=pl.BlockSpec((1, 1, _LANE), lambda b: (b, 0, 0)),
        compiler_params=pltpu.CompilerParams(dimension_semantics=("parallel",)),
    )(feat, row, col, target3, mask3, gtx, gty,
      jnp.asarray(sel1), jnp.asarray(sel2), jnp.asarray(bw),
      jnp.asarray(grp), jnp.asarray(grpT))

    sl1_total = jnp.sum(parts[:, 0, 0])
    mask_total = jnp.sum(parts[:, 0, 1])
    var_total = jnp.sum(parts[:, 0, 2])

    loss = jnp.float32(0.0)
    if reg_weight > 0:
        loss = loss + reg_weight * sl1_total / (mask_total + 1e-4)
    if var_weight > 0:
        loss = loss + var_weight * var_total / B
    return loss

# TODO(synk): VarLoss.backward (custom autograd gradient) is not implemented; forward only.
# (If a backward is added, use a safe sqrt -- masked/eps -- to avoid NaN grads at dist==0.)


def ref_fusion_loss(output, mask, ind, target, gt_2d, reg_weight, var_weight):
    """Pure numpy reimplementation of the PyTorch forward pass (for checking)."""
    output = np.asarray(output, np.float64)
    mask = np.asarray(mask, np.float64).reshape(output.shape[0], -1)
    ind = np.asarray(ind)
    B, C, H, W = output.shape
    target = np.asarray(target, np.float64).reshape(B, -1)
    feat = output.transpose(0, 2, 3, 1).reshape(B, -1)
    pred = np.take_along_axis(feat, ind, axis=1)
    loss = 0.0
    if reg_weight > 0:
        num = mask.sum()
        d = (pred - target) * mask
        ad = np.abs(d)
        sl1 = np.where(ad < 1.0, 0.5 * d * d, ad - 0.5).sum()
        loss += reg_weight * sl1 / (num + 1e-4)
    if var_weight > 0:
        xy = np.asarray(gt_2d, np.float64).reshape(B, -1, 2)
        out = 0.0
        for t in range(B):
            if mask[t].sum() == 0:
                for g in range(len(_SKELETON_IDX)):
                    E, num = 0.0, 0
                    N = len(_SKELETON_IDX[g])
                    l = np.zeros(N)
                    for j in range(N):
                        id1, id2 = _SKELETON_IDX[g][j]
                        if target[t, id1] > 0.5 and target[t, id2] > 0.5:
                            l[j] = (((xy[t, id1] - xy[t, id2]) ** 2).sum()
                                    + (pred[t, id1] - pred[t, id2]) ** 2) ** 0.5
                            l[j] *= _SKELETON_WEIGHT[g][j]
                            num += 1
                            E += l[j]
                    E = E / num if num >= 0.5 else 0
                    gl = 0.0
                    for j in range(N):
                        if l[j] > 0:
                            gl += (l[j] - E) ** 2 / 2.0 / num
                    out += gl
        loss += var_weight * out / B
    return loss


if __name__ == "__main__":
    key = jax.random.PRNGKey(0)
    k1, k2, k3, k4, k5 = jax.random.split(key, 5)

    B, K, H, W = 2, 16, 16, 16
    output = jax.random.normal(k1, (B, 1, H, W), jnp.float32)
    ind = jax.random.randint(k2, (B, K), 0, H * W, jnp.int32)
    target = jax.random.uniform(k3, (B, K, 1), jnp.float32, 0.0, 2.0)
    # sample 0 supervised (reg loss active), sample 1 unsupervised (var loss active)
    mask_row0 = (jax.random.uniform(k4, (1, K)) > 0.5).astype(jnp.float32)
    mask = jnp.concatenate([mask_row0, jnp.zeros((1, K), jnp.float32)], axis=0)
    gt_2d = jax.random.uniform(k5, (B, K, 2), jnp.float32, 0.0, 10.0)

    reg_weight, var_weight = 1.0, 0.01

    loss = fusion_loss(output, mask, ind, target, gt_2d, reg_weight, var_weight)
    loss = jax.block_until_ready(loss)

    ref = ref_fusion_loss(np.asarray(output), np.asarray(mask), np.asarray(ind),
                          np.asarray(target), np.asarray(gt_2d), reg_weight, var_weight)
    assert np.allclose(float(loss), ref, rtol=1e-4, atol=1e-5), (float(loss), ref)
    print("KERNEL_OK")
</pallas_src>

<mosaic_0001>
module attributes {stable_mosaic.version = 11 : i64} {
  func.func @_fusion_loss_kernel(%arg0: i32, %arg1: memref<1x2x128xf32, #tpu.memory_space<vmem>>, %arg2: memref<1x1x16xi32, #tpu.memory_space<vmem>>, %arg3: memref<1x1x16xi32, #tpu.memory_space<vmem>>, %arg4: memref<1x1x16xf32, #tpu.memory_space<vmem>>, %arg5: memref<1x1x16xf32, #tpu.memory_space<vmem>>, %arg6: memref<1x1x16xf32, #tpu.memory_space<vmem>>, %arg7: memref<1x1x16xf32, #tpu.memory_space<vmem>>, %arg8: memref<16x128xf32, #tpu.memory_space<vmem>>, %arg9: memref<16x128xf32, #tpu.memory_space<vmem>>, %arg10: memref<1x128xf32, #tpu.memory_space<vmem>>, %arg11: memref<128x128xf32, #tpu.memory_space<vmem>>, %arg12: memref<128x128xf32, #tpu.memory_space<vmem>>, %arg13: memref<1x1x128xf32, #tpu.memory_space<vmem>>) attributes {dimension_semantics = [#tpu.dimension_semantics<parallel>], iteration_bounds = array<i64: 2>, scalar_prefetch = 0 : i64, scratch_operands = 0 : i64, tpu.core_type = #tpu.core_type<tc>, window_params = [{transform_indices = @transform_0, window_bounds = array<i64: 1, 2, 128>}, {transform_indices = @transform_1, window_bounds = array<i64: 1, 1, 16>}, {transform_indices = @transform_2, window_bounds = array<i64: 1, 1, 16>}, {transform_indices = @transform_3, window_bounds = array<i64: 1, 1, 16>}, {transform_indices = @transform_4, window_bounds = array<i64: 1, 1, 16>}, {transform_indices = @transform_5, window_bounds = array<i64: 1, 1, 16>}, {transform_indices = @transform_6, window_bounds = array<i64: 1, 1, 16>}, {pipeline_mode = #tpu.pipeline_mode<synchronous>, transform_indices = @transform_7, window_bounds = array<i64: 16, 128>}, {pipeline_mode = #tpu.pipeline_mode<synchronous>, transform_indices = @transform_8, window_bounds = array<i64: 16, 128>}, {pipeline_mode = #tpu.pipeline_mode<synchronous>, transform_indices = @transform_9, window_bounds = array<i64: 1, 128>}, {pipeline_mode = #tpu.pipeline_mode<synchronous>, transform_indices = @transform_10, window_bounds = array<i64: 128, 128>}, {pipeline_mode = #tpu.pipeline_mode<synchronous>, transform_indices = @transform_11, window_bounds = array<i64: 128, 128>}, {transform_indices = @transform_12, window_bounds = array<i64: 1, 1, 128>}]} {
    %c0 = arith.constant 0 : index
    %c0_0 = arith.constant 0 : index
    %c0_1 = arith.constant 0 : index
    %0 = vector.load %arg1[%c0, %c0_0, %c0_1] : memref<1x2x128xf32, #tpu.memory_space<vmem>>, vector<1x2x128xf32>
    %1 = vector.shape_cast %0 : vector<1x2x128xf32> to vector<2x128xf32>
    %c0_2 = arith.constant 0 : index
    %c0_3 = arith.constant 0 : index
    %c0_4 = arith.constant 0 : index
    %2 = vector.load %arg2[%c0_2, %c0_3, %c0_4] : memref<1x1x16xi32, #tpu.memory_space<vmem>>, vector<1x1x16xi32>
    %3 = vector.shape_cast %2 : vector<1x1x16xi32> to vector<1x16xi32>
    %c0_5 = arith.constant 0 : index
    %c0_6 = arith.constant 0 : index
    %c0_7 = arith.constant 0 : index
    %4 = vector.load %arg3[%c0_5, %c0_6, %c0_7] : memref<1x1x16xi32, #tpu.memory_space<vmem>>, vector<1x1x16xi32>
    %5 = vector.shape_cast %4 : vector<1x1x16xi32> to vector<1x16xi32>
    %c0_8 = arith.constant 0 : index
    %c0_9 = arith.constant 0 : index
    %c0_10 = arith.constant 0 : index
    %6 = vector.load %arg4[%c0_8, %c0_9, %c0_10] : memref<1x1x16xf32, #tpu.memory_space<vmem>>, vector<1x1x16xf32>
    %7 = vector.shape_cast %6 : vector<1x1x16xf32> to vector<1x16xf32>
    %c0_11 = arith.constant 0 : index
    %c0_12 = arith.constant 0 : index
    %c0_13 = arith.constant 0 : index
    %8 = vector.load %arg5[%c0_11, %c0_12, %c0_13] : memref<1x1x16xf32, #tpu.memory_space<vmem>>, vector<1x1x16xf32>
    %9 = vector.shape_cast %8 : vector<1x1x16xf32> to vector<1x16xf32>
    %10 = tpu.iota {dimensions = array<i32: 0>} : vector<128x16xi32>
    %11 = vector.broadcast %5 : vector<1x16xi32> to vector<128x16xi32>
    %12 = arith.cmpi eq, %10, %11 : vector<128x16xi32>
    %13 = arith.extui %12 : vector<128x16xi1> to vector<128x16xi32>
    %14 = arith.sitofp %13 : vector<128x16xi32> to vector<128x16xf32>
    %cst = arith.constant dense<0.000000e+00> : vector<2x16xf32>
    %15 = tpu.matmul %1, %14, %cst {dimension_numbers = #tpu.dot_dimension_numbers<[1], [0], [0], [1], [0, 0, 1, 1], [], []>, precision = #tpu.contract_precision<fp32>} : vector<2x128xf32>, vector<128x16xf32>, vector<2x16xf32> -> vector<2x16xf32>
    %16 = tpu.iota {dimensions = array<i32: 0>} : vector<2x16xi32>
    %17 = vector.broadcast %3 : vector<1x16xi32> to vector<2x16xi32>
    %18 = arith.cmpi eq, %16, %17 : vector<2x16xi32>
    %19 = arith.extui %18 : vector<2x16xi1> to vector<2x16xi32>
    %20 = arith.sitofp %19 : vector<2x16xi32> to vector<2x16xf32>
    %21 = arith.mulf %15, %20 : vector<2x16xf32>
    %cst_14 = arith.constant dense<0.000000e+00> : vector<16xf32>
    %22 = vector.multi_reduction <add>, %21, %cst_14 [0] : vector<2x16xf32> to vector<16xf32>
    %23 = vector.shape_cast %22 : vector<16xf32> to vector<1x16xf32>
    %24 = vector.shape_cast %9 : vector<1x16xf32> to vector<1x1x16xf32>
    %cst_15 = arith.constant dense<0.000000e+00> : vector<1xf32>
    %25 = vector.multi_reduction <add>, %24, %cst_15 [1, 2] : vector<1x1x16xf32> to vector<1xf32>
    %26 = vector.shape_cast %25 : vector<1xf32> to vector<1x1x1xf32>
    %27 = vector.extract %26[0, 0, 0] : f32 from vector<1x1x1xf32>
    %28 = arith.subf %23, %7 : vector<1x16xf32>
    %29 = arith.mulf %28, %9 : vector<1x16xf32>
    %30 = math.absf %29 : vector<1x16xf32>
    %cst_16 = arith.constant 1.000000e+00 : f32
    %31 = vector.broadcast %cst_16 : f32 to vector<1x16xf32>
    %32 = arith.cmpf olt, %30, %31 : vector<1x16xf32>
    %cst_17 = arith.constant 5.000000e-01 : f32
    %33 = vector.broadcast %cst_17 : f32 to vector<1x16xf32>
    %34 = arith.mulf %33, %29 : vector<1x16xf32>
    %35 = arith.mulf %34, %29 : vector<1x16xf32>
    %cst_18 = arith.constant 5.000000e-01 : f32
    %36 = vector.broadcast %cst_18 : f32 to vector<1x16xf32>
    %37 = arith.subf %30, %36 : vector<1x16xf32>
    %38 = arith.select %32, %35, %37 : vector<1x16xi1>, vector<1x16xf32>
    %39 = vector.shape_cast %38 : vector<1x16xf32> to vector<1x1x16xf32>
    %cst_19 = arith.constant dense<0.000000e+00> : vector<1xf32>
    %40 = vector.multi_reduction <add>, %39, %cst_19 [1, 2] : vector<1x1x16xf32> to vector<1xf32>
    %41 = vector.shape_cast %40 : vector<1xf32> to vector<1x1x1xf32>
    %42 = vector.extract %41[0, 0, 0] : f32 from vector<1x1x1xf32>
    %c0_20 = arith.constant 0 : index
    %c0_21 = arith.constant 0 : index
    %c0_22 = arith.constant 0 : index
    %43 = vector.load %arg6[%c0_20, %c0_21, %c0_22] : memref<1x1x16xf32, #tpu.memory_space<vmem>>, vector<1x1x16xf32>
    %44 = vector.shape_cast %43 : vector<1x1x16xf32> to vector<1x16xf32>
    %c0_23 = arith.constant 0 : index
    %c0_24 = arith.constant 0 : index
    %c0_25 = arith.constant 0 : index
    %45 = vector.load %arg7[%c0_23, %c0_24, %c0_25] : memref<1x1x16xf32, #tpu.memory_space<vmem>>, vector<1x1x16xf32>
    %46 = vector.shape_cast %45 : vector<1x1x16xf32> to vector<1x16xf32>
    %c0_26 = arith.constant 0 : index
    %c0_27 = arith.constant 0 : index
    %47 = vector.load %arg8[%c0_26, %c0_27] : memref<16x128xf32, #tpu.memory_space<vmem>>, vector<16x128xf32>
    %c0_28 = arith.constant 0 : index
    %c0_29 = arith.constant 0 : index
    %48 = vector.load %arg9[%c0_28, %c0_29] : memref<16x128xf32, #tpu.memory_space<vmem>>, vector<16x128xf32>
    %c0_30 = arith.constant 0 : index
    %c0_31 = arith.constant 0 : index
    %49 = vector.load %arg10[%c0_30, %c0_31] : memref<1x128xf32, #tpu.memory_space<vmem>>, vector<1x128xf32>
    %c0_32 = arith.constant 0 : index
    %c0_33 = arith.constant 0 : index
    %50 = vector.load %arg11[%c0_32, %c0_33] : memref<128x128xf32, #tpu.memory_space<vmem>>, vector<128x128xf32>
    %c0_34 = arith.constant 0 : index
    %c0_35 = arith.constant 0 : index
    %51 = vector.load %arg12[%c0_34, %c0_35] : memref<128x128xf32, #tpu.memory_space<vmem>>, vector<128x128xf32>
    %cst_36 = arith.constant dense<0.000000e+00> : vector<1x128xf32>
    %52 = tpu.matmul %7, %47, %cst_36 {dimension_numbers = #tpu.dot_dimension_numbers<[1], [0], [0], [1], [0, 0, 1, 1], [], []>, precision = #tpu.contract_precision<fp32>} : vector<1x16xf32>, vector<16x128xf32>, vector<1x128xf32> -> vector<1x128xf32>
    %cst_37 = arith.constant dense<0.000000e+00> : vector<1x128xf32>
    %53 = tpu.matmul %7, %48, %cst_37 {dimension_numbers = #tpu.dot_dimension_numbers<[1], [0], [0], [1], [0, 0, 1, 1], [], []>, precision = #tpu.contract_precision<fp32>} : vector<1x16xf32>, vector<16x128xf32>, vector<1x128xf32> -> vector<1x128xf32>
    %cst_38 = arith.constant dense<0.000000e+00> : vector<1x128xf32>
    %54 = tpu.matmul %23, %47, %cst_38 {dimension_numbers = #tpu.dot_dimension_numbers<[1], [0], [0], [1], [0, 0, 1, 1], [], []>, precision = #tpu.contract_precision<fp32>} : vector<1x16xf32>, vector<16x128xf32>, vector<1x128xf32> -> vector<1x128xf32>
    %cst_39 = arith.constant dense<0.000000e+00> : vector<1x128xf32>
    %55 = tpu.matmul %23, %48, %cst_39 {dimension_numbers = #tpu.dot_dimension_numbers<[1], [0], [0], [1], [0, 0, 1, 1], [], []>, precision = #tpu.contract_precision<fp32>} : vector<1x16xf32>, vector<16x128xf32>, vector<1x128xf32> -> vector<1x128xf32>
    %cst_40 = arith.constant dense<0.000000e+00> : vector<1x128xf32>
    %56 = tpu.matmul %44, %47, %cst_40 {dimension_numbers = #tpu.dot_dimension_numbers<[1], [0], [0], [1], [0, 0, 1, 1], [], []>, precision = #tpu.contract_precision<fp32>} : vector<1x16xf32>, vector<16x128xf32>, vector<1x128xf32> -> vector<1x128xf32>
    %cst_41 = arith.constant dense<0.000000e+00> : vector<1x128xf32>
    %57 = tpu.matmul %44, %48, %cst_41 {dimension_numbers = #tpu.dot_dimension_numbers<[1], [0], [0], [1], [0, 0, 1, 1], [], []>, precision = #tpu.contract_precision<fp32>} : vector<1x16xf32>, vector<16x128xf32>, vector<1x128xf32> -> vector<1x128xf32>
    %cst_42 = arith.constant dense<0.000000e+00> : vector<1x128xf32>
    %58 = tpu.matmul %46, %47, %cst_42 {dimension_numbers = #tpu.dot_dimension_numbers<[1], [0], [0], [1], [0, 0, 1, 1], [], []>, precision = #tpu.contract_precision<fp32>} : vector<1x16xf32>, vector<16x128xf32>, vector<1x128xf32> -> vector<1x128xf32>
    %cst_43 = arith.constant dense<0.000000e+00> : vector<1x128xf32>
    %59 = tpu.matmul %46, %48, %cst_43 {dimension_numbers = #tpu.dot_dimension_numbers<[1], [0], [0], [1], [0, 0, 1, 1], [], []>, precision = #tpu.contract_precision<fp32>} : vector<1x16xf32>, vector<16x128xf32>, vector<1x128xf32> -> vector<1x128xf32>
    %cst_44 = arith.constant 5.000000e-01 : f32
    %60 = vector.broadcast %cst_44 : f32 to vector<1x128xf32>
    %61 = arith.cmpf ogt, %52, %60 : vector<1x128xf32>
    %cst_45 = arith.constant 5.000000e-01 : f32
    %62 = vector.broadcast %cst_45 : f32 to vector<1x128xf32>
    %63 = arith.cmpf ogt, %53, %62 : vector<1x128xf32>
    %64 = arith.andi %61, %63 : vector<1x128xi1>
    %65 = arith.extui %64 : vector<1x128xi1> to vector<1x128xi32>
    %66 = arith.sitofp %65 : vector<1x128xi32> to vector<1x128xf32>
    %67 = arith.subf %56, %57 : vector<1x128xf32>
    %68 = arith.mulf %67, %67 : vector<1x128xf32>
    %69 = arith.subf %58, %59 : vector<1x128xf32>
    %70 = arith.mulf %69, %69 : vector<1x128xf32>
    %71 = arith.addf %68, %70 : vector<1x128xf32>
    %72 = arith.subf %54, %55 : vector<1x128xf32>
    %73 = arith.mulf %72, %72 : vector<1x128xf32>
    %74 = arith.addf %71, %73 : vector<1x128xf32>
    %75 = math.sqrt %74 : vector<1x128xf32>
    %76 = arith.mulf %75, %49 : vector<1x128xf32>
    %77 = arith.mulf %76, %66 : vector<1x128xf32>
    %cst_46 = arith.constant dense<0.000000e+00> : vector<1x128xf32>
    %78 = tpu.matmul %66, %50, %cst_46 {dimension_numbers = #tpu.dot_dimension_numbers<[1], [0], [0], [1], [0, 0, 1, 1], [], []>, precision = #tpu.contract_precision<fp32>} : vector<1x128xf32>, vector<128x128xf32>, vector<1x128xf32> -> vector<1x128xf32>
    %cst_47 = arith.constant dense<0.000000e+00> : vector<1x128xf32>
    %79 = tpu.matmul %77, %50, %cst_47 {dimension_numbers = #tpu.dot_dimension_numbers<[1], [0], [0], [1], [0, 0, 1, 1], [], []>, precision = #tpu.contract_precision<fp32>} : vector<1x128xf32>, vector<128x128xf32>, vector<1x128xf32> -> vector<1x128xf32>
    %cst_48 = arith.constant 5.000000e-01 : f32
    %80 = vector.broadcast %cst_48 : f32 to vector<1x128xf32>
    %81 = arith.cmpf oge, %78, %80 : vector<1x128xf32>
    %cst_49 = arith.constant 1.000000e+00 : f32
    %82 = vector.broadcast %cst_49 : f32 to vector<1x128xf32>
    %83 = arith.maximumf %78, %82 : vector<1x128xf32>
    %84 = arith.divf %79, %83 : vector<1x128xf32>
    %cst_50 = arith.constant 0.000000e+00 : f32
    %85 = vector.broadcast %cst_50 : f32 to vector<1x128xf32>
    %86 = arith.select %81, %84, %85 : vector<1x128xi1>, vector<1x128xf32>
    %cst_51 = arith.constant dense<0.000000e+00> : vector<1x128xf32>
    %87 = tpu.matmul %86, %51, %cst_51 {dimension_numbers = #tpu.dot_dimension_numbers<[1], [0], [0], [1], [0, 0, 1, 1], [], []>, precision = #tpu.contract_precision<fp32>} : vector<1x128xf32>, vector<128x128xf32>, vector<1x128xf32> -> vector<1x128xf32>
    %cst_52 = arith.constant dense<0.000000e+00> : vector<1x128xf32>
    %88 = tpu.matmul %78, %51, %cst_52 {dimension_numbers = #tpu.dot_dimension_numbers<[1], [0], [0], [1], [0, 0, 1, 1], [], []>, precision = #tpu.contract_precision<fp32>} : vector<1x128xf32>, vector<128x128xf32>, vector<1x128xf32> -> vector<1x128xf32>
    %cst_53 = arith.constant 1.000000e+00 : f32
    %89 = vector.broadcast %cst_53 : f32 to vector<1x128xf32>
    %90 = arith.maximumf %88, %89 : vector<1x128xf32>
    %cst_54 = arith.constant 0.000000e+00 : f32
    %91 = vector.broadcast %cst_54 : f32 to vector<1x128xf32>
    %92 = arith.cmpf ogt, %77, %91 : vector<1x128xf32>
    %93 = arith.subf %77, %87 : vector<1x128xf32>
    %94 = arith.mulf %93, %93 : vector<1x128xf32>
    %cst_55 = arith.constant 2.000000e+00 : f32
    %95 = vector.broadcast %cst_55 : f32 to vector<1x128xf32>
    %96 = arith.divf %94, %95 : vector<1x128xf32>
    %97 = arith.divf %96, %90 : vector<1x128xf32>
    %cst_56 = arith.constant 0.000000e+00 : f32
    %98 = vector.broadcast %cst_56 : f32 to vector<1x128xf32>
    %99 = arith.select %92, %97, %98 : vector<1x128xi1>, vector<1x128xf32>
    %cst_57 = arith.constant 0.000000e+00 : f32
    %100 = arith.cmpf oeq, %27, %cst_57 : f32
    %101 = arith.extui %100 : i1 to i32
    %102 = arith.sitofp %101 : i32 to f32
    %103 = vector.shape_cast %99 : vector<1x128xf32> to vector<1x1x128xf32>
    %cst_58 = arith.constant dense<0.000000e+00> : vector<1xf32>
    %104 = vector.multi_reduction <add>, %103, %cst_58 [1, 2] : vector<1x1x128xf32> to vector<1xf32>
    %105 = vector.shape_cast %104 : vector<1xf32> to vector<1x1x1xf32>
    %106 = vector.extract %105[0, 0, 0] : f32 from vector<1x1x1xf32>
    %107 = arith.mulf %106, %102 : f32
    %108 = tpu.iota {dimensions = array<i32: 1>} : vector<1x128xi32>
    %c0_i32 = arith.constant 0 : i32
    %109 = vector.broadcast %c0_i32 : i32 to vector<1x128xi32>
    %110 = arith.cmpi eq, %108, %109 : vector<1x128xi32>
    %cst_59 = arith.constant 0.000000e+00 : f32
    %111 = vector.broadcast %42 : f32 to vector<1x128xf32>
    %112 = vector.broadcast %cst_59 : f32 to vector<1x128xf32>
    %113 = arith.select %110, %111, %112 : vector<1x128xi1>, vector<1x128xf32>
    %c1_i32 = arith.constant 1 : i32
    %114 = vector.broadcast %c1_i32 : i32 to vector<1x128xi32>
    %115 = arith.cmpi eq, %108, %114 : vector<1x128xi32>
    %cst_60 = arith.constant 0.000000e+00 : f32
    %116 = vector.broadcast %27 : f32 to vector<1x128xf32>
    %117 = vector.broadcast %cst_60 : f32 to vector<1x128xf32>
    %118 = arith.select %115, %116, %117 : vector<1x128xi1>, vector<1x128xf32>
    %119 = arith.addf %113, %118 : vector<1x128xf32>
    %c2_i32 = arith.constant 2 : i32
    %120 = vector.broadcast %c2_i32 : i32 to vector<1x128xi32>
    %121 = arith.cmpi eq, %108, %120 : vector<1x128xi32>
    %cst_61 = arith.constant 0.000000e+00 : f32
    %122 = vector.broadcast %107 : f32 to vector<1x128xf32>
    %123 = vector.broadcast %cst_61 : f32 to vector<1x128xf32>
    %124 = arith.select %121, %122, %123 : vector<1x128xi1>, vector<1x128xf32>
    %125 = arith.addf %119, %124 : vector<1x128xf32>
    %c0_62 = arith.constant 0 : index
    %c0_63 = arith.constant 0 : index
    %c0_64 = arith.constant 0 : index
    %126 = vector.load %arg13[%c0_62, %c0_63, %c0_64] : memref<1x1x128xf32, #tpu.memory_space<vmem>>, vector<1x1x128xf32>
    %127 = vector.shape_cast %126 : vector<1x1x128xf32> to vector<1x128xf32>
    %128 = vector.shape_cast %125 : vector<1x128xf32> to vector<1x1x128xf32>
    tpu.vector_store %arg13[%c0_62, %c0_63, %c0_64], %128 {strides = array<i32>} : memref<1x1x128xf32, #tpu.memory_space<vmem>>, vector<1x1x128xf32>,
    return
  }
  func.func @transform_0(%arg0: i32) -> (i32, i32, i32) {
    %c0_i32 = arith.constant 0 : i32
    %c0_i32_0 = arith.constant 0 : i32
    %c0_i32_1 = arith.constant 0 : i32
    return %arg0, %c0_i32, %c0_i32_0 : i32, i32, i32
  }
  func.func @transform_1(%arg0: i32) -> (i32, i32, i32) {
    %c0_i32 = arith.constant 0 : i32
    %c0_i32_0 = arith.constant 0 : i32
    %c0_i32_1 = arith.constant 0 : i32
    return %arg0, %c0_i32, %c0_i32_0 : i32, i32, i32
  }
  func.func @transform_2(%arg0: i32) -> (i32, i32, i32) {
    %c0_i32 = arith.constant 0 : i32
    %c0_i32_0 = arith.constant 0 : i32
    %c0_i32_1 = arith.constant 0 : i32
    return %arg0, %c0_i32, %c0_i32_0 : i32, i32, i32
  }
  func.func @transform_3(%arg0: i32) -> (i32, i32, i32) {
    %c0_i32 = arith.constant 0 : i32
    %c0_i32_0 = arith.constant 0 : i32
    %c0_i32_1 = arith.constant 0 : i32
    return %arg0, %c0_i32, %c0_i32_0 : i32, i32, i32
  }
  func.func @transform_4(%arg0: i32) -> (i32, i32, i32) {
    %c0_i32 = arith.constant 0 : i32
    %c0_i32_0 = arith.constant 0 : i32
    %c0_i32_1 = arith.constant 0 : i32
    return %arg0, %c0_i32, %c0_i32_0 : i32, i32, i32
  }
  func.func @transform_5(%arg0: i32) -> (i32, i32, i32) {
    %c0_i32 = arith.constant 0 : i32
    %c0_i32_0 = arith.constant 0 : i32
    %c0_i32_1 = arith.constant 0 : i32
    return %arg0, %c0_i32, %c0_i32_0 : i32, i32, i32
  }
  func.func @transform_6(%arg0: i32) -> (i32, i32, i32) {
    %c0_i32 = arith.constant 0 : i32
    %c0_i32_0 = arith.constant 0 : i32
    %c0_i32_1 = arith.constant 0 : i32
    return %arg0, %c0_i32, %c0_i32_0 : i32, i32, i32
  }
  func.func @transform_7(%arg0: i32) -> (i32, i32) {
    %c0_i32 = arith.constant 0 : i32
    %c0_i32_0 = arith.constant 0 : i32
    %c0_i32_1 = arith.constant 0 : i32
    return %c0_i32, %c0_i32_0 : i32, i32
  }
  func.func @transform_8(%arg0: i32) -> (i32, i32) {
    %c0_i32 = arith.constant 0 : i32
    %c0_i32_0 = arith.constant 0 : i32
    %c0_i32_1 = arith.constant 0 : i32
    return %c0_i32, %c0_i32_0 : i32, i32
  }
  func.func @transform_9(%arg0: i32) -> (i32, i32) {
    %c0_i32 = arith.constant 0 : i32
    %c0_i32_0 = arith.constant 0 : i32
    %c0_i32_1 = arith.constant 0 : i32
    return %c0_i32, %c0_i32_0 : i32, i32
  }
  func.func @transform_10(%arg0: i32) -> (i32, i32) {
    %c0_i32 = arith.constant 0 : i32
    %c0_i32_0 = arith.constant 0 : i32
    %c0_i32_1 = arith.constant 0 : i32
    return %c0_i32, %c0_i32_0 : i32, i32
  }
  func.func @transform_11(%arg0: i32) -> (i32, i32) {
    %c0_i32 = arith.constant 0 : i32
    %c0_i32_0 = arith.constant 0 : i32
    %c0_i32_1 = arith.constant 0 : i32
    return %c0_i32, %c0_i32_0 : i32, i32
  }
  func.func @transform_12(%arg0: i32) -> (i32, i32, i32) {
    %c0_i32 = arith.constant 0 : i32
    %c0_i32_0 = arith.constant 0 : i32
    %c0_i32_1 = arith.constant 0 : i32
    return %arg0, %c0_i32, %c0_i32_0 : i32, i32, i32
  }
}

</mosaic_0001>

<bundles_post_ra>
// kernel: tpu_custom_call.1
= control target key start
LH: loop header
LB: loop body
LE: loop exit
PB: predicated region body
PF: predicated region fallthrough
CT: control target
= control target key end

     0   :  { %s13616_s0 = inlined_call_operand.hbm [shape: f32[2,2,128], index: 0, kind: input, shape index: {}]   ;;  %s13617_s1 = inlined_call_operand.vmem [shape: s32[2,1,16], index: 1, kind: input, shape index: {}]   ;;  %s13618_s2 = inlined_call_operand.vmem [shape: s32[2,1,16], index: 2, kind: input, shape index: {}]   ;;  %s13619_s3 = inlined_call_operand.vmem [shape: f32[2,1,16], index: 3, kind: input, shape index: {}]   ;;  %s13620_s4 = inlined_call_operand.vmem [shape: f32[2,1,16], index: 4, kind: input, shape index: {}]   ;;  %s13621_s5 = inlined_call_operand.vmem [shape: f32[2,1,16], index: 5, kind: input, shape index: {}]   ;;  %s13622_s6 = inlined_call_operand.hbm [shape: f32[2,1,16], index: 6, kind: input, shape index: {}]   ;;  %s13623_s7 = inlined_call_operand.vmem [shape: f32[16,128], index: 7, kind: input, shape index: {}]   ;;  %s13624_s8 = inlined_call_operand.hbm [shape: f32[16,128], index: 8, kind: input, shape index: {}]   ;;  %s13625_s9 = inlined_call_operand.vmem [shape: f32[1,128], index: 9, kind: input, shape index: {}]   ;;  %s13626_s10 = inlined_call_operand.hbm [shape: f32[128,128], index: 10, kind: input, shape index: {}]   ;;  %s13627_s11 = inlined_call_operand.hbm [shape: f32[128,128], index: 11, kind: input, shape index: {}]   ;;  %s13628_s12 = inlined_call_operand.hbm [shape: f32[2,1,128], index: 12, kind: output, shape index: {}]  }
   0x1   :  { %13688 = sst [smem:[#allocation22_spill]] %s13616_s0 }
   0x2   :  { %13689 = sst [smem:[#allocation23_spill]] %s13617_s1 }
   0x3   :  { %13690 = sst [smem:[#allocation24_spill]] %s13621_s5 }
   0x4   :  { %13691 = sst [smem:[#allocation25_spill]] %s13625_s9 }
   0x5   :  { %13692 = sst [smem:[#allocation26_spill]] %s13628_s12 }
   0x6   :  { %17 = vsyncpa [#allocation3], 0 }
   0x7   :  { %19 = vsyncpa [#allocation3 + $0x1], 0 }
   0x8   :  { %20 = vsyncpa [#allocation6], 0 }
   0x9   :  { %22 = vsyncpa [#allocation6 + $0x1], 0 }
   0xa   :  { %23 = vsyncpa [#allocation9], 0 }
   0xb   :  { %24 = vsyncpa [#allocation4], 0 }
   0xc   :  { %26 = vsyncpa [#allocation4 + $0x1], 0  ;;  %s11386_s21 = smov 0   ;;  %s11388_s22 = smov 0  }
   0xd   :  { %s11390_s23 = smov 0   ;;  %s11392_s24 = smov 0  }
   0xe LB: > { %13693 = sst [smem:[#allocation17_spill]] %s11294_s21  ;;  %s11407_s25 = sadd.s32 4294967295, %s11306_s24   ;;  %s11306_s24 = sphi %s11392_s24, %s13794_s24   ;;  %s11302_s23 = sphi %s11390_s23, %s13793_s23   ;;  %s11298_s22 = sphi %s11388_s22, %s13792_s22   ;;  %s11294_s21 = sphi %s11386_s21, %s13791_s21  }
   0xf   : > { %s7860_s26 = sadd.s32 4294967294, %s11306_s24   ;;  %p52_p0 = scmp.ne.s32.totalorder %s11298_s22, %s11294_s21 }
  0x10   : > { %p13631_p1 = scmp.eq.s32.totalorder %s11407_s25, 0  ;;  %p343_p3 = scmp.eq.s32.totalorder %s7860_s26, 1 }
  0x11   : > { %p7861_p5 = scmp.ge.s32.totalorder %s11306_s24, 1  ;;  %p350_p7 = scmp.lt.s32.totalorder %s11306_s24, 3 }
  0x12   : > { %p11416_p4 = por %p13631_p1, %p52_p0  ;;  %p11421_p6 = por %p343_p3, %p52_p0 }
  0x13   : > { %p11426_p8 = pnand %p7861_p5, %p350_p7  ;;  %s11308_s30 = smov [#allocation7]  }
  0x14   : > { %s13694_s27 = scalar_select %p11416_p4, 1, 0 }
  0x15   : > { %s13695_s28 = scalar_select %p11421_p6, 1, 0 }
  0x16   : > { %s13697_s29 = scalar_select %p11426_p8, 1, 0 }
  0x17   : > { %13696 = sst [smem:[#allocation18_spill]] %s13695_s28  ;;  %s365_s13 = sshll.u32 %s11308_s30, 4  ;;  %s11430_s13 = int_to_ptr.vmem [resolvable:$true] %s365_s13 }
  0x18   : > { %p11007_p9 = pneg %p11426_p8  ;;  %s11309_s15 = smov [#allocation8]  }
  0x19   : > { %s381_s16 = sshll.u32 %s11309_s15, 4  ;;  %s11310_s17 = smov [#allocation10]   ;;  %s11441_s16 = int_to_ptr.vmem [resolvable:$true] %s381_s16 }
  0x1a   : > { %p11437_p11 = pnand %p11007_p9, %p13631_p1  ;;  %s11443_s18 = sshll.u32 %s11310_s17, 4  ;;  %s395_s18 = int_to_ptr.vmem [resolvable:$true] %s11443_s18 }
  0x1b   : > { %s11084_s26 = scalar_lea.hbm %s13624_s8, 256 }
  0x1c   : > { %p11085_p12 = scmp.ne.s32.totalorder %s13624_s8, %s11084_s26  ;;  %p11453_p13 = pneg %p11437_p11 }
  0x1d   : > { %p11091_p5 = scmp.lt.u32.totalorder %s11084_s26, %s13624_s8 }
  0x1e   : > { %p11087_p0 = pnand %p11453_p13, %p11085_p12 }
  0x20   : > { %p11088_p3 = pneg %p11087_p0 }
  0x22   : > { %p11093_p7 = pnand %p11091_p5, %p11088_p3 }
  0x24   : > { %11096 = shalt.err (!%p11093_p7)
}
  0x25   : > { %s11097_s28 = scalar_lea.vmem %s11430_s13, 256  ;;  %p11105_p2 = scmp.lt.s32.totalorder %s11430_s13, %s11430_s13 }
  0x26   : > { %p11098_p9 = scmp.ne.s32.totalorder %s11430_s13, %s11097_s28  ;;  %p11106_p6 = scmp.lt.s32.totalorder %s11097_s28, %s11097_s28 }
  0x28   : > { %p11100_p10 = pnand %p11098_p9, %p11453_p13  ;;  %p11107_p12 = por %p11106_p6, %p11105_p2 }
  0x2a   : > { %p11101_p1 = pneg %p11100_p10 }
  0x2c   : > { %p11108_p0 = pnand %p11107_p12, %p11101_p1 }
  0x2e   : > { %11111 = shalt.err (!%p11108_p0)
}
  0x2f   : > { %s11311_s19 = smov 128   ;;  %s11312_s20 = smov 8  }
  0x30   : > { %11010 = dma.hbm_to_vmem [thread:$0]  (!%p11437_p11), %s13624_s8, 256, %s11430_s13, [#allocation6], %s11311_s19, %s11311_s19, %s11312_s20  }
  0x31   : > { %s11112_s28 = scalar_lea.hbm %s13626_s10, 2048 }
  0x32   : > { %p11113_p1 = scmp.ne.s32.totalorder %s13626_s10, %s11112_s28  ;;  %p11119_p10 = scmp.lt.u32.totalorder %s11112_s28, %s13626_s10 }
  0x34   : > { %p11115_p2 = pnand %p11113_p1, %p11453_p13 }
  0x36   : > { %p11116_p6 = pneg %p11115_p2 }
  0x38   : > { %p11121_p3 = pnand %p11119_p10, %p11116_p6 }
  0x3a   : > { %11124 = shalt.err (!%p11121_p3)
}
  0x3b   : > { %s11125_s13 = scalar_lea.vmem %s11441_s16, 2048  ;;  %p11133_p12 = scmp.lt.s32.totalorder %s11441_s16, %s11441_s16 }
  0x3c   : > { %p11126_p5 = scmp.ne.s32.totalorder %s11441_s16, %s11125_s13  ;;  %p11134_p0 = scmp.lt.s32.totalorder %s11125_s13, %s11125_s13 }
  0x3e   : > { %p11128_p7 = pnand %p11126_p5, %p11453_p13  ;;  %p11135_p1 = por %p11134_p0, %p11133_p12 }
  0x40   : > { %p11129_p9 = pneg %p11128_p7 }
  0x42   : > { %p11136_p2 = pnand %p11135_p1, %p11129_p9 }
  0x44   : > { %11139 = shalt.err (!%p11136_p2)
}
  0x45   : > { %11013 = dma.hbm_to_vmem [thread:$0]  (!%p11437_p11), %s13626_s10, 2048, %s11441_s16, [#allocation9], %s11311_s19, %s11311_s19, %s11312_s20  }
  0x46   : > { %s11140_s26 = scalar_lea.hbm %s13627_s11, 2048 }
  0x47   : > { %p11141_p6 = scmp.ne.s32.totalorder %s13627_s11, %s11140_s26  ;;  %p11147_p5 = scmp.lt.u32.totalorder %s11140_s26, %s13627_s11 }
  0x49   : > { %p11143_p10 = pnand %p11141_p6, %p11453_p13 }
  0x4b   : > { %p11144_p3 = pneg %p11143_p10 }
  0x4d   : > { %p11149_p7 = pnand %p11147_p5, %p11144_p3 }
  0x4f   : > { %11152 = shalt.err (!%p11149_p7)
}
  0x50   : > { %s11153_s13 = scalar_lea.vmem %s395_s18, 2048  ;;  %p11161_p1 = scmp.lt.s32.totalorder %s395_s18, %s395_s18 }
  0x51   : > { %p11154_p9 = scmp.ne.s32.totalorder %s395_s18, %s11153_s13  ;;  %p11162_p2 = scmp.lt.s32.totalorder %s11153_s13, %s11153_s13 }
  0x53   : > { %p11156_p12 = pnand %p11154_p9, %p11453_p13  ;;  %p11163_p4 = por %p11162_p2, %p11161_p1 }
  0x55   : > { %p11157_p0 = pneg %p11156_p12 }
  0x57   : > { %p11164_p8 = pnand %p11163_p4, %p11157_p0 }
  0x59   : > { %11167 = shalt.err (!%p11164_p8)
}
  0x5a   : > { %11016 = dma.hbm_to_vmem [thread:$0]  (!%p11437_p11), %s13627_s11, 2048, %s395_s18, [#allocation9], %s11311_s19, %s11311_s19, %s11312_s20  }
  0x5b   : > { %s11526_s21 = sadd.s32 1, %s11306_s24   ;;  %s39_s5 = sadd.s32 1, %s11302_s23 }
  0x5c   : > { %s36_s14 = ssub.s32 %s11306_s24, %s11526_s21  ;;  %p46_p8 = scmp.ne.s32.totalorder %s11302_s23, %s11298_s22 }
  0x5d   : > { %p37_p4 = scmp.eq.s32.totalorder %s36_s14, 0  ;;  %p47_p13 = scmp.eq.s32.totalorder %s11306_s24, 0 }
  0x5e   : > { %p11031_p6 = scmp.lt.s32.totalorder %s11306_s24, 2  ;;  %p13700_p3 = scmp.eq.s32.totalorder %s11407_s25, 1 }
  0x5f   : > { %s11536_s9 = scalar_select %p37_p4, %s11302_s23, %s39_s5  }
  0x60   : > { %p48_p10 = por %p47_p13, %p46_p8  ;;  %p11540_p5 = por %p13700_p3, %p46_p8 }
  0x61   : > { %s11545_s26 = sand.u32 1, %s11302_s23   ;;  %s7867_s18 = sshll.u32 %s11306_s24, 5 }
  0x62   : > { %s13701_s12 = scalar_select %p11540_p5, 1, 0 }
  0x63   : > { %s7866_s19 = sshll.u32 %s11545_s26, 1  ;;  %s13702_s0 = sld [smem:[#allocation22_spill]] }
  0x64   : > { %s412_s17 = scalar_lea.vmem [#allocation2], %s7866_s19  ;;  %p11554_p11 = pnand %p11031_p6, %p48_p10 }
  0x65   : > { %s419_s28 = sshll.u32 %s412_s17, 4  ;;  %s456_s16 = sand.u32 1, %s11306_s24   ;;  %s11558_s28 = int_to_ptr.vmem [resolvable:$true] %s419_s28 }
  0x66   : > { %s409_s1 = scalar_lea.sflag [#allocation3], %s11545_s26  ;;  %p11170_p9 = pneg %p11554_p11 }
  0x69   : > { %s11552_s15 = scalar_lea.hbm %s13702_s0, %s7867_s18  ;;  %s11173_s19 = scalar_lea.hbm %s13702_s0, 64 }
  0x6a   : > { %s11168_s14 = scalar_lea.hbm %s11552_s15, 32  ;;  %p11174_p1 = scmp.lt.u32.totalorder %s11552_s15, %s13702_s0 }
  0x6b   : > { %p11169_p7 = scmp.ne.s32.totalorder %s11552_s15, %s11168_s14  ;;  %p11175_p2 = scmp.lt.u32.totalorder %s11173_s19, %s11168_s14 }
  0x6c   : > { %p11177_p8 = scmp.lt.u32.totalorder %s11168_s14, %s11552_s15 }
  0x6d   : > { %p11171_p12 = pnand %p11170_p9, %p11169_p7  ;;  %p11176_p4 = por %p11175_p2, %p11174_p1 }
  0x6f   : > { %p11172_p0 = pneg %p11171_p12  ;;  %p11178_p13 = por %p11177_p8, %p11176_p4 }
  0x71   : > { %p11179_p6 = pnand %p11178_p13, %p11172_p0 }
  0x73   : > { %11182 = shalt.err (!%p11179_p6)
}
  0x74   : > { %s11183_s17 = scalar_lea.vmem %s11558_s28, 32  ;;  %s11313_s5 = smov [#allocation2]  }
  0x75   : > { %p11184_p10 = scmp.ne.s32.totalorder %s11558_s28, %s11183_s17  ;;  %s11188_s18 = sshll.u32 %s11313_s5, 4  ;;  %s11189_s18 = int_to_ptr.vmem [resolvable:$false] %s11188_s18 }
  0x76   : > { %s11190_s20 = scalar_lea.vmem %s11189_s18, 64  ;;  %p11191_p12 = scmp.lt.s32.totalorder %s11558_s28, %s11189_s18 }
  0x77   : > { %p11186_p3 = pnand %p11184_p10, %p11170_p9  ;;  %p11192_p1 = scmp.lt.s32.totalorder %s11190_s20, %s11183_s17 }
  0x79   : > { %p11187_p7 = pneg %p11186_p3  ;;  %p11193_p2 = por %p11192_p1, %p11191_p12 }
  0x7b   : > { %p11194_p4 = pnand %p11193_p2, %p11187_p7 }
  0x7d   : > { %11197 = shalt.err (!%p11194_p4)
}
  0x7e   : > { %11020 = dma.hbm_to_vmem [thread:$0]  (!%p11554_p11), %s11552_s15, 32, %s11558_s28, %s409_s1  }
  0x7f   : > { %s7868_s14 = sshll.u32 %s11306_s24, 4  ;;  %s459_s17 = scalar_lea.vmem [#allocation5], %s11545_s26 }
  0x80   : > { %s11591_s5 = scalar_lea.hbm %s13622_s6, %s7868_s14  ;;  %s466_s18 = sshll.u32 %s459_s17, 4  ;;  %s467_s18 = int_to_ptr.vmem [resolvable:$true] %s466_s18 }
  0x81   : > { %s457_s20 = scalar_lea.sflag [#allocation6], %s456_s16  ;;  %s11198_s0 = scalar_lea.hbm %s11591_s5, 16 }
  0x82   : > { %p11199_p0 = scmp.ne.s32.totalorder %s11591_s5, %s11198_s0  ;;  %s11203_s1 = scalar_lea.hbm %s13622_s6, 32 }
  0x83   : > { %p11204_p6 = scmp.lt.u32.totalorder %s11591_s5, %s13622_s6  ;;  %p11205_p10 = scmp.lt.u32.totalorder %s11203_s1, %s11198_s0 }
  0x84   : > { %p11201_p8 = pnand %p11199_p0, %p11170_p9  ;;  %p11207_p7 = scmp.lt.u32.totalorder %s11198_s0, %s11591_s5 }
  0x85   : > { %p11206_p3 = por %p11205_p10, %p11204_p6 }
  0x86   : > { %p11202_p13 = pneg %p11201_p8 }
  0x87   : > { %p11208_p12 = por %p11207_p7, %p11206_p3 }
  0x89   : > { %p11209_p1 = pnand %p11208_p12, %p11202_p13 }
  0x8b   : > { %11212 = shalt.err (!%p11209_p1)
}
  0x8c   : > { %s11213_s26 = scalar_lea.vmem %s467_s18, 16  ;;  %s11314_s16 = smov [#allocation5]  }
  0x8d   : > { %p11214_p2 = scmp.ne.s32.totalorder %s467_s18, %s11213_s26  ;;  %s11218_s30 = sshll.u32 %s11314_s16, 4  ;;  %s11219_s30 = int_to_ptr.vmem [resolvable:$false] %s11218_s30 }
  0x8e   : > { %s11220_s17 = scalar_lea.vmem %s11219_s30, 32  ;;  %p11221_p8 = scmp.lt.s32.totalorder %s467_s18, %s11219_s30 }
  0x8f   : > { %p11216_p4 = pnand %p11214_p2, %p11170_p9  ;;  %p11222_p5 = scmp.lt.s32.totalorder %s11220_s17, %s11213_s26 }
  0x91   : > { %p11217_p0 = pneg %p11216_p4  ;;  %p11223_p6 = por %p11222_p5, %p11221_p8 }
  0x93   : > { %p11224_p10 = pnand %p11223_p6, %p11217_p0 }
  0x95   : > { %11227 = shalt.err (!%p11224_p10)
}
  0x96   : > { %11023 = dma.hbm_to_vmem [thread:$0]  (!%p11554_p11), %s11591_s5, 16, %s467_s18, %s457_s20  }
  0x97   : > { %p13704_p13 = scmp.ne.s32.totalorder %s13697_s29, 0 }
  0x99   : > { %475 = sbr.rel (%p13704_p13) target bundleno = 2111 (0x83f), region = 68 }
  0xa0   : > { %s11618_s0 = sand.u32 1, %s11298_s22   ;;  %p13705_p5 = scmp.ne.s32.totalorder %s13694_s27, 0 }
  0xa1   : > { %s7870_s15 = sshll.u32 %s11618_s0, 1  ;;  %s478_s28 = scalar_lea.sflag [#allocation3], %s11618_s0 }
  0xa2   : > { %s11622_s1 = scalar_lea.vmem [#allocation2], %s7870_s15 }
  0xa3   : > { %11273 = dma.done.wait (%p13705_p5), %s478_s28, 32  }
  0xa4   : > { %11275 = vsyncadd (%p13705_p5), %s478_s28, 4294967264  ;;  %s486_s29 = sand.u32 1, %s11407_s25   ;;  %s489_s5 = scalar_lea.vmem [#allocation5], %s11618_s0 }
  0xa5   : > { %s487_s13 = scalar_lea.sflag [#allocation6], %s486_s29 }
  0xa6   : > { %11277 = dma.done.wait (%p13705_p5), %s487_s13, 16  }
  0xa7   : > { %11279 = vsyncadd (%p13705_p5), %s487_s13, 4294967280  ;;  %p13706_p11 = scmp.eq.s32.totalorder %s11407_s25, 0 }
  0xa9   : > { %11281 = dma.done.wait (%p13706_p11), [#allocation6], 256   ;;  %p13707_p9 = pmov %p13706_p11 }
  0xab   : > { %11283 = vsyncadd (%p13707_p9), [#allocation6], 4294967040  ;;  %p13708_p3 = pmov %p13707_p9 }
  0xad   : > { %11285 = dma.done.wait (%p13708_p3), [#allocation9], 4096   ;;  %p13709_p7 = pmov %p13708_p3 }
  0xae   : > { %p560_p12 = scmp.lt.s32.totalorder %s11407_s25, 1  ;;  %v13636_v0 = vlaneseq  ;;  %v13644_v1 = vmov 0.0|0.0   ;;  %vm11316_vm0 = vmmov 0   ;;  %v13642_v2 = vmov 0.0   ;;  %v575_v29 = vld [vmem:[%s11622_s1] sm:$0x3] }
  0xaf   : > { %11287 = vsyncadd (%p13709_p7), [#allocation9], 4294963200  ;;  %9989 = vmatprep.subr.bf16.mxu0 %v13644_v1  ;;  %8635 = vmatprep.mubr.msk.f32.mxu0 %vm11316_vm0, %v13642_v2  ;;  %v13638_v11 = vmov 1.0|1.0   ;;  %v11769_v40 = vand.u32 4294901760, %v575_v29  ;;  %v12211_v10 = vld [vmem:[#allocation8] sm:$0xff] }
  0xb0   : > { %s11647_s27 = scalar_select %p560_p12, %s11407_s25, 1  ;;  %v11650_v3 = vshrl.u32 %v13636_v0, 7  ;;  %10133 = vmatprep.subr.bf16.mxu1 %v13644_v1  ;;  %8817 = vmatprep.mubr.msk.f32.mxu1 %vm11316_vm0, %v13642_v2  ;;  %v12213_v12 = vld [vmem:[#allocation8 + $0x8] sm:$0xff]  ;;  %v5082_v17 = vand.u32 4294901760, %v12211_v10  ;;  %v12221_v38 = vld [vmem:[#allocation8 + $0x10] sm:$0xff] }
  0xb1   : > { %v11786_v46 = vsub.f32 %v575_v29, %v11769_v40  ;;  %v5085_v24 = vand.u32 4294901760, %v12213_v12  ;;  %s13758_s30 = sld [smem:[#allocation24_spill]]  ;;  %s13759_s15 = sld [smem:[#allocation25_spill]] }
  0xb2   : > { %s565_s14 = scalar_lea.vmem %s13618_s2, %s11647_s27  ;;  %v582_v4 = vadd.s32 8, %v11650_v3  ;;  %v583_v5 = vadd.s32 16, %v11650_v3  ;;  %v584_v6 = vadd.s32 24, %v11650_v3  ;;  %v585_v8 = vadd.s32 32, %v11650_v3  ;;  %s568_s16 = scalar_lea.vmem %s13619_s3, %s11647_s27 }
  0xb3   : > { %v11662_v7 = vld [vmem:[%s565_s14] ss:$0 sm:$0xff]  ;;  %v586_v9 = vadd.s32 40, %v11650_v3  ;;  %v587_v13 = vadd.s32 48, %v11650_v3  ;;  %v588_v14 = vadd.s32 56, %v11650_v3  ;;  %v589_v18 = vadd.s32 64, %v11650_v3  ;;  %s571_s13 = scalar_lea.vmem %s13620_s4, %s11647_s27 }
  0xb4   : > { %vm601_vm1 = vcmp.eq.s32.totalorder %v11650_v3, %v11662_v7  ;;  %vm602_vm2 = vcmp.eq.s32.totalorder %v582_v4, %v11662_v7  ;;  %vm603_vm3 = vcmp.eq.s32.totalorder %v583_v5, %v11662_v7  ;;  %vm604_vm4 = vcmp.eq.s32.totalorder %v584_v6, %v11662_v7  ;;  %s13737_s14 = sld [smem:[#allocation23_spill]]  ;;  %p13785_p4 = scmp.ne.s32.totalorder %s13701_s12, 0 }
  0xb5   : > { %vm11671_vm5 = vmpackc.low %vm602_vm2, %vm601_vm1  ;;  %vm605_vm7 = vcmp.eq.s32.totalorder %v585_v8, %v11662_v7  ;;  %vm606_vm8 = vcmp.eq.s32.totalorder %v586_v9, %v11662_v7  ;;  %v7875_v15 = vsel %vm601_vm1, 1.0, %v13642_v2  ;;  %v7876_v16 = vsel %vm602_vm2, 1.0, %v13642_v2 }
  0xb6   : > { %9991 = vmatpush3.bf16.msk.msra.mxu0 %vm11671_vm5, %v13638_v11  ;;  %vm11683_vm6 = vmpackc.low %vm604_vm4, %vm603_vm3  ;;  %v11706_v19 = vsub.f32 %v7875_v15, %v7875_v15  ;;  %vm607_vm10 = vcmp.eq.s32.totalorder %v587_v13, %v11662_v7  ;;  %vm608_vm11 = vcmp.eq.s32.totalorder %v588_v14, %v11662_v7  ;;  %v590_v20 = vadd.s32 72, %v11650_v3 }
  0xb7   : > { %9992 = vmatprep.subr.bf16.mxu0 %v13644_v1  ;;  %vm11701_vm9 = vmpackc.low %vm606_vm8, %vm605_vm7  ;;  %v11711_v21 = vsub.f32 %v7876_v16, %v7876_v16  ;;  %v7877_v22 = vsel %vm603_vm3, 1.0, %v13642_v2  ;;  %v7878_v23 = vsel %vm604_vm4, 1.0, %v13642_v2  ;;  %v591_v25 = vadd.s32 80, %v11650_v3  ;;  %s574_s17 = scalar_lea.vmem %s13758_s30, %s11647_s27 }
  0xb8   : > { %vm11727_vm12 = vmpackc.low %vm608_vm11, %vm607_vm10  ;;  %v592_v26 = vadd.s32 88, %v11650_v3  ;;  %v743_v27 = vand.u32 4294901760, %v11706_v19  ;;  %v11734_v28 = vsub.f32 %v7877_v22, %v7877_v22  ;;  %vm609_vm13 = vcmp.eq.s32.totalorder %v589_v18, %v11662_v7 }
  0xb9   : > { %vm610_vm14 = vcmp.eq.s32.totalorder %v590_v20, %v11662_v7  ;;  %v750_v30 = vand.u32 4294901760, %v11711_v21  ;;  %v593_v31 = vadd.s32 96, %v11650_v3  ;;  %v11741_v32 = vsub.f32 %v7878_v23, %v7878_v23 }
  0xba   : > { %9994 = vmatpush3.bf16.msk.msra.mxu0 %vm11683_vm6, %v13638_v11  ;;  %v7879_v33 = vsel %vm605_vm7, 1.0, %v13642_v2  ;;  %v594_v34 = vadd.s32 104, %v11650_v3  ;;  %v11751_v35 = vadd.s32 112, %v11650_v3  ;;  %v7880_v36 = vsel %vm606_vm8, 1.0, %v13642_v2  ;;  %vm11764_vm15 = vmpackc.low %vm610_vm14, %vm609_vm13  ;;  %s562_s19 = scalar_lea.vmem %s13737_s14, %s11647_s27  ;;  %s7946_s14 = sshll.u32 %s11407_s25, 4 }
  0xbb   : > { %9995 = vmatprep.subr.bf16.mxu0 %v13644_v1  ;;  %v7881_v37 = vsel %vm607_vm10, 1.0, %v13642_v2  ;;  %v596_v39 = vadd.s32 120, %v11650_v3  ;;  %v744_v41 = vsub.f32 %v11706_v19, %v743_v27  ;;  %v757_v42 = vand.u32 4294901760, %v11734_v28  ;;  %s7689_s27 = scalar_lea.sflag [#allocation4], %s11618_s0  ;;  %s11320_s25 = smov [#allocation11]  }
  0xbc   : > { %vm611_vm1 = vcmp.eq.s32.totalorder %v591_v25, %v11662_v7  ;;  %vm612_vm2 = vcmp.eq.s32.totalorder %v592_v26, %v11662_v7  ;;  %v751_v43 = vsub.f32 %v11711_v21, %v750_v30  ;;  %v11780_v44 = vsub.f32 %v7879_v33, %v7879_v33  ;;  %v1337_v25 = vld [vmem:[%s13623_s7] sm:$0xff]  ;;  %v1338_v26 = vld [vmem:[%s13623_s7 + $0x8] sm:$0xff] }
  0xbd   : > { %v7882_v45 = vsel %vm608_vm11, 1.0, %v13642_v2  ;;  %v764_v47 = vand.u32 4294901760, %v11741_v32  ;;  %v11789_v48 = vsub.f32 %v7880_v36, %v7880_v36  ;;  %v11791_v49 = vsub.f32 %v7881_v37, %v7881_v37  ;;  %vm11813_vm4 = vmpackc.low %vm612_vm2, %vm611_vm1  ;;  %v11888_v36 = vld [vmem:[%s568_s16] sm:$0x1] }
  0xbe   : > { %9997 = vmatpush3.bf16.msk.msra.mxu0 %vm11701_vm9, %v13638_v11  ;;  %v7883_v50 = vsel %vm609_vm13, 1.0, %v13642_v2  ;;  %vm1374_vm3 = vcmask 130048   ;;  %v7884_v51 = vsel %vm610_vm14, 1.0, %v13642_v2  ;;  %v7885_v52 = vsel %vm611_vm1, 1.0, %v13642_v2 }
  0xbf   : > { %9998 = vmatprep.subr.bf16.mxu0 %v13644_v1  ;;  %v7886_v53 = vsel %vm612_vm2, 1.0, %v13642_v2  ;;  %vm613_vm7 = vcmp.eq.s32.totalorder %v593_v31, %v11662_v7  ;;  %v745_v55 = vand.u32 4294901760, %v744_v41  ;;  %v11818_v56 = vsub.f32 %v7882_v45, %v7882_v45 }
  0xc0   : > { %vm614_vm8 = vcmp.eq.s32.totalorder %v594_v34, %v11662_v7  ;;  %v7887_v57 = vsel %vm613_vm7, 1.0, %v13642_v2  ;;  %v752_v58 = vand.u32 4294901760, %v751_v43  ;;  %v771_v59 = vand.u32 4294901760, %v11780_v44 }
  0xc1   : > { %v11825_v60 = vsub.f32 %v7883_v50, %v7883_v50  ;;  %v13637_v61 = vand.u32 4294901760, %v11786_v46  ;;  %v778_v62 = vand.u32 4294901760, %v11789_v48  ;;  %v11829_v63 = vsub.f32 %v7884_v51, %v7884_v51  ;;  %vm11842_vm10 = vmpackc.low %vm614_vm8, %vm613_vm7 }
  0xc2   : > { %10000 = vmatpush3.bf16.msk.msra.mxu0 %vm11727_vm12, %v13638_v11  ;;  %v11834_v4 = vsub.f32 %v7885_v52, %v7885_v52  ;;  %v11836_v5 = vsub.f32 %v7886_v53, %v7886_v53  ;;  %v7888_v6 = vsel %vm614_vm8, 1.0, %v13642_v2  ;;  %v11846_v9 = vsub.f32 %v7887_v57, %v7887_v57 }
  0xc3   : > { %10001 = vmatprep.subr.bf16.mxu0 %v13644_v1  ;;  %vm615_vm11 = vcmp.eq.s32.totalorder %v11751_v35, %v11662_v7  ;;  %vm616_vm13 = vcmp.eq.s32.totalorder %v596_v39, %v11662_v7  ;;  %v785_v13 = vand.u32 4294901760, %v11791_v49  ;;  %v792_v14 = vand.u32 4294901760, %v11818_v56 }
  0xc4   : > { %v7889_v15 = vsel %vm615_vm11, 1.0, %v13642_v2  ;;  %v7890_v16 = vsel %vm616_vm13, 1.0, %v13642_v2  ;;  %v799_v18 = vand.u32 4294901760, %v11825_v60  ;;  %v733_v20 = vsub.f32 %v11786_v46, %v13637_v61  ;;  %vm11897_vm14 = vmpackc.low %vm616_vm13, %vm615_vm11 }
  0xc5   : > { %v758_v22 = vsub.f32 %v11734_v28, %v757_v42  ;;  %v765_v23 = vsub.f32 %v11741_v32, %v764_v47  ;;  %v806_v29 = vand.u32 4294901760, %v11829_v63  ;;  %v813_v31 = vand.u32 4294901760, %v11834_v4 }
  0xc6   : > { %10003 = vmatpush3.bf16.msk.msra.mxu0 %vm11764_vm15, %v13638_v11  ;;  %v820_v33 = vand.u32 4294901760, %v11836_v5  ;;  %v11886_v34 = vsub.f32 %v7888_v6, %v7888_v6  ;;  %v11901_v43 = vsub.f32 %v7889_v15, %v7889_v15  ;;  %v11903_v45 = vsub.f32 %v7890_v16, %v7890_v16 }
  0xc7   : > { %10004 = vmatprep.subr.bf16.mxu0 %v13644_v1  ;;  %v10014_v50 = vpack.c.bf16 %v752_v58, %v745_v55  ;;  %v772_v51 = vsub.f32 %v11780_v44, %v771_v59  ;;  %v779_v52 = vsub.f32 %v11789_v48, %v778_v62  ;;  %v1379_v35 = vand.u32 4294901760, %v1337_v25 }
  0xc8   : > { %v1382_v53 = vand.u32 4294901760, %v1338_v26  ;;  %v734_v7 = vand.u32 4294901760, %v733_v20  ;;  %v759_v39 = vand.u32 4294901760, %v758_v22  ;;  %v766_v57 = vand.u32 4294901760, %v765_v23 }
  0xc9   : > { %v1376_v6 = vsel %vm1374_vm3, %v11888_v36, 0  ;;  %v11920_v15 = vsub.f32 %v1337_v25, %v1379_v35  ;;  %v834_v0 = vand.u32 4294901760, %v11886_v34  ;;  %v786_v20 = vsub.f32 %v11791_v49, %v785_v13 }
  0xca   : > { %10006 = vmatpush3.bf16.msk.msra.mxu0 %vm11813_vm4, %v13638_v11  ;;  %v11916_v55 = vpack.c.bf16 %v1382_v53, %v1379_v35  ;;  %v11918_v58 = vand.u32 4294901760, %v1376_v6  ;;  %v11922_v16 = vsub.f32 %v1338_v26, %v1382_v53  ;;  %v11931_v22 = vpack.c.bf16 %v750_v30, %v743_v27 }
  0xcb   : > { %10007 = vmatprep.subr.bf16.mxu0 %v13644_v1  ;;  %v11937_v23 = vpack.c.bf16 %v764_v47, %v757_v42  ;;  %v841_v25 = vand.u32 4294901760, %v11901_v43  ;;  %v13641_v35 = vand.u32 4294901760, %v11920_v15  ;;  %v848_v27 = vand.u32 4294901760, %v11903_v45 }
  0xcc   : > { %10135 = vmatpush3.bf16.msra.mxu1 %v11916_v55  ;;  %v11942_v26 = vsub.f32 %v1376_v6, %v11918_v58  ;;  %v13640_v53 = vand.u32 4294901760, %v11922_v16  ;;  %v773_v30 = vand.u32 4294901760, %v772_v51  ;;  %v780_v61 = vand.u32 4294901760, %v779_v52 }
  0xcd   : > { %10136 = vmatprep.subr.bf16.mxu1 %v13644_v1  ;;  %v10017_v42 = vpack.c.bf16 %v766_v57, %v759_v39  ;;  %v1459_v6 = vsub.f32 %v11920_v15, %v13641_v35  ;;  %v787_v52 = vand.u32 4294901760, %v786_v20  ;;  %v11970_v39 = vpack.c.bf16 %v792_v14, %v785_v13 }
  0xce   : > { %10009 = vmatpush3.bf16.msk.msra.mxu0 %vm11842_vm10, %v13638_v11  ;;  %v11952_v47 = vand.u32 4294901760, %v11942_v26  ;;  %v1466_v51 = vsub.f32 %v11922_v16, %v13640_v53  ;;  %v807_v57 = vsub.f32 %v11829_v63, %v806_v29  ;;  %v10020_v20 = vpack.c.bf16 %v780_v61, %v773_v30 }
  0xcf   : > { %10010 = vmatprep.subr.bf16.mxu0 %v13644_v1  ;;  %v1460_v35 = vand.u32 4294901760, %v1459_v6  ;;  %v11977_v37 = vpack.c.bf16 %v806_v29, %v799_v18  ;;  %v13727_v61 = vmov 0.0|0.0   ;;  %v13728_v29 = vmov 0.0  }
  0xd0   : > { %v1448_v53 = vsub.f32 %v11942_v26, %v11952_v47  ;;  %v821_v30 = vsub.f32 %v11836_v5, %v820_v33  ;;  %v12232_v54 = vpack.c.bf16 %v5085_v24, %v5082_v17  ;;  %v5088_v8 = vand.u32 4294901760, %v12221_v38 }
  0xd1   : > { %vm1298_vm1 = vcmask 123904  }
  0xd2   : > { %10012 = vmatpush3.bf16.msk.msra.mxu0 %vm11897_vm14, %v13638_v11  ;;  %v793_v11 = vsub.f32 %v11818_v56, %v792_v14  ;;  %v13726_v14 = vand.u32 4294901760, %v11846_v9 }
  0xd3   : > { %10013 = vmatprep.subr.bf16.mxu0 %v13644_v1 }
  0xd4   : > { %v11991_v6 = vpack.c.bf16 %v834_v0, %v13726_v14  ;;  %v822_v14 = vand.u32 4294901760, %v821_v30  ;;  %v1340_v30 = vld [vmem:[#allocation7 + $0x8] sm:$0xff] }
  0xd5   : > { %8636 = vmatmul.mubr.f32.vlgmr.msra.gmra.mrb[0].mxu0 %v734_v7  ;;  %v11968_v7 = vpack.c.bf16 %v778_v62, %v771_v59  ;;  %v11983_v59 = vpack.c.bf16 %v820_v33, %v813_v31  ;;  %v11985_v62 = vand.u32 4294901760, %v1448_v53  ;;  %v808_v53 = vand.u32 4294901760, %v807_v57 }
  0xd6   : > { %10015 = vmatpush3.bf16.msra.mxu0 %v10014_v50  ;;  %8670 = vmatprep.mubr.msk.f32.mxu0 %vm11316_vm0, %v13642_v2  ;;  %v800_v50 = vsub.f32 %v11825_v60, %v799_v18  ;;  %v1467_v2 = vand.u32 4294901760, %v1466_v51  ;;  %v814_v18 = vsub.f32 %v11834_v4, %v813_v31  ;;  %v12010_v31 = vpack.c.bf16 %v11922_v16, %v11920_v15 }
  0xd7   : > { %10016 = vmatprep.subr.bf16.mxu0 %v13644_v1  ;;  %v794_v1 = vand.u32 4294901760, %v793_v11  ;;  %v11993_v11 = vpack.c.bf16 %v848_v27, %v841_v25  ;;  %8818 = vmatmul.mubr.f32.vlgmr.msra.gmra.mrb[0].mxu1 %v11985_v62  ;;  %v842_v33 = vsub.f32 %v11901_v43, %v841_v25 }
  0xd8   : > { %v11987_v13 = vpack.c.bf16 %v1467_v2, %v1460_v35  ;;  %8824 = vmatprep.mubr.msk.f32.mxu1 %vm11316_vm0, %v13728_v29  ;;  %v801_v35 = vand.u32 4294901760, %v800_v50  ;;  %v835_v50 = vsub.f32 %v11886_v34, %v834_v0 }
  0xd9   : > { %v10023_v2 = vpack.c.bf16 %v794_v1, %v787_v52  ;;  %v13729_v1 = vand.u32 4294901760, %v11846_v9 }
  0xda   : > { %10018 = vmatpush3.bf16.msra.mxu0 %v10017_v42  ;;  %10138 = vmatpush3.bf16.msra.mxu1 %v11987_v13  ;;  %v815_v42 = vand.u32 4294901760, %v814_v18  ;;  %v10026_v51 = vpack.c.bf16 %v808_v53, %v801_v35  ;;  %v836_v18 = vand.u32 4294901760, %v835_v50  ;;  %v843_v35 = vand.u32 4294901760, %v842_v33 }
  0xdb   : > { %10019 = vmatprep.subr.bf16.mxu0 %v13727_v61  ;;  %10139 = vmatprep.subr.bf16.mxu1 %v13727_v61  ;;  %v828_v52 = vsub.f32 %v11846_v9, %v13729_v1  ;;  %v10038_v50 = vpack.c.bf16 %v11711_v21, %v11706_v19 }
  0xdc   : > { %v10029_v57 = vpack.c.bf16 %v822_v14, %v815_v42  ;;  %v13730_v42 = vand.u32 4294901760, %v11920_v15 }
  0xde   : > { %10021 = vmatpush3.bf16.msra.mxu0 %v10020_v20  ;;  %v829_v20 = vand.u32 4294901760, %v828_v52  ;;  %v1841_v52 = vand.u32 4294901760, %v1340_v30 }
  0xdf   : > { %10022 = vmatprep.subr.bf16.mxu0 %v13727_v61  ;;  %8825 = vmatmul.mubr.f32.vlgmr.msra.gmra.mrb[0].mxu1 %v11918_v58 }
  0xe0   : > { %10141 = vmatpush3.bf16.msra.mxu1 %v12010_v31  ;;  %8831 = vmatprep.mubr.msk.f32.mxu1 %vm11316_vm0, %v13728_v29  ;;  %v10032_v0 = vpack.c.bf16 %v836_v18, %v829_v20  ;;  %v12046_v15 = vsub.f32 %v1340_v30, %v1841_v52  ;;  %v10047_v20 = vpack.c.bf16 %v11818_v56, %v11791_v49 }
  0xe1   : > { %10142 = vmatprep.subr.bf16.mxu1 %v13727_v61  ;;  %v10053_v56 = vpack.c.bf16 %v11836_v5, %v11834_v4  ;;  %v10059_v4 = vpack.c.bf16 %v11903_v45, %v11901_v43  ;;  %v13732_v5 = vmov 1.0|1.0   ;;  %v12237_v43 = vld [vmem:[#allocation8 + $0x20] sm:$0xff] }
  0xe2   : > { %10024 = vmatpush3.bf16.msra.mxu0 %v10023_v2  ;;  %v849_v2 = vsub.f32 %v11903_v45, %v848_v27  ;;  %v1339_v27 = vld [vmem:[#allocation7] sm:$0xff]  ;;  %v1924_v21 = vand.u32 4294901760, %v12046_v15  ;;  %v12239_v45 = vld [vmem:[#allocation8 + $0x28] sm:$0xff] }
  0xe3   : > { %10025 = vmatprep.subr.bf16.mxu0 %v13727_v61  ;;  %v1838_v1 = vand.u32 4294901760, %v1339_v27 }
  0xe4   : > { %v850_v53 = vand.u32 4294901760, %v849_v2  ;;  %v10050_v2 = vpack.c.bf16 %v11829_v63, %v11825_v60  ;;  %v10056_v60 = vpack.c.bf16 %v11886_v34, %v11846_v9  ;;  %v13733_v34 = vand.u32 4294901760, %v11786_v46 }
  0xe5   : > { %v12044_v33 = vsub.f32 %v1339_v27, %v1838_v1 }
  0xe6   : > { %10027 = vmatpush3.bf16.msra.mxu0 %v10026_v51  ;;  %v10035_v25 = vpack.c.bf16 %v850_v53, %v843_v35  ;;  %v13731_v51 = vand.u32 4294901760, %v11922_v16  ;;  %v10041_v16 = vpack.c.bf16 %v11741_v32, %v11734_v28  ;;  %v1925_v32 = vsub.f32 %v12046_v15, %v1924_v21  ;;  %v1352_v35 = vld [vmem:[#allocation8 + $0x50] sm:$0xff]  ;;  %v1353_v53 = vld [vmem:[#allocation8 + $0x58] sm:$0xff] }
  0xe7   : > { %10028 = vmatprep.subr.bf16.mxu0 %v13727_v61  ;;  %8832 = vmatmul.mubr.f32.vlgmr.msra.gmra.mrb[0].mxu1 %v11942_v26  ;;  %v1917_v19 = vand.u32 4294901760, %v12044_v33  ;;  %v12096_v63 = vpack.c.bf16 %v12046_v15, %v12044_v33  ;;  %v5112_v27 = vand.u32 4294901760, %v1352_v35  ;;  %v5115_v30 = vand.u32 4294901760, %v1353_v53 }
  0xe8   : > { %10144 = vmatpush3.bf16.msra.mxu1 %v11916_v55  ;;  %8838 = vmatprep.mubr.msk.f32.mxu1 %vm11316_vm0, %v13728_v29  ;;  %v12036_v14 = vpack.c.bf16 %v13731_v51, %v13730_v42  ;;  %v1926_v18 = vand.u32 4294901760, %v1925_v32  ;;  %v12294_v42 = vld [vmem:[#allocation8 + $0x68] sm:$0xff] }
  0xe9   : > { %10145 = vmatprep.subr.bf16.mxu1 %v13727_v61  ;;  %v1918_v28 = vsub.f32 %v12044_v33, %v1917_v19  ;;  %v12123_v9 = vpack.c.bf16 %v1924_v21, %v1917_v19  ;;  %v12302_v33 = vpack.c.bf16 %v5115_v30, %v5112_v27 }
  0xea   : > { %10030 = vmatpush3.bf16.msra.mxu0 %v10029_v57  ;;  %v10044_v57 = vpack.c.bf16 %v11789_v48, %v11780_v44  ;;  %v12071_v44 = vpack.c.bf16 %v1841_v52, %v1838_v1  ;;  %v5121_v1 = vand.u32 4294901760, %v12294_v42  ;;  %v12298_v52 = vld [vmem:[#allocation8 + $0x70] sm:$0xff] }
  0xeb   : > { %10031 = vmatprep.subr.bf16.mxu0 %v13727_v61  ;;  %v1919_v48 = vand.u32 4294901760, %v1918_v28  ;;  %v12326_v28 = vsub.f32 %v1353_v53, %v5115_v30  ;;  %v12358_v30 = vsub.f32 %v12213_v12, %v5085_v24 }
  0xed   : > { %v12080_v49 = vpack.c.bf16 %v1926_v18, %v1919_v48 }
  0xee   : > { %10033 = vmatpush3.bf16.msra.mxu0 %v10032_v0 }
  0xef   : > { %10034 = vmatprep.subr.bf16.mxu0 %v13727_v61  ;;  %8839 = vmatmul.mubr.f32.vlgmr.msra.gmra.mrb[0].mxu1 %v11952_v47 }
  0xf0   : > { %10147 = vmatpush3.bf16.msra.mxu1 %v12036_v14  ;;  %8845 = vmatprep.mubr.msk.f32.mxu1 %vm11316_vm0, %v13728_v29 }
  0xf1   : > { %10148 = vmatprep.subr.bf16.mxu1 %v13727_v61 }
  0xf2   : > { %10036 = vmatpush3.bf16.msra.mxu0 %v10035_v25  ;;  %v12292_v25 = vld [vmem:[#allocation8 + $0x60] sm:$0xff] }
  0xf3   : > { %10037 = vmatprep.subr.bf16.mxu0 %v13727_v61  ;;  %v5118_v51 = vand.u32 4294901760, %v12292_v25 }
  0xf5   : > { %8671 = vmatmul.mubr.f32.vlgmr.msra.gmra.mrb[0].mxu0 %v11769_v40  ;;  %v12309_v15 = vpack.c.bf16 %v5121_v1, %v5118_v51 }
  0xf6   : > { %10039 = vmatpush3.bf16.msra.mxu0 %v10038_v50  ;;  %8705 = vmatprep.mubr.msk.f32.mxu0 %vm11316_vm0, %v13728_v29  ;;  %v12300_v50 = vld [vmem:[#allocation8 + $0x78] sm:$0xff] }
  0xf7   : > { %10040 = vmatprep.subr.bf16.mxu0 %v13727_v61  ;;  %8846 = vmatmul.mubr.f32.vlgmr.msra.gmra.mrb[0].mxu1 %v11918_v58  ;;  %v5127_v19 = vand.u32 4294901760, %v12300_v50 }
  0xf8   : > { %10150 = vmatpush3.bf16.msra.mxu1 %v11916_v55  ;;  %8852 = vmatprep.mubr.msk.f32.mxu1 %vm11316_vm0, %v13728_v29 }
  0xf9   : > { %10151 = vmatprep.subr.bf16.mxu1 %v13727_v61 }
  0xfa   : > { %10042 = vmatpush3.bf16.msra.mxu0 %v10041_v16  ;;  %v5124_v16 = vand.u32 4294901760, %v12298_v52 }
  0xfb   : > { %10043 = vmatprep.subr.bf16.mxu0 %v13727_v61 }
  0xfc   : > { %v12319_v21 = vpack.c.bf16 %v5127_v19, %v5124_v16 }
  0xfe   : > { %10045 = vmatpush3.bf16.msra.mxu0 %v10044_v57  ;;  %v12324_v57 = vsub.f32 %v1352_v35, %v5112_v27  ;;  %v12353_v27 = vsub.f32 %v12211_v10, %v5082_v17 }
  0xff   : > { %10046 = vmatprep.subr.bf16.mxu0 %v13727_v61  ;;  %8853 = vmatmul.mubr.f32.vlgmr.msra.gmra.mrb[0].mxu1 %v11918_v58 }
 0x100   : > { %10153 = vmatpush3.bf16.msra.mxu1 %v12071_v44  ;;  %8859 = vmatprep.mubr.msk.f32.mxu1 %vm11316_vm0, %v13728_v29  ;;  %v13647_v32 = vand.u32 4294901760, %v12324_v57  ;;  %v12348_v53 = vpack.c.bf16 %v12326_v28, %v12324_v57 }
 0x101   : > { %10154 = vmatprep.subr.bf16.mxu1 %v13727_v61 }
 0x102   : > { %10048 = vmatpush3.bf16.msra.mxu0 %v10047_v20  ;;  %v13646_v20 = vand.u32 4294901760, %v12326_v28  ;;  %v5246_v48 = vsub.f32 %v12324_v57, %v13647_v32  ;;  %13734 = vst [vmem:[#allocation19_spill] sm:$0xff] %v12348_v53 }
 0x103   : > { %10049 = vmatprep.subr.bf16.mxu0 %v13727_v61  ;;  %8860 = vmatmul.mubr.f32.vlgmr.msra.gmra.mrb[2].mxu1 %v11985_v62 }
 0x104   : > { %10156 = vmatpush3.bf16.msra.mxu1 %v12080_v49  ;;  %8866 = vmatprep.mubr.msk.f32.mxu1 %vm11316_vm0, %v13728_v29  ;;  %v5253_v18 = vsub.f32 %v12326_v28, %v13646_v20 }
 0x105   : > { %10157 = vmatprep.subr.bf16.mxu1 %v13727_v61 }
 0x106   : > { %10051 = vmatpush3.bf16.msra.mxu0 %v10050_v2  ;;  %v5247_v2 = vand.u32 4294901760, %v5246_v48  ;;  %v13664_v48 = vand.u32 4294901760, %v12353_v27 }
 0x107   : > { %10052 = vmatprep.subr.bf16.mxu0 %v13727_v61 }
 0x108   : > { %v5176_v10 = vsub.f32 %v12353_v27, %v13664_v48 }
 0x10a   : > { %10054 = vmatpush3.bf16.msra.mxu0 %v10053_v56  ;;  %v5254_v56 = vand.u32 4294901760, %v5253_v18  ;;  %v13651_v18 = vand.u32 4294901760, %v12358_v30 }
 0x10b   : > { %10055 = vmatprep.subr.bf16.mxu0 %v13727_v61  ;;  %8867 = vmatmul.mubr.f32.vlgmr.msra.gmra.mrb[2].mxu1 %v11918_v58 }
 0x10c   : > { %10159 = vmatpush3.bf16.msra.mxu1 %v12096_v63  ;;  %8873 = vmatprep.mubr.msk.f32.mxu1 %vm11316_vm0, %v13728_v29  ;;  %v5183_v12 = vsub.f32 %v12358_v30, %v13651_v18 }
 0x10d   : > { %10160 = vmatprep.subr.bf16.mxu1 %v13727_v61 }
 0x10e   : > { %10057 = vmatpush3.bf16.msra.mxu0 %v10056_v60  ;;  %v12336_v60 = vpack.c.bf16 %v5254_v56, %v5247_v2  ;;  %v12365_v2 = vsub.f32 %v12221_v38, %v5088_v8 }
 0x10f   : > { %10058 = vmatprep.subr.bf16.mxu0 %v13727_v61 }
 0x110   : > { %v13649_v24 = vand.u32 4294901760, %v12365_v2 }
 0x112   : > { %10060 = vmatpush3.bf16.msra.mxu0 %v10059_v4  ;;  %v12342_v4 = vld [vmem:[%s571_s13] sm:$0x1] }
 0x113   : > { %10061 = vmatprep.subr.bf16.mxu0 %v13727_v61  ;;  %8874 = vmatmul.mubr.f32.vlgmr.msra.gmra.mrb[2].mxu1 %v11942_v26 }
 0x114   : > { %10162 = vmatpush3.bf16.msra.mxu1 %v12071_v44  ;;  %8880 = vmatprep.mubr.msk.f32.mxu1 %vm11316_vm0, %v13728_v29 }
 0x115   : > { %8706 = vmatmul.mubr.f32.vlgmr.msra.gmra.mrb[0].mxu0 %v11786_v46  ;;  %10163 = vmatprep.subr.bf16.mxu1 %v13727_v61  ;;  %v12223_v46 = vld [vmem:[#allocation8 + $0x18] sm:$0xff] }
 0x116   : > { %10063 = vmatpush3.bf16.msk.msra.mxu0 %vm11671_vm5, %v13732_v5  ;;  %8740 = vmatprep.mubr.msk.f32.mxu0 %vm11316_vm0, %v13728_v29 }
 0x117   : > { %10064 = vmatprep.subr.bf16.mxu0 %v13727_v61 }
 0x11a   : > { %10066 = vmatpush3.bf16.msk.msra.mxu0 %vm11683_vm6, %v13732_v5 }
 0x11b   : > { %10067 = vmatprep.subr.bf16.mxu0 %v13727_v61  ;;  %8881 = vmatmul.mubr.f32.vlgmr.msra.gmra.mrb[2].mxu1 %v11952_v47 }
 0x11c   : > { %10165 = vmatpush3.bf16.msra.mxu1 %v12123_v9  ;;  %8887 = vmatprep.mubr.msk.f32.mxu1 %vm11316_vm0, %v13728_v29 }
 0x11d   : > { %10166 = vmatprep.subr.bf16.mxu1 %v13727_v61 }
 0x11e   : > { %10069 = vmatpush3.bf16.msk.msra.mxu0 %vm11701_vm9, %v13732_v5 }
 0x11f   : > { %10070 = vmatprep.subr.bf16.mxu0 %v13727_v61 }
 0x122   : > { %10072 = vmatpush3.bf16.msk.msra.mxu0 %vm11727_vm12, %v13732_v5 }
 0x123   : > { %10073 = vmatprep.subr.bf16.mxu0 %v13727_v61  ;;  %8888 = vmatmul.mubr.f32.vlgmr.msra.gmra.mrb[2].mxu1 %v11918_v58 }
 0x124   : > { %10168 = vmatpush3.bf16.msra.mxu1 %v12071_v44  ;;  %8894 = vmatprep.mubr.msk.f32.mxu1 %vm11316_vm0, %v13728_v29 }
 0x125   : > { %10169 = vmatprep.subr.bf16.mxu1 %v13727_v61 }
 0x126   : > { %10075 = vmatpush3.bf16.msk.msra.mxu0 %vm11764_vm15, %v13732_v5 }
 0x127   : > { %10076 = vmatprep.subr.bf16.mxu0 %v13727_v61 }
 0x12a   : > { %10078 = vmatpush3.bf16.msk.msra.mxu0 %vm11813_vm4, %v13732_v5 }
 0x12b   : > { %10079 = vmatprep.subr.bf16.mxu0 %v13727_v61  ;;  %8895 = vmatmul.mubr.f32.vlgmr.msra.gmra.mrb[2].mxu1 %v11918_v58  ;;  %v5094_v58 = vand.u32 4294901760, %v12237_v43 }
 0x12c   : > { %10171 = vmatpush3.bf16.msra.mxu1 %v11916_v55  ;;  %8901 = vmatprep.mubr.msk.f32.mxu1 %vm11316_vm0, %v13728_v29 }
 0x12d   : > { %10172 = vmatprep.subr.bf16.mxu1 %v13727_v61 }
 0x12e   : > { %10081 = vmatpush3.bf16.msk.msra.mxu0 %vm11842_vm10, %v13732_v5 }
 0x12f   : > { %10082 = vmatprep.subr.bf16.mxu0 %v13727_v61 }
 0x132   : > { %10084 = vmatpush3.bf16.msk.msra.mxu0 %vm11897_vm14, %v13732_v5 }
 0x133   : > { %10085 = vmatprep.subr.bf16.mxu0 %v13727_v61 }
 0x135   : > { %8741 = vmatmul.mubr.f32.vlgmr.msra.gmra.mrb[0].mxu0 %v13733_v34 }
 0x136   : > { %10087 = vmatpush3.bf16.msra.mxu0 %v11931_v22  ;;  %8775 = vmatprep.mubr.msk.f32.mxu0 %vm11316_vm0, %v13728_v29  ;;  %v5097_v22 = vand.u32 4294901760, %v12239_v45 }
 0x137   : > { %10088 = vmatprep.subr.bf16.mxu0 %v13727_v61 }
 0x138   : > { %v12263_v26 = vpack.c.bf16 %v5097_v22, %v5094_v58 }
 0x13a   : > { %10090 = vmatpush3.bf16.msra.mxu0 %v11937_v23  ;;  %v12254_v23 = vld [vmem:[#allocation8 + $0x30] sm:$0xff] }
 0x13b   : > { %10091 = vmatprep.subr.bf16.mxu0 %v13727_v61  ;;  %v5100_v47 = vand.u32 4294901760, %v12254_v23 }
 0x13e   : > { %10093 = vmatpush3.bf16.msra.mxu0 %v11968_v7 }
 0x13f   : > { %10094 = vmatprep.subr.bf16.mxu0 %v13727_v61 }
 0x142   : > { %10096 = vmatpush3.bf16.msra.mxu0 %v11970_v39  ;;  %v12268_v39 = vld [vmem:[#allocation8 + $0x40] sm:$0xff] }
 0x143   : > { %10097 = vmatprep.subr.bf16.mxu0 %v13727_v61 }
 0x146   : > { %10099 = vmatpush3.bf16.msra.mxu0 %v11977_v37  ;;  %v5091_v37 = vand.u32 4294901760, %v12223_v46 }
 0x147   : > { %10100 = vmatprep.subr.bf16.mxu0 %v13727_v61 }
 0x148   : > { %v12247_v41 = vpack.c.bf16 %v5091_v37, %v5088_v8  ;;  %v12370_v56 = vsub.f32 %v12223_v46, %v5091_v37  ;;  %v12383_v46 = vsub.f32 %v12237_v43, %v5094_v58  ;;  %v12388_v8 = vsub.f32 %v12239_v45, %v5097_v22 }
 0x149   : > { %v12402_v43 = vsub.f32 %v12254_v23, %v5100_v47  ;;  %v5190_v22 = vsub.f32 %v12365_v2, %v13649_v24 }
 0x14a   : > { %10102 = vmatpush3.bf16.msra.mxu0 %v11983_v59  ;;  %v12270_v59 = vld [vmem:[#allocation8 + $0x48] sm:$0xff]  ;;  %v13648_v38 = vand.u32 4294901760, %v12370_v56  ;;  %v13663_v23 = vand.u32 4294901760, %v12383_v46 }
 0x14b   : > { %10103 = vmatprep.subr.bf16.mxu0 %v13727_v61  ;;  %v13654_v20 = vand.u32 4294901760, %v12402_v43 }
 0x14c   : > { %v5204_v24 = vsub.f32 %v12383_v46, %v13663_v23 }
 0x14e   : > { %10105 = vmatpush3.bf16.msra.mxu0 %v11991_v6  ;;  %v5106_v6 = vand.u32 4294901760, %v12268_v39 }
 0x14f   : > { %10106 = vmatprep.subr.bf16.mxu0 %v13727_v61 }
 0x150   : > { %v12432_v32 = vsub.f32 %v12268_v39, %v5106_v6  ;;  %v5218_v39 = vsub.f32 %v12402_v43, %v13654_v20 }
 0x152   : > { %10108 = vmatpush3.bf16.msra.mxu0 %v11993_v11  ;;  %v5109_v11 = vand.u32 4294901760, %v12270_v59 }
 0x153   : > { %10109 = vmatprep.subr.bf16.mxu0 %v13727_v61 }
 0x154   : > { %v12287_v0 = vpack.c.bf16 %v5109_v11, %v5106_v6  ;;  %v13662_v6 = vand.u32 4294901760, %v12432_v32 }
 0x155   : > { %8776 = vmatmul.mubr.f32.vlgmr.msra.gmra.mrb[0].mxu0 %v11769_v40 }
 0x156   : > { %10111 = vmatpush3.bf16.msk.msra.mxu0 %vm11671_vm5, %v13732_v5  ;;  %8810 = vmatprep.mubr.msk.f32.mxu0 %vm11316_vm0, %v13728_v29  ;;  %vm1306_vm5 = vcmask 122880  }
 0x157   : > { %10112 = vmatprep.subr.bf16.mxu0 %v13727_v61 }
 0x15a   : > { %10114 = vmatpush3.bf16.msk.msra.mxu0 %vm11683_vm6, %v13732_v5 }
 0x15b   : > { %10115 = vmatprep.subr.bf16.mxu0 %v13727_v61 }
 0x15e   : > { %10117 = vmatpush3.bf16.msk.msra.mxu0 %vm11701_vm9, %v13732_v5 }
 0x15f   : > { %10118 = vmatprep.subr.bf16.mxu0 %v13727_v61 }
 0x162   : > { %10120 = vmatpush3.bf16.msk.msra.mxu0 %vm11727_vm12, %v13732_v5 }
 0x163   : > { %10121 = vmatprep.subr.bf16.mxu0 %v13727_v61 }
 0x166   : > { %10123 = vmatpush3.bf16.msk.msra.mxu0 %vm11764_vm15, %v13732_v5 }
 0x167   : > { %10124 = vmatprep.subr.bf16.mxu0 %v13727_v61 }
 0x16a   : > { %10126 = vmatpush3.bf16.msk.msra.mxu0 %vm11813_vm4, %v13732_v5 }
 0x16b   : > { %10127 = vmatprep.subr.bf16.mxu0 %v13727_v61 }
 0x16e   : > { %10129 = vmatpush3.bf16.msk.msra.mxu0 %vm11842_vm10, %v13732_v5 }
 0x16f   : > { %10130 = vmatprep.subr.bf16.mxu0 %v13727_v61 }
 0x172   : > { %10132 = vmatpush3.bf16.msk.msra.mxu0 %vm11897_vm14, %v13732_v5  ;;  %v1307_v5 = vsel %vm1306_vm5, %v12342_v4, 0.0 }
 0x173   : > { %10277 = vmatprep.subr.bf16.mxu0 %v13727_v61  ;;  %1308 = vadd.xlane.f32.xlu0 %v1307_v5 }
 0x175   : > { %8811 = vmatmul.mubr.f32.vlgmr.msra.gmra.mrb[0].mxu0 %v11769_v40  ;;  %v12256_v40 = vld [vmem:[#allocation8 + $0x38] sm:$0xff] }
 0x176   : > { %10279 = vmatpush3.bf16.msra.mxu0 %v12232_v54  ;;  %9181 = vmatprep.mubr.msk.f32.mxu0 %vm11316_vm0, %v13728_v29  ;;  %v5103_v7 = vand.u32 4294901760, %v12256_v40 }
 0x177   : > { %10280 = vmatprep.subr.bf16.mxu0 %v13727_v61 }
 0x178   : > { %v12277_v62 = vpack.c.bf16 %v5103_v7, %v5100_v47  ;;  %v12411_v58 = vsub.f32 %v12256_v40, %v5103_v7  ;;  %v13652_v47 = vand.u32 4294901760, %v12388_v8 }
 0x17a   : > { %10282 = vmatpush3.bf16.msra.mxu0 %v12247_v41  ;;  %v13653_v7 = vand.u32 4294901760, %v12411_v58 }
 0x17b   : > { %10283 = vmatprep.subr.bf16.mxu0 %v13727_v61 }
 0x17e   : > { %10285 = vmatpush3.bf16.msra.mxu0 %v12263_v26 }
 0x17f   : > { %10286 = vmatprep.subr.bf16.mxu0 %v13727_v61 }
 0x182   : > { %10288 = vmatpush3.bf16.msra.mxu0 %v12277_v62 }
 0x183   : > { %10289 = vmatprep.subr.bf16.mxu0 %v13727_v61 }
 0x186   : > { %10291 = vmatpush3.bf16.msra.mxu0 %v12287_v0 }
 0x187   : > { %10292 = vmatprep.subr.bf16.mxu0 %v13727_v61 }
 0x18a   : > { %10294 = vmatpush3.bf16.msra.mxu0 %v12302_v33 }
 0x18b   : > { %10295 = vmatprep.subr.bf16.mxu0 %v13727_v61 }
 0x18e   : > { %10297 = vmatpush3.bf16.msra.mxu0 %v12309_v15 }
 0x18f   : > { %10298 = vmatprep.subr.bf16.mxu0 %v13727_v61 }
 0x192   : > { %10300 = vmatpush3.bf16.msra.mxu0 %v12319_v21 }
 0x193   : > { %10301 = vmatprep.subr.bf16.mxu0 %v13727_v61 }
 0x1d2   : > { %v1833_v34 = vpop.f32.mrb[0].mxu1 }
 0x1d3   : > { %v8854_v35 = vpop.f32.mrb[1].mxu1  ;;  %vm5059_vm6 = vcmp.gt.f32.partialorder %v1833_v34, 0.5 }
 0x1d4   : > { %v5177_v35 = vand.u32 4294901760, %v5176_v10  ;;  %v5197_v10 = vsub.f32 %v12370_v56, %v13648_v38  ;;  %v12437_v38 = vsub.f32 %v12270_v59, %v5109_v11  ;;  %v5225_v59 = vsub.f32 %v12411_v58, %v13653_v7 }
 0x1d5   : > { %v5232_v7 = vsub.f32 %v12432_v32, %v13662_v6 }
 0x1d6   : > { %v13661_v11 = vand.u32 4294901760, %v12437_v38 }
 0x1d8   : > { %v5239_v20 = vsub.f32 %v12437_v38, %v13661_v11 }
 0x1fe   : > { %v2292_v17 = vpop.f32.mrb[2].mxu1 }
 0x1ff   : > { %vm5060_vm9 = vcmp.gt.f32.partialorder %v2292_v17, 0.5  ;;  %v8896_v37 = vpop.f32.mrb[3].mxu1  ;;  %v5184_v17 = vand.u32 4294901760, %v5183_v12 }
 0x200   : > { %vm12390_vm12 = vmand %vm5059_vm6, %vm5060_vm9 }
 0x201   : > { %v12397_v34 = vsel %vm12390_vm12, 1.0, %v13728_v29  ;;  %v12422_v37 = vpack.c.bf16 %v5184_v17, %v5177_v35  ;;  %v5191_v35 = vand.u32 4294901760, %v5190_v22  ;;  %v5198_v17 = vand.u32 4294901760, %v5197_v10 }
 0x202   : > { %v12406_v45 = vsub.f32 %v12397_v34, %v12397_v34  ;;  %v5205_v10 = vand.u32 4294901760, %v5204_v24  ;;  %v12471_v24 = vsub.f32 %v12292_v25, %v5118_v51  ;;  %v12487_v25 = vsub.f32 %v12298_v52, %v5124_v16 }
 0x203   : > { %v12454_v22 = vpack.c.bf16 %v5198_v17, %v5191_v35 }
 0x204   : > { %v13650_v12 = vand.u32 4294901760, %v12406_v45  ;;  %v13658_v16 = vand.u32 4294901760, %v12487_v25 }
 0x206   : > { %v5165_v40 = vsub.f32 %v12406_v45, %v13650_v12  ;;  %v5211_v12 = vsub.f32 %v12388_v8, %v13652_v47 }
 0x208   : > { %v5166_v18 = vand.u32 4294901760, %v5165_v40  ;;  %v5212_v47 = vand.u32 4294901760, %v5211_v12  ;;  %v5226_v40 = vand.u32 4294901760, %v5225_v59  ;;  %v12476_v12 = vsub.f32 %v12294_v42, %v5121_v1 }
 0x209   : > { %v5240_v59 = vand.u32 4294901760, %v5239_v20  ;;  %v12492_v42 = vsub.f32 %v12300_v50, %v5127_v19 }
 0x20a   : > { %9182 = vmatmul.mubr.f32.vlgmr.msra.gmra.mrb[2].mxu0 %v5166_v18  ;;  %v5219_v18 = vand.u32 4294901760, %v5218_v39  ;;  %v12466_v35 = vpack.c.bf16 %v5212_v47, %v5205_v10  ;;  %v5233_v39 = vand.u32 4294901760, %v5232_v7  ;;  %v13660_v47 = vand.u32 4294901760, %v12471_v24 }
 0x20b   : > { %10303 = vmatpush3.bf16.msra.mxu0 %v12422_v37  ;;  %9216 = vmatprep.mubr.msk.f32.mxu0 %vm11316_vm0, %v13728_v29  ;;  %v13659_v10 = vand.u32 4294901760, %v12476_v12  ;;  %v13657_v20 = vand.u32 4294901760, %v12492_v42  ;;  %v5274_v7 = vsub.f32 %v12487_v25, %v13658_v16 }
 0x20c   : > { %10304 = vmatprep.subr.bf16.mxu0 %v13727_v61  ;;  %v12479_v17 = vpack.c.bf16 %v5226_v40, %v5219_v18  ;;  %v12495_v51 = vpack.c.bf16 %v5240_v59, %v5233_v39  ;;  %v5260_v1 = vsub.f32 %v12471_v24, %v13660_v47 }
 0x20d   : > { %v5267_v52 = vsub.f32 %v12476_v12, %v13659_v10  ;;  %v5281_v18 = vsub.f32 %v12492_v42, %v13657_v20  ;;  %v5275_v39 = vand.u32 4294901760, %v5274_v7  ;;  %v12543_v7 = vpack.c.bf16 %v12388_v8, %v12383_v46 }
 0x20e   : > { %v5261_v50 = vand.u32 4294901760, %v5260_v1  ;;  %v12575_v10 = vpack.c.bf16 %v12492_v42, %v12487_v25 }
 0x20f   : > { %10306 = vmatpush3.bf16.msra.mxu0 %v12454_v22  ;;  %v5268_v19 = vand.u32 4294901760, %v5267_v52  ;;  %v5282_v59 = vand.u32 4294901760, %v5281_v18  ;;  %v12526_v52 = vpack.c.bf16 %v12358_v30, %v12353_v27  ;;  %v12549_v18 = vpack.c.bf16 %v12411_v58, %v12402_v43 }
 0x210   : > { %10307 = vmatprep.subr.bf16.mxu0 %v13727_v61  ;;  %13739 = vst [vmem:[#allocation21_spill] sm:$0xff] %v12575_v10 }
 0x211   : > { %v12516_v40 = vpack.c.bf16 %v5268_v19, %v5261_v50  ;;  %v12520_v1 = vpack.c.bf16 %v5282_v59, %v5275_v39  ;;  %v13655_v50 = vmov 1.0   ;;  %v12535_v19 = vpack.c.bf16 %v12370_v56, %v12365_v2  ;;  %v7939_v59 = vld [vmem:[%s562_s19] ss:$0 sm:$0xff]  ;;  %s559_s19 = scalar_lea.vmem [#allocation11], %s11618_s0 }
 0x212   : > { %v12555_v39 = vpack.c.bf16 %v12437_v38, %v12432_v32  ;;  %vm1294_vm15 = vcmp.eq.s32.totalorder %v11650_v3, %v7939_v59  ;;  %s7701_s26 = sshll.u32 %s559_s19, 4  ;;  %s13574_s26 = int_to_ptr.vmem [resolvable:$true] %s7701_s26 }
 0x213   : > { %10309 = vmatpush3.bf16.msra.mxu0 %v12466_v35  ;;  %v7940_v20 = vsel %vm1294_vm15, 1.0, %v13728_v29 }
 0x214   : > { %10310 = vmatprep.subr.bf16.mxu0 %v13727_v61 }
 0x217   : > { %10312 = vmatpush3.bf16.msra.mxu0 %v12479_v17 }
 0x218   : > { %10313 = vmatprep.subr.bf16.mxu0 %v13727_v61 }
 0x21b   : > { %10315 = vmatpush3.bf16.msra.mxu0 %v12495_v51 }
 0x21c   : > { %10316 = vmatprep.subr.bf16.mxu0 %v13727_v61 }
 0x21f   : > { %10318 = vmatpush3.bf16.msra.mxu0 %v12336_v60 }
 0x220   : > { %10319 = vmatprep.subr.bf16.mxu0 %v13727_v61 }
 0x223   : > { %10321 = vmatpush3.bf16.msra.mxu0 %v12516_v40 }
 0x224   : > { %10322 = vmatprep.subr.bf16.mxu0 %v13727_v61 }
 0x227   : > { %10324 = vmatpush3.bf16.msra.mxu0 %v12520_v1 }
 0x228   : > { %10325 = vmatprep.subr.bf16.mxu0 %v13727_v61 }
 0x22a   : > { %9217 = vmatmul.mubr.msk.f32.vlgmr.msra.gmra.mrb[2].mxu0 %vm12390_vm12, %v13655_v50  ;;  %v12568_v50 = vpack.c.bf16 %v12476_v12, %v12471_v24 }
 0x22b   : > { %10327 = vmatpush3.bf16.msra.mxu0 %v12526_v52  ;;  %9251 = vmatprep.mubr.msk.f32.mxu0 %vm11316_vm0, %v13728_v29 }
 0x22c   : > { %10328 = vmatprep.subr.bf16.mxu0 %v13727_v61  ;;  %13738 = vst [vmem:[#allocation20_spill] sm:$0xff] %v12568_v50 }
 0x22f   : > { %10330 = vmatpush3.bf16.msra.mxu0 %v12535_v19 }
 0x230   : > { %10331 = vmatprep.subr.bf16.mxu0 %v13727_v61 }
 0x233   : > { %10333 = vmatpush3.bf16.msra.mxu0 %v12543_v7 }
 0x234   : > { %10334 = vmatprep.subr.bf16.mxu0 %v13727_v61 }
 0x237   : > { %10336 = vmatpush3.bf16.msra.mxu0 %v12549_v18 }
 0x238   : > { %10337 = vmatprep.subr.bf16.mxu0 %v13727_v61 }
 0x23b   : > { %10339 = vmatpush3.bf16.msra.mxu0 %v12555_v39 }
 0x23c   : > { %10340 = vmatprep.subr.bf16.mxu0 %v13727_v61 }
 0x23f   : > { %10342 = vmatpush3.bf16.msra.mxu0 %v12348_v53 }
 0x240   : > { %10343 = vmatprep.subr.bf16.mxu0 %v13727_v61 }
 0x243   : > { %10345 = vmatpush3.bf16.msra.mxu0 %v12568_v50 }
 0x244   : > { %10346 = vmatprep.subr.bf16.mxu0 %v13727_v61 }
 0x247   : > { %10348 = vmatpush3.bf16.msra.mxu0 %v12575_v10 }
 0x248   : > { %v1286_v16 = vpop.f32.mrb[0].mxu0  ;;  %10349 = vmatprep.subr.bf16.mxu0 %v13727_v61 }
 0x249   : > { %v1297_v47 = vmul.f32 %v7940_v20, %v1286_v16  ;;  %v8812_v3 = vpop.f32.mrb[1].mxu0 }
 0x24a   : > { %9252 = vmatmul.mubr.f32.vlgmr.msra.gmra.mrb[2].mxu0 %v12406_v45 }
 0x24b   : > { %v1299_v59 = vsel %vm1298_vm1, %v1297_v47, 0.0  ;;  %10351 = vmatpush3.bf16.msra.mxu0 %v12232_v54  ;;  %9286 = vmatprep.mubr.msk.f32.mxu0 %vm11316_vm0, %v13728_v29 }
 0x24c   : > { %v1300_v11 = vrot.slane %v1299_v59, 4  ;;  %10352 = vmatprep.subr.bf16.mxu0 %v13727_v61 }
 0x24e   : > { %v1301_v6 = vadd.f32 %v1300_v11, %v1299_v59 }
 0x24f   : > { %10354 = vmatpush3.bf16.msra.mxu0 %v12247_v41 }
 0x250   : > { %v1302_v23 = vrot.slane %v1301_v6, 2  ;;  %10355 = vmatprep.subr.bf16.mxu0 %v13727_v61 }
 0x252   : > { %v1303_v16 = vadd.f32 %v1302_v23, %v1301_v6 }
 0x253   : > { %10357 = vmatpush3.bf16.msra.mxu0 %v12263_v26 }
 0x254   : > { %v1304_v20 = vrot.slane %v1303_v16, 1  ;;  %10358 = vmatprep.subr.bf16.mxu0 %v13727_v61 }
 0x256   : > { %v1305_v47 = vadd.f32 %v1304_v20, %v1303_v16 }
 0x257   : > { %10360 = vmatpush3.bf16.msra.mxu0 %v12277_v62 }
 0x258   : > { %v1317_v3 = vsub.f32 %v1305_v47, %v11888_v36  ;;  %v2297_v11 = vsel %vm1374_vm3, %v1305_v47, 0  ;;  %10361 = vmatprep.subr.bf16.mxu0 %v13727_v61 }
 0x259   : > { %v12590_v59 = vand.u32 4294901760, %v2297_v11 }
 0x25a   : > { %v1318_v48 = vmul.f32 %v1317_v3, %v12342_v4 }
 0x25b   : > { %v12595_v23 = vsub.f32 %v2297_v11, %v12590_v59  ;;  %10363 = vmatpush3.bf16.msra.mxu0 %v12287_v0  ;;  %v13741_v11 = vand.u32 4294901760, %v12358_v30  ;;  %v13745_v30 = vand.u32 4294901760, %v12383_v46  ;;  %v13749_v46 = vand.u32 4294901760, %v12432_v32 }
 0x25c   : > { %v1321_v6 = vmul.f32 0.5, %v1318_v48  ;;  %v1319_v10 = vand.u32 2147483647, %v1318_v48  ;;  %10364 = vmatprep.subr.bf16.mxu0 %v13727_v61  ;;  %v13753_v32 = vand.u32 4294901760, %v12471_v24  ;;  %v13757_v24 = vmov 1.0  }
 0x25d   : > { %v12599_v16 = vand.u32 4294901760, %v12595_v23 }
 0x25e   : > { %vm1320_vm2 = vcmp.lt.f32.partialorder %v1319_v10, 1.0  ;;  %v1322_v36 = vmul.f32 %v1321_v6, %v1318_v48  ;;  %v7941_v20 = vadd.f32 -0.5, %v1319_v10  ;;  %v1309_v48 = vpop.xlane.xlu0 %1308 }
 0x25f   : > { %v2369_v47 = vsub.f32 %v12595_v23, %v12599_v16  ;;  %10366 = vmatpush3.bf16.msra.mxu0 %v12302_v33  ;;  %v1310_v10 = vrot.slane %v1309_v48, 4 }
 0x260   : > { %v1324_v50 = vsel %vm1320_vm2, %v1322_v36, %v7941_v20  ;;  %10367 = vmatprep.subr.bf16.mxu0 %v13727_v61  ;;  %v13742_v20 = vand.u32 4294901760, %v12406_v45 }
 0x261   : > { %v1325_v4 = vsel %vm1306_vm5, %v1324_v50, 0.0  ;;  %v12606_v3 = vand.u32 4294901760, %v2369_v47  ;;  %v13740_v50 = vand.u32 4294901760, %v12353_v27  ;;  %v1311_v36 = vadd.f32 %v1310_v10, %v1309_v48 }
 0x262   : > { %1326 = vadd.xlane.f32.xlu0 %v1325_v4  ;;  %v13743_v47 = vand.u32 4294901760, %v12365_v2  ;;  %v13744_v4 = vand.u32 4294901760, %v12370_v56  ;;  %v13746_v2 = vand.u32 4294901760, %v12388_v8  ;;  %v13747_v10 = vand.u32 4294901760, %v12402_v43 }
 0x263   : > { %8902 = vmatmul.mubr.f32.vlgmr.msra.gmra.mrb[4].mxu1 %v12606_v3  ;;  %10369 = vmatpush3.bf16.msra.mxu0 %v12309_v15  ;;  %v12628_v6 = vpack.c.bf16 %v13741_v11, %v13740_v50  ;;  %v1312_v27 = vrot.slane %v1311_v36, 2  ;;  %v13748_v50 = vand.u32 4294901760, %v12411_v58  ;;  %v13750_v8 = vand.u32 4294901760, %v12437_v38 }
 0x264   : > { %10174 = vmatpush3.bf16.msra.mxu1 %v11987_v13  ;;  %8908 = vmatprep.mubr.msk.f32.mxu1 %vm11316_vm0, %v13728_v29  ;;  %v12638_v53 = vpack.c.bf16 %v13744_v4, %v13743_v47  ;;  %v12653_v56 = vpack.c.bf16 %v13746_v2, %v13745_v30  ;;  %v13751_v58 = vand.u32 4294901760, %v12324_v57  ;;  %v13754_v57 = vand.u32 4294901760, %v12476_v12  ;;  %v1335_v12 = vld [vmem:[%s574_s17] sm:$0x1]  ;;  %s13784_s17 = sld [smem:[#allocation26_spill]] }
 0x265   : > { %10175 = vmatprep.subr.bf16.mxu1 %v13727_v61  ;;  %10370 = vmatprep.subr.bf16.mxu0 %v13727_v61  ;;  %v1313_v45 = vadd.f32 %v1312_v27, %v1311_v36  ;;  %v12661_v11 = vpack.c.bf16 %v13748_v50, %v13747_v10  ;;  %v12674_v43 = vpack.c.bf16 %v13750_v8, %v13749_v46  ;;  %v13752_v36 = vand.u32 4294901760, %v12326_v28  ;;  %v1336_v50 = vld [vmem:[%s489_s5] sm:$0x1] }
 0x266   : > { %v12695_v28 = vpack.c.bf16 %v13754_v57, %v13753_v32  ;;  %v13755_v38 = vand.u32 4294901760, %v12487_v25  ;;  %v13756_v4 = vand.u32 4294901760, %v12492_v42  ;;  %v3218_v25 = vsel %vm1374_vm3, %v1335_v12, 0 }
 0x267   : > { %10372 = vmatpush3.bf16.msra.mxu0 %v12319_v21  ;;  %v1314_v48 = vrot.slane %v1313_v45, 1  ;;  %v12682_v47 = vpack.c.bf16 %v13752_v36, %v13751_v58  ;;  %v12750_v42 = vand.u32 4294901760, %v3218_v25  ;;  %v4139_v46 = vsel %vm1374_vm3, %v1336_v50, 0 }
 0x268   : > { %10373 = vmatprep.subr.bf16.mxu0 %v13727_v61  ;;  %v12703_v27 = vpack.c.bf16 %v13756_v4, %v13755_v38  ;;  %v4208_v8 = vand.u32 4294901760, %v4139_v46 }
 0x26a   : > { %9287 = vmatmul.mubr.f32.vlgmr.msra.gmra.mrb[2].mxu0 %v13742_v20  ;;  %v1315_v20 = vadd.f32 %v1314_v48, %v1313_v45  ;;  %v4209_v58 = vsub.f32 %v4139_v46, %v4208_v8  ;;  %s13572_s5 = scalar_lea.hbm %s13784_s17, %s7946_s14 }
 0x26b   : > { %8909 = vmatmul.mubr.f32.vlgmr.msra.gmra.mrb[4].mxu1 %v12590_v59  ;;  %10375 = vmatpush3.bf16.msra.mxu0 %v12628_v6 }
 0x26c   : > { %10177 = vmatpush3.bf16.msra.mxu1 %v12010_v31  ;;  %8915 = vmatprep.mubr.msk.f32.mxu1 %vm11316_vm0, %v13728_v29  ;;  %10983 = vpush %v1315_v20  ;;  %v4210_v36 = vand.u32 4294901760, %v4209_v58 }
 0x26d   : > { %10178 = vmatprep.subr.bf16.mxu1 %v13727_v61  ;;  %9321 = vmatprep.mubr.msk.f32.mxu0 %vm11316_vm0, %v13728_v29 }
 0x26e   : > { %10376 = vmatprep.subr.bf16.mxu0 %v13727_v61  ;;  %v4211_v32 = vsub.f32 %v4209_v58, %v4210_v36 }
 0x26f   : > { %10378 = vmatpush3.bf16.msra.mxu0 %v12638_v53 }
 0x270   : > { %10379 = vmatprep.subr.bf16.mxu0 %v13727_v61  ;;  %v4212_v57 = vand.u32 4294901760, %v4211_v32 }
 0x273   : > { %8916 = vmatmul.mubr.f32.vlgmr.msra.gmra.mrb[4].mxu1 %v12595_v23  ;;  %10381 = vmatpush3.bf16.msra.mxu0 %v12653_v56 }
 0x274   : > { %10180 = vmatpush3.bf16.msra.mxu1 %v11916_v55  ;;  %8922 = vmatprep.mubr.msk.f32.mxu1 %vm11316_vm0, %v13728_v29 }
 0x275   : > { %10181 = vmatprep.subr.bf16.mxu1 %v13727_v61  ;;  %10382 = vmatprep.subr.bf16.mxu0 %v13727_v61 }
 0x277   : > { %10384 = vmatpush3.bf16.msra.mxu0 %v12661_v11 }
 0x278   : > { %10385 = vmatprep.subr.bf16.mxu0 %v13727_v61 }
 0x27b   : > { %8923 = vmatmul.mubr.f32.vlgmr.msra.gmra.mrb[4].mxu1 %v12599_v16  ;;  %10387 = vmatpush3.bf16.msra.mxu0 %v12674_v43 }
 0x27c   : > { %10183 = vmatpush3.bf16.msra.mxu1 %v12036_v14  ;;  %8929 = vmatprep.mubr.msk.f32.mxu1 %vm11316_vm0, %v13728_v29 }
 0x27d   : > { %10184 = vmatprep.subr.bf16.mxu1 %v13727_v61  ;;  %10388 = vmatprep.subr.bf16.mxu0 %v13727_v61 }
 0x27f   : > { %10390 = vmatpush3.bf16.msra.mxu0 %v12682_v47 }
 0x280   : > { %10391 = vmatprep.subr.bf16.mxu0 %v13727_v61 }
 0x283   : > { %8930 = vmatmul.mubr.f32.vlgmr.msra.gmra.mrb[4].mxu1 %v12590_v59  ;;  %10393 = vmatpush3.bf16.msra.mxu0 %v12695_v28 }
 0x284   : > { %10186 = vmatpush3.bf16.msra.mxu1 %v11916_v55  ;;  %8936 = vmatprep.mubr.msk.f32.mxu1 %vm11316_vm0, %v13728_v29 }
 0x285   : > { %10187 = vmatprep.subr.bf16.mxu1 %v13727_v61  ;;  %10394 = vmatprep.subr.bf16.mxu0 %v13727_v61 }
 0x287   : > { %10396 = vmatpush3.bf16.msra.mxu0 %v12703_v27 }
 0x288   : > { %10397 = vmatprep.subr.bf16.mxu0 %v13727_v61 }
 0x28a   : > { %9322 = vmatmul.mubr.msk.f32.vlgmr.msra.gmra.mrb[2].mxu0 %vm12390_vm12, %v13757_v24 }
 0x28b   : > { %8937 = vmatmul.mubr.f32.vlgmr.msra.gmra.mrb[4].mxu1 %v12590_v59  ;;  %10399 = vmatpush3.bf16.msra.mxu0 %v12232_v54 }
 0x28c   : > { %10189 = vmatpush3.bf16.msra.mxu1 %v12071_v44  ;;  %8943 = vmatprep.mubr.msk.f32.mxu1 %vm11316_vm0, %v13728_v29 }
 0x28d   : > { %10190 = vmatprep.subr.bf16.mxu1 %v13727_v61  ;;  %9356 = vmatprep.mubr.msk.f32.mxu0 %vm11316_vm0, %v13728_v29 }
 0x28e   : > { %10400 = vmatprep.subr.bf16.mxu0 %v13727_v61 }
 0x28f   : > { %8944 = vmatmul.mubr.f32.vlgmr.msra.gmra.mrb[6].mxu1 %v12606_v3  ;;  %10402 = vmatpush3.bf16.msra.mxu0 %v12247_v41 }
 0x290   : > { %10192 = vmatpush3.bf16.msra.mxu1 %v12080_v49  ;;  %8950 = vmatprep.mubr.msk.f32.mxu1 %vm11316_vm0, %v13728_v29 }
 0x291   : > { %10193 = vmatprep.subr.bf16.mxu1 %v13727_v61  ;;  %10403 = vmatprep.subr.bf16.mxu0 %v13727_v61 }
 0x293   : > { %10405 = vmatpush3.bf16.msra.mxu0 %v12263_v26 }
 0x294   : > { %10406 = vmatprep.subr.bf16.mxu0 %v13727_v61 }
 0x297   : > { %8951 = vmatmul.mubr.f32.vlgmr.msra.gmra.mrb[6].mxu1 %v12590_v59  ;;  %10408 = vmatpush3.bf16.msra.mxu0 %v12277_v62 }
 0x298   : > { %10195 = vmatpush3.bf16.msra.mxu1 %v12096_v63  ;;  %8957 = vmatprep.mubr.msk.f32.mxu1 %vm11316_vm0, %v13728_v29 }
 0x299   : > { %10196 = vmatprep.subr.bf16.mxu1 %v13727_v61  ;;  %10409 = vmatprep.subr.bf16.mxu0 %v13727_v61 }
 0x29b   : > { %10411 = vmatpush3.bf16.msra.mxu0 %v12287_v0 }
 0x29c   : > { %10412 = vmatprep.subr.bf16.mxu0 %v13727_v61 }
 0x29d   : > { %s10984_s28 = spop %10983 }
 0x29e   : > { %p7659_p1 = scmp.eq.f32.partialorder %s10984_s28, 0.0 }
 0x29f   : > { %8958 = vmatmul.mubr.f32.vlgmr.msra.gmra.mrb[6].mxu1 %v12595_v23  ;;  %10414 = vmatpush3.bf16.msra.mxu0 %v12302_v33  ;;  %v3288_v23 = vsub.f32 %v3218_v25, %v12750_v42 }
 0x2a0   : > { %10198 = vmatpush3.bf16.msra.mxu1 %v12071_v44  ;;  %8964 = vmatprep.mubr.msk.f32.mxu1 %vm11316_vm0, %v13728_v29  ;;  %s7660_s29 = scalar_select %p7659_p1, 1, 0 }
 0x2a1   : > { %10199 = vmatprep.subr.bf16.mxu1 %v13727_v61  ;;  %10415 = vmatprep.subr.bf16.mxu0 %v13727_v61 }
 0x2a2   : > { %s7661_s13 = scvt.s32.f32 %s7660_s29 }
 0x2a3   : > { %10417 = vmatpush3.bf16.msra.mxu0 %v12309_v15 }
 0x2a4   : > { %10418 = vmatprep.subr.bf16.mxu0 %v13727_v61 }
 0x2a7   : > { %8965 = vmatmul.mubr.f32.vlgmr.msra.gmra.mrb[6].mxu1 %v12599_v16  ;;  %10420 = vmatpush3.bf16.msra.mxu0 %v12319_v21  ;;  %v3289_v16 = vand.u32 4294901760, %v3288_v23 }
 0x2a8   : > { %10201 = vmatpush3.bf16.msra.mxu1 %v12123_v9  ;;  %8971 = vmatprep.mubr.msk.f32.mxu1 %vm11316_vm0, %v13728_v29 }
 0x2a9   : > { %10202 = vmatprep.subr.bf16.mxu1 %v13727_v61  ;;  %10565 = vmatprep.subr.bf16.mxu0 %v13727_v61  ;;  %v3290_v3 = vsub.f32 %v3288_v23, %v3289_v16 }
 0x2aa   : > { %9357 = vmatmul.mubr.msk.f32.vlgmr.msra.gmra.mrb[2].mxu0 %vm12390_vm12, %v13757_v24 }
 0x2ab   : > { %9601 = vmatprep.mubr.msk.f32.mxu0 %vm11316_vm0, %v13728_v29  ;;  %v3291_v30 = vand.u32 4294901760, %v3290_v3 }
 0x2af   : > { %8972 = vmatmul.mubr.f32.vlgmr.msra.gmra.mrb[6].mxu1 %v12590_v59 }
 0x2b0   : > { %10204 = vmatpush3.bf16.msra.mxu1 %v12071_v44  ;;  %8978 = vmatprep.mubr.msk.f32.mxu1 %vm11316_vm0, %v13728_v29 }
 0x2b1   : > { %10205 = vmatprep.subr.bf16.mxu1 %v13727_v61 }
 0x2b7   : > { %8979 = vmatmul.mubr.f32.vlgmr.msra.gmra.mrb[6].mxu1 %v12590_v59 }
 0x2b8   : > { %10207 = vmatpush3.bf16.msra.mxu1 %v11916_v55  ;;  %8985 = vmatprep.mubr.msk.f32.mxu1 %vm11316_vm0, %v13728_v29 }
 0x2b9   : > { %10208 = vmatprep.subr.bf16.mxu1 %v13727_v61 }
 0x2bb   : > { %8986 = vmatmul.mubr.f32.vlgmr.msra.gmra.mrb[8].mxu1 %v3291_v30 }
 0x2bc   : > { %10210 = vmatpush3.bf16.msra.mxu1 %v11987_v13  ;;  %8992 = vmatprep.mubr.msk.f32.mxu1 %vm11316_vm0, %v13728_v29 }
 0x2bd   : > { %10211 = vmatprep.subr.bf16.mxu1 %v13727_v61 }
 0x2c3   : > { %8993 = vmatmul.mubr.f32.vlgmr.msra.gmra.mrb[8].mxu1 %v12750_v42 }
 0x2c4   : > { %10213 = vmatpush3.bf16.msra.mxu1 %v12010_v31  ;;  %8999 = vmatprep.mubr.msk.f32.mxu1 %vm11316_vm0, %v13728_v29 }
 0x2c5   : > { %10214 = vmatprep.subr.bf16.mxu1 %v13727_v61 }
 0x2cb   : > { %9000 = vmatmul.mubr.f32.vlgmr.msra.gmra.mrb[8].mxu1 %v3288_v23 }
 0x2cc   : > { %10216 = vmatpush3.bf16.msra.mxu1 %v11916_v55  ;;  %9006 = vmatprep.mubr.msk.f32.mxu1 %vm11316_vm0, %v13728_v29 }
 0x2cd   : > { %10217 = vmatprep.subr.bf16.mxu1 %v13727_v61 }
 0x2d3   : > { %9007 = vmatmul.mubr.f32.vlgmr.msra.gmra.mrb[8].mxu1 %v3289_v16 }
 0x2d4   : > { %10219 = vmatpush3.bf16.msra.mxu1 %v12036_v14  ;;  %9013 = vmatprep.mubr.msk.f32.mxu1 %vm11316_vm0, %v13728_v29 }
 0x2d5   : > { %10220 = vmatprep.subr.bf16.mxu1 %v13727_v61 }
 0x2db   : > { %9014 = vmatmul.mubr.f32.vlgmr.msra.gmra.mrb[8].mxu1 %v12750_v42 }
 0x2dc   : > { %10222 = vmatpush3.bf16.msra.mxu1 %v11916_v55  ;;  %9020 = vmatprep.mubr.msk.f32.mxu1 %vm11316_vm0, %v13728_v29 }
 0x2dd   : > { %10223 = vmatprep.subr.bf16.mxu1 %v13727_v61 }
 0x2e3   : > { %9021 = vmatmul.mubr.f32.vlgmr.msra.gmra.mrb[8].mxu1 %v12750_v42 }
 0x2e4   : > { %10225 = vmatpush3.bf16.msra.mxu1 %v12071_v44  ;;  %9027 = vmatprep.mubr.msk.f32.mxu1 %vm11316_vm0, %v13728_v29 }
 0x2e5   : > { %10226 = vmatprep.subr.bf16.mxu1 %v13727_v61 }
 0x2e7   : > { %9028 = vmatmul.mubr.f32.vlgmr.msra.gmra.mrb[10].mxu1 %v3291_v30 }
 0x2e8   : > { %10228 = vmatpush3.bf16.msra.mxu1 %v12080_v49  ;;  %9034 = vmatprep.mubr.msk.f32.mxu1 %vm11316_vm0, %v13728_v29 }
 0x2e9   : > { %10229 = vmatprep.subr.bf16.mxu1 %v13727_v61 }
 0x2ef   : > { %9035 = vmatmul.mubr.f32.vlgmr.msra.gmra.mrb[10].mxu1 %v12750_v42  ;;  %v1327_v5 = vpop.xlane.xlu0 %1326 }
 0x2f0   : > { %10231 = vmatpush3.bf16.msra.mxu1 %v12096_v63  ;;  %v1328_v59 = vrot.slane %v1327_v5, 4  ;;  %9041 = vmatprep.mubr.msk.f32.mxu1 %vm11316_vm0, %v13728_v29 }
 0x2f1   : > { %10232 = vmatprep.subr.bf16.mxu1 %v13727_v61 }
 0x2f2   : > { %v1329_v2 = vadd.f32 %v1328_v59, %v1327_v5 }
 0x2f4   : > { %v1330_v45 = vrot.slane %v1329_v2, 2 }
 0x2f6   : > { %v1331_v48 = vadd.f32 %v1330_v45, %v1329_v2 }
 0x2f7   : > { %9042 = vmatmul.mubr.f32.vlgmr.msra.gmra.mrb[10].mxu1 %v3288_v23 }
 0x2f8   : > { %10234 = vmatpush3.bf16.msra.mxu1 %v12071_v44  ;;  %v1332_v10 = vrot.slane %v1331_v48, 1  ;;  %9048 = vmatprep.mubr.msk.f32.mxu1 %vm11316_vm0, %v13728_v29 }
 0x2f9   : > { %10235 = vmatprep.subr.bf16.mxu1 %v13727_v61 }
 0x2fa   : > { %v1333_v20 = vadd.f32 %v1332_v10, %v1331_v48 }
 0x2fc   : > { %10985 = vpush %v1333_v20  ;;  %v1341_v20 = vld [vmem:[%s13759_s15] sm:$0x1]  ;;  %s11228_s15 = scalar_lea.vmem %s13574_s26, 16 }
 0x2fd   : > { %p11229_p2 = scmp.ne.s32.totalorder %s13574_s26, %s11228_s15 }
 0x2ff   : > { %9049 = vmatmul.mubr.f32.vlgmr.msra.gmra.mrb[10].mxu1 %v3289_v16  ;;  %p11230_p0 = pnand %p11229_p2, %p13785_p4 }
 0x300   : > { %10237 = vmatpush3.bf16.msra.mxu1 %v12123_v9  ;;  %9055 = vmatprep.mubr.msk.f32.mxu1 %vm11316_vm0, %v13728_v29 }
 0x301   : > { %10238 = vmatprep.subr.bf16.mxu1 %v13727_v61  ;;  %p11231_p8 = pneg %p11230_p0 }
 0x307   : > { %9056 = vmatmul.mubr.f32.vlgmr.msra.gmra.mrb[10].mxu1 %v12750_v42 }
 0x308   : > { %10240 = vmatpush3.bf16.msra.mxu1 %v12071_v44  ;;  %9062 = vmatprep.mubr.msk.f32.mxu1 %vm11316_vm0, %v13728_v29 }
 0x309   : > { %10241 = vmatprep.subr.bf16.mxu1 %v13727_v61 }
 0x30f   : > { %9063 = vmatmul.mubr.f32.vlgmr.msra.gmra.mrb[10].mxu1 %v12750_v42 }
 0x310   : > { %10243 = vmatpush3.bf16.msra.mxu1 %v11916_v55  ;;  %9069 = vmatprep.mubr.msk.f32.mxu1 %vm11316_vm0, %v13728_v29 }
 0x311   : > { %10244 = vmatprep.subr.bf16.mxu1 %v13727_v61 }
 0x313   : > { %9070 = vmatmul.mubr.f32.vlgmr.msra.gmra.mrb[12].mxu1 %v4212_v57 }
 0x314   : > { %10246 = vmatpush3.bf16.msra.mxu1 %v11987_v13  ;;  %9076 = vmatprep.mubr.msk.f32.mxu1 %vm11316_vm0, %v13728_v29 }
 0x315   : > { %10247 = vmatprep.subr.bf16.mxu1 %v13727_v61 }
 0x31b   : > { %9077 = vmatmul.mubr.f32.vlgmr.msra.gmra.mrb[12].mxu1 %v4208_v8 }
 0x31c   : > { %10249 = vmatpush3.bf16.msra.mxu1 %v12010_v31  ;;  %9083 = vmatprep.mubr.msk.f32.mxu1 %vm11316_vm0, %v13728_v29 }
 0x31d   : > { %10250 = vmatprep.subr.bf16.mxu1 %v13727_v61 }
 0x323   : > { %9084 = vmatmul.mubr.f32.vlgmr.msra.gmra.mrb[12].mxu1 %v4209_v58 }
 0x324   : > { %10252 = vmatpush3.bf16.msra.mxu1 %v11916_v55  ;;  %9090 = vmatprep.mubr.msk.f32.mxu1 %vm11316_vm0, %v13728_v29 }
 0x325   : > { %10253 = vmatprep.subr.bf16.mxu1 %v13727_v61 }
 0x32b   : > { %9091 = vmatmul.mubr.f32.vlgmr.msra.gmra.mrb[12].mxu1 %v4210_v36 }
 0x32c   : > { %10255 = vmatpush3.bf16.msra.mxu1 %v12036_v14  ;;  %9097 = vmatprep.mubr.msk.f32.mxu1 %vm11316_vm0, %v13728_v29 }
 0x32d   : > { %10256 = vmatprep.subr.bf16.mxu1 %v13727_v61  ;;  %s10986_s1 = spop %10985 }
 0x333   : > { %9098 = vmatmul.mubr.f32.vlgmr.msra.gmra.mrb[12].mxu1 %v4208_v8 }
 0x334   : > { %10258 = vmatpush3.bf16.msra.mxu1 %v11916_v55  ;;  %9104 = vmatprep.mubr.msk.f32.mxu1 %vm11316_vm0, %v13728_v29 }
 0x335   : > { %10259 = vmatprep.subr.bf16.mxu1 %v13727_v61 }
 0x33b   : > { %9105 = vmatmul.mubr.f32.vlgmr.msra.gmra.mrb[12].mxu1 %v4208_v8 }
 0x33c   : > { %10261 = vmatpush3.bf16.msra.mxu1 %v12071_v44  ;;  %9111 = vmatprep.mubr.msk.f32.mxu1 %vm11316_vm0, %v13728_v29 }
 0x33d   : > { %10262 = vmatprep.subr.bf16.mxu1 %v13727_v61 }
 0x33f   : > { %9112 = vmatmul.mubr.f32.vlgmr.msra.gmra.mrb[14].mxu1 %v4212_v57 }
 0x340   : > { %10264 = vmatpush3.bf16.msra.mxu1 %v12080_v49  ;;  %9118 = vmatprep.mubr.msk.f32.mxu1 %vm11316_vm0, %v13728_v29 }
 0x341   : > { %10265 = vmatprep.subr.bf16.mxu1 %v13727_v61 }
 0x347   : > { %9119 = vmatmul.mubr.f32.vlgmr.msra.gmra.mrb[14].mxu1 %v4208_v8 }
 0x348   : > { %10267 = vmatpush3.bf16.msra.mxu1 %v12096_v63  ;;  %9125 = vmatprep.mubr.msk.f32.mxu1 %vm11316_vm0, %v13728_v29 }
 0x349   : > { %10268 = vmatprep.subr.bf16.mxu1 %v13727_v61 }
 0x34f   : > { %9126 = vmatmul.mubr.f32.vlgmr.msra.gmra.mrb[14].mxu1 %v4209_v58 }
 0x350   : > { %10270 = vmatpush3.bf16.msra.mxu1 %v12071_v44  ;;  %9132 = vmatprep.mubr.msk.f32.mxu1 %vm11316_vm0, %v13728_v29 }
 0x351   : > { %10271 = vmatprep.subr.bf16.mxu1 %v13727_v61 }
 0x357   : > { %9133 = vmatmul.mubr.f32.vlgmr.msra.gmra.mrb[14].mxu1 %v4210_v36 }
 0x358   : > { %10273 = vmatpush3.bf16.msra.mxu1 %v12123_v9  ;;  %9139 = vmatprep.mubr.msk.f32.mxu1 %vm11316_vm0, %v13728_v29 }
 0x359   : > { %10274 = vmatprep.subr.bf16.mxu1 %v13727_v61 }
 0x35e   : > { %v2754_v55 = vpop.f32.mrb[4].mxu1 }
 0x35f   : > { %v8938_v13 = vpop.f32.mrb[5].mxu1  ;;  %9140 = vmatmul.mubr.f32.vlgmr.msra.gmra.mrb[14].mxu1 %v4208_v8 }
 0x360   : > { %10276 = vmatpush3.bf16.msra.mxu1 %v12071_v44  ;;  %9146 = vmatprep.mubr.msk.f32.mxu1 %vm11316_vm0, %v13728_v29 }
 0x361   : > { %10421 = vmatprep.subr.bf16.mxu1 %v13727_v61 }
 0x367   : > { %9147 = vmatmul.mubr.f32.vlgmr.msra.gmra.mrb[14].mxu1 %v4208_v8 }
 0x368   : > { %10423 = vmatpush3.bf16.msra.mxu1 %v12232_v54  ;;  %9391 = vmatprep.mubr.msk.f32.mxu1 %vm11316_vm0, %v13728_v29 }
 0x369   : > { %10424 = vmatprep.subr.bf16.mxu1 %v13727_v61 }
 0x36c   : > { %10426 = vmatpush3.bf16.msra.mxu1 %v12247_v41 }
 0x36d   : > { %10427 = vmatprep.subr.bf16.mxu1 %v13727_v61 }
 0x370   : > { %10429 = vmatpush3.bf16.msra.mxu1 %v12263_v26 }
 0x371   : > { %10430 = vmatprep.subr.bf16.mxu1 %v13727_v61 }
 0x374   : > { %10432 = vmatpush3.bf16.msra.mxu1 %v12277_v62 }
 0x375   : > { %10433 = vmatprep.subr.bf16.mxu1 %v13727_v61 }
 0x378   : > { %10435 = vmatpush3.bf16.msra.mxu1 %v12287_v0 }
 0x379   : > { %10436 = vmatprep.subr.bf16.mxu1 %v13727_v61 }
 0x37c   : > { %10438 = vmatpush3.bf16.msra.mxu1 %v12302_v33 }
 0x37d   : > { %10439 = vmatprep.subr.bf16.mxu1 %v13727_v61  ;;  %v12894_v31 = vpop.f32.mrb[2].mxu0 }
 0x37e   : > { %v9358_v14 = vpop.f32.mrb[3].mxu0  ;;  %vm6363_vm7 = vcmp.ge.f32.partialorder %v12894_v31, 0.5 }
 0x380   : > { %10441 = vmatpush3.bf16.msra.mxu1 %v12309_v15 }
 0x381   : > { %10442 = vmatprep.subr.bf16.mxu1 %v13727_v61 }
 0x384   : > { %10444 = vmatpush3.bf16.msra.mxu1 %v12319_v21 }
 0x385   : > { %10445 = vmatprep.subr.bf16.mxu1 %v13727_v61 }
 0x38a   : > { %v3213_v44 = vpop.f32.mrb[6].mxu1 }
 0x38b   : > { %v5069_v49 = vsub.f32 %v2754_v55, %v3213_v44  ;;  %v8980_v63 = vpop.f32.mrb[7].mxu1 }
 0x38d   : > { %v5070_v59 = vmul.f32 %v5069_v49, %v5069_v49  ;;  %v12956_v49 = vld [vmem:[#allocation10 + $0x28] sm:$0xff] }
 0x3b6   : > { %v3675_v9 = vpop.f32.mrb[8].mxu1 }
 0x3b7   : > { %v9022_v38 = vpop.f32.mrb[9].mxu1 }
 0x3e2   : > { %v4134_v4 = vpop.f32.mrb[10].mxu1 }
 0x3e3   : > { %v5064_v24 = vsub.f32 %v3675_v9, %v4134_v4  ;;  %v9064_v12 = vpop.f32.mrb[11].mxu1  ;;  %v6384_v9 = vand.u32 4294901760, %v12956_v49  ;;  %v12970_v4 = vld [vmem:[#allocation10 + $0x30] sm:$0xff] }
 0x3e5   : > { %v5065_v30 = vmul.f32 %v5064_v24, %v5064_v24  ;;  %v12972_v24 = vld [vmem:[#allocation10 + $0x38] sm:$0xff] }
 0x3e6   : > { %v6390_v12 = vand.u32 4294901760, %v12972_v24 }
 0x40e   : > { %v4596_v25 = vpop.f32.mrb[12].mxu1 }
 0x40f   : > { %v9106_v42 = vpop.f32.mrb[13].mxu1 }
 0x410   : > { %v12986_v42 = vld [vmem:[#allocation10 + $0x40] sm:$0xff] }
 0x43a   : > { %v5055_v23 = vpop.f32.mrb[14].mxu1 }
 0x43b   : > { %v5066_v16 = vsub.f32 %v4596_v25, %v5055_v23  ;;  %v9148_v3 = vpop.f32.mrb[15].mxu1  ;;  %v12988_v23 = vld [vmem:[#allocation10 + $0x48] sm:$0xff] }
 0x43d   : > { %v5067_v5 = vmul.f32 %v5066_v16, %v5066_v16  ;;  %v6396_v16 = vand.u32 4294901760, %v12988_v23 }
 0x43f   : > { %v5068_v2 = vadd.f32 %v5067_v5, %v5065_v30  ;;  %v13002_v30 = vld [vmem:[#allocation10 + $0x50] sm:$0xff]  ;;  %v13004_v5 = vld [vmem:[#allocation10 + $0x58] sm:$0xff] }
 0x441   : > { %v5071_v45 = vadd.f32 %v5070_v59, %v5068_v2  ;;  %v13673_v59 = vand.u32 4294901760, %v13004_v5 }
 0x443   : > { %11078 = vrsqrt.f32 %v5071_v45  ;;  %vm5074_vm3 = vcmp.eq.f32.partialorder %v5071_v45, inf  ;;  %v5077_v50 = vand.u32 2147483648, %v5071_v45  ;;  %vm5076_vm4 = vcmp.eq.f32.partialorder %v5071_v45, 0.0 }
 0x44d   : > { %v11079_v48 = vpop.eup %11078 }
 0x44e   : > { %v5073_v10 = vmul.f32 %v11079_v48, %v5071_v45  ;;  %v13020_v48 = vld [vmem:[#allocation10 + $0x68] sm:$0xff] }
 0x450   : > { %v5075_v46 = vsel %vm5074_vm3, %v5071_v45, %v5073_v10  ;;  %v13018_v45 = vld [vmem:[#allocation10 + $0x60] sm:$0xff] }
 0x451   : > { %v5078_v8 = vsel %vm5076_vm4, %v5077_v50, %v5075_v46  ;;  %v13671_v10 = vand.u32 4294901760, %v13018_v45  ;;  %v13669_v50 = vand.u32 4294901760, %v13020_v48 }
 0x452   : > { %v5079_v58 = vmul.f32 %v5078_v8, %v1341_v20 }
 0x453   : > { %v13036_v8 = vpack.c.bf16 %v13669_v50, %v13671_v10  ;;  %v13762_v10 = vld [vmem:[#allocation21_spill] sm:$0xff] }
 0x454   : > { %v12902_v36 = vmul.f32 %v12397_v34, %v5079_v58  ;;  %v1358_v34 = vld [vmem:[#allocation10] sm:$0xff]  ;;  %v13038_v58 = vld [vmem:[#allocation10 + $0x70] sm:$0xff] }
 0x456   : > { %v12905_v32 = vand.u32 4294901760, %v12902_v36  ;;  %vm7651_vm8 = vcmp.gt.f32.partialorder %v12902_v36, 0.0 }
 0x458   : > { %v12909_v57 = vsub.f32 %v12902_v36, %v12905_v32 }
 0x45a   : > { %v13668_v55 = vand.u32 4294901760, %v12909_v57 }
 0x45c   : > { %v5806_v13 = vsub.f32 %v12909_v57, %v13668_v55 }
 0x45e   : > { %v5807_v14 = vand.u32 4294901760, %v5806_v13  ;;  %v13040_v13 = vld [vmem:[#allocation10 + $0x78] sm:$0xff] }
 0x460   : > { %9392 = vmatmul.mubr.f32.vlgmr.msra.gmra.mrb[16].mxu1 %v5807_v14  ;;  %v13761_v14 = vld [vmem:[#allocation20_spill] sm:$0xff] }
 0x461   : > { %10447 = vmatpush3.bf16.msra.mxu1 %v12422_v37  ;;  %9426 = vmatprep.mubr.msk.f32.mxu1 %vm11316_vm0, %v13728_v29  ;;  %v1359_v37 = vld [vmem:[#allocation10 + $0x8] sm:$0xff] }
 0x462   : > { %10448 = vmatprep.subr.bf16.mxu1 %v13727_v61 }
 0x465   : > { %10450 = vmatpush3.bf16.msra.mxu1 %v12454_v22  ;;  %v6369_v22 = vand.u32 4294901760, %v1358_v34 }
 0x466   : > { %10451 = vmatprep.subr.bf16.mxu1 %v13727_v61 }
 0x467   : > { %v13027_v20 = vsub.f32 %v1358_v34, %v6369_v22  ;;  %v13675_v34 = vand.u32 4294901760, %v13040_v13 }
 0x469   : > { %10453 = vmatpush3.bf16.msra.mxu1 %v12466_v35  ;;  %v6372_v35 = vand.u32 4294901760, %v1359_v37 }
 0x46a   : > { %10454 = vmatprep.subr.bf16.mxu1 %v13727_v61 }
 0x46b   : > { %v13029_v46 = vsub.f32 %v1359_v37, %v6372_v35  ;;  %v13670_v37 = vand.u32 4294901760, %v13027_v20 }
 0x46d   : > { %10456 = vmatpush3.bf16.msra.mxu1 %v12479_v17  ;;  %v12934_v17 = vpack.c.bf16 %v6372_v35, %v6369_v22  ;;  %v13672_v22 = vand.u32 4294901760, %v13029_v46  ;;  %v6463_v35 = vsub.f32 %v13027_v20, %v13670_v37 }
 0x46e   : > { %10457 = vmatprep.subr.bf16.mxu1 %v13727_v61 }
 0x46f   : > { %10567 = vmatpush3.bf16.msra.mxu0 %v12934_v17 }
 0x470   : > { %10568 = vmatprep.subr.bf16.mxu0 %v13727_v61 }
 0x471   : > { %10459 = vmatpush3.bf16.msra.mxu1 %v12495_v51  ;;  %v12936_v51 = vld [vmem:[#allocation10 + $0x10] sm:$0xff] }
 0x472   : > { %10460 = vmatprep.subr.bf16.mxu1 %v13727_v61 }
 0x475   : > { %10462 = vmatpush3.bf16.msra.mxu1 %v12336_v60  ;;  %v12938_v60 = vld [vmem:[#allocation10 + $0x18] sm:$0xff] }
 0x476   : > { %10463 = vmatprep.subr.bf16.mxu1 %v13727_v61 }
 0x479   : > { %10465 = vmatpush3.bf16.msra.mxu1 %v12516_v40  ;;  %v6375_v40 = vand.u32 4294901760, %v12936_v51 }
 0x47a   : > { %10466 = vmatprep.subr.bf16.mxu1 %v13727_v61 }
 0x47b   : > { %v13058_v55 = vsub.f32 %v12936_v51, %v6375_v40 }
 0x47d   : > { %10468 = vmatpush3.bf16.msra.mxu1 %v12520_v1  ;;  %v6378_v1 = vand.u32 4294901760, %v12938_v60  ;;  %v13679_v51 = vand.u32 4294901760, %v13058_v55 }
 0x47e   : > { %10469 = vmatprep.subr.bf16.mxu1 %v13727_v61 }
 0x47f   : > { %v12952_v44 = vpack.c.bf16 %v6378_v1, %v6375_v40  ;;  %v13070_v37 = vsub.f32 %v12938_v60, %v6378_v1  ;;  %v13090_v1 = vsub.f32 %v12956_v49, %v6384_v9 }
 0x480   : > { %9427 = vmatmul.mubr.f32.vlgmr.msra.gmra.mrb[16].mxu1 %v12905_v32 }
 0x481   : > { %10471 = vmatpush3.bf16.msra.mxu1 %v12526_v52  ;;  %9461 = vmatprep.mubr.msk.f32.mxu1 %vm11316_vm0, %v13728_v29  ;;  %v12954_v52 = vld [vmem:[#allocation10 + $0x20] sm:$0xff]  ;;  %v13677_v40 = vand.u32 4294901760, %v13070_v37 }
 0x482   : > { %10472 = vmatprep.subr.bf16.mxu1 %v13727_v61  ;;  %v6381_v63 = vand.u32 4294901760, %v12954_v52  ;;  %10570 = vmatpush3.bf16.msra.mxu0 %v12952_v44 }
 0x483   : > { %10571 = vmatprep.subr.bf16.mxu0 %v13727_v61 }
 0x484   : > { %v12968_v38 = vpack.c.bf16 %v6384_v9, %v6381_v63  ;;  %v13085_v60 = vsub.f32 %v12954_v52, %v6381_v63 }
 0x485   : > { %10474 = vmatpush3.bf16.msra.mxu1 %v12535_v19  ;;  %v6387_v19 = vand.u32 4294901760, %v12970_v4 }
 0x486   : > { %10475 = vmatprep.subr.bf16.mxu1 %v13727_v61  ;;  %10573 = vmatpush3.bf16.msra.mxu0 %v12968_v38  ;;  %v13676_v63 = vand.u32 4294901760, %v13085_v60 }
 0x487   : > { %10574 = vmatprep.subr.bf16.mxu0 %v13727_v61  ;;  %v12984_v25 = vpack.c.bf16 %v6390_v12, %v6387_v19 }
 0x488   : > { %v6491_v9 = vsub.f32 %v13085_v60, %v13676_v63 }
 0x489   : > { %10477 = vmatpush3.bf16.msra.mxu1 %v12543_v7  ;;  %v6393_v7 = vand.u32 4294901760, %v12986_v42 }
 0x48a   : > { %10478 = vmatprep.subr.bf16.mxu1 %v13727_v61  ;;  %10576 = vmatpush3.bf16.msra.mxu0 %v12984_v25 }
 0x48b   : > { %10577 = vmatprep.subr.bf16.mxu0 %v13727_v61  ;;  %v13000_v3 = vpack.c.bf16 %v6396_v16, %v6393_v7 }
 0x48d   : > { %10480 = vmatpush3.bf16.msra.mxu1 %v12549_v18  ;;  %v13674_v18 = vand.u32 4294901760, %v13002_v30 }
 0x48e   : > { %10481 = vmatprep.subr.bf16.mxu1 %v13727_v61  ;;  %10579 = vmatpush3.bf16.msra.mxu0 %v13000_v3 }
 0x48f   : > { %10580 = vmatprep.subr.bf16.mxu0 %v13727_v61  ;;  %v13016_v2 = vpack.c.bf16 %v13673_v59, %v13674_v18 }
 0x491   : > { %10483 = vmatpush3.bf16.msra.mxu1 %v12555_v39  ;;  %v13760_v39 = vld [vmem:[#allocation19_spill] sm:$0xff] }
 0x492   : > { %10484 = vmatprep.subr.bf16.mxu1 %v13727_v61  ;;  %10582 = vmatpush3.bf16.msra.mxu0 %v13016_v2 }
 0x493   : > { %10583 = vmatprep.subr.bf16.mxu0 %v13727_v61 }
 0x495   : > { %10486 = vmatpush3.bf16.msra.mxu1 %v13760_v39  ;;  %v13686_v39 = vand.u32 4294901760, %v13038_v58 }
 0x496   : > { %10487 = vmatprep.subr.bf16.mxu1 %v13727_v61  ;;  %10585 = vmatpush3.bf16.msra.mxu0 %v13036_v8 }
 0x497   : > { %10586 = vmatprep.subr.bf16.mxu0 %v13727_v61  ;;  %v13065_v50 = vpack.c.bf16 %v13675_v34, %v13686_v39  ;;  %v6477_v34 = vsub.f32 %v13058_v55, %v13679_v51 }
 0x499   : > { %10489 = vmatpush3.bf16.msra.mxu1 %v13761_v14  ;;  %v6470_v14 = vsub.f32 %v13029_v46, %v13672_v22  ;;  %v6464_v22 = vand.u32 4294901760, %v6463_v35  ;;  %v6478_v52 = vand.u32 4294901760, %v6477_v34  ;;  %v13112_v35 = vsub.f32 %v12970_v4, %v6387_v19 }
 0x49a   : > { %10490 = vmatprep.subr.bf16.mxu1 %v13727_v61  ;;  %10588 = vmatpush3.bf16.msra.mxu0 %v13065_v50  ;;  %v13117_v34 = vsub.f32 %v12972_v24, %v6390_v12  ;;  %v13136_v19 = vsub.f32 %v12986_v42, %v6393_v7  ;;  %v13141_v12 = vsub.f32 %v12988_v23, %v6396_v16  ;;  %v13763_v7 = vand.u32 4294901760, %v13002_v30 }
 0x49b   : > { %v6471_v59 = vand.u32 4294901760, %v6470_v14  ;;  %10589 = vmatprep.subr.bf16.mxu0 %v13727_v61  ;;  %v13764_v16 = vand.u32 4294901760, %v13004_v5 }
 0x49c   : > { %v13155_v23 = vsub.f32 %v13002_v30, %v13763_v7 }
 0x49d   : > { %10492 = vmatpush3.bf16.msra.mxu1 %v13762_v10  ;;  %v13077_v18 = vpack.c.bf16 %v6471_v59, %v6464_v22  ;;  %v6484_v59 = vsub.f32 %v13070_v37, %v13677_v40  ;;  %v13678_v10 = vand.u32 4294901760, %v13090_v1  ;;  %v13684_v40 = vand.u32 4294901760, %v13112_v35 }
 0x49e   : > { %10493 = vmatprep.subr.bf16.mxu1 %v13727_v61 }
 0x49f   : > { %v6485_v49 = vand.u32 4294901760, %v6484_v59  ;;  %v6498_v22 = vsub.f32 %v13090_v1, %v13678_v10  ;;  %v6492_v59 = vand.u32 4294901760, %v6491_v9  ;;  %v13682_v10 = vand.u32 4294901760, %v13117_v34 }
 0x4a0   : > { %9462 = vmatmul.mubr.f32.vlgmr.msra.gmra.mrb[16].mxu1 %v12909_v57  ;;  %v6505_v4 = vsub.f32 %v13112_v35, %v13684_v40  ;;  %v13680_v9 = vand.u32 4294901760, %v13141_v12 }
 0x4a1   : > { %10495 = vmatpush3.bf16.msra.mxu1 %v12232_v54  ;;  %9496 = vmatprep.mubr.msk.f32.mxu1 %vm11316_vm0, %v13728_v29  ;;  %v13119_v14 = vpack.c.bf16 %v6485_v49, %v6478_v52  ;;  %v6499_v63 = vand.u32 4294901760, %v6498_v22  ;;  %v6512_v24 = vsub.f32 %v13117_v34, %v13682_v10  ;;  %v13681_v49 = vand.u32 4294901760, %v13136_v19 }
 0x4a2   : > { %10496 = vmatprep.subr.bf16.mxu1 %v13727_v61  ;;  %v6506_v52 = vand.u32 4294901760, %v6505_v4  ;;  %v6526_v4 = vsub.f32 %v13141_v12, %v13680_v9 }
 0x4a3   : > { %v13125_v51 = vpack.c.bf16 %v6499_v63, %v6492_v59  ;;  %v6513_v63 = vand.u32 4294901760, %v6512_v24  ;;  %v6519_v42 = vsub.f32 %v13136_v19, %v13681_v49  ;;  %v13160_v59 = vsub.f32 %v13004_v5, %v13764_v16 }
 0x4a4   : > { %v6527_v30 = vand.u32 4294901760, %v6526_v4  ;;  %v13765_v16 = vand.u32 4294901760, %v13018_v45 }
 0x4a5   : > { %10498 = vmatpush3.bf16.msra.mxu1 %v12247_v41  ;;  %v13147_v22 = vpack.c.bf16 %v6513_v63, %v6506_v52  ;;  %v6520_v24 = vand.u32 4294901760, %v6519_v42  ;;  %v13683_v52 = vand.u32 4294901760, %v13155_v23  ;;  %v13685_v63 = vand.u32 4294901760, %v13160_v59 }
 0x4a6   : > { %10499 = vmatprep.subr.bf16.mxu1 %v13727_v61  ;;  %v13178_v9 = vsub.f32 %v13018_v45, %v13765_v16  ;;  %v13766_v42 = vand.u32 4294901760, %v13020_v48 }
 0x4a7   : > { %v6533_v7 = vsub.f32 %v13155_v23, %v13683_v52  ;;  %v6540_v5 = vsub.f32 %v13160_v59, %v13685_v63  ;;  %v13185_v10 = vpack.c.bf16 %v6527_v30, %v6520_v24  ;;  %v13767_v24 = vand.u32 4294901760, %v13038_v58 }
 0x4a8   : > { %v13183_v49 = vsub.f32 %v13020_v48, %v13766_v42  ;;  %v6546_v40 = vand.u32 4294901760, %v13178_v9 }
 0x4a9   : > { %10501 = vmatpush3.bf16.msra.mxu1 %v12263_v26  ;;  %v6534_v4 = vand.u32 4294901760, %v6533_v7  ;;  %v6541_v52 = vand.u32 4294901760, %v6540_v5  ;;  %v13202_v30 = vsub.f32 %v13038_v58, %v13767_v24  ;;  %v13768_v7 = vand.u32 4294901760, %v13040_v13 }
 0x4aa   : > { %10502 = vmatprep.subr.bf16.mxu1 %v13727_v61  ;;  %v13687_v63 = vand.u32 4294901760, %v13183_v49  ;;  %v6547_v45 = vsub.f32 %v13178_v9, %v6546_v40 }
 0x4ab   : > { %v13191_v39 = vpack.c.bf16 %v6541_v52, %v6534_v4  ;;  %v13207_v5 = vsub.f32 %v13040_v13, %v13768_v7  ;;  %v6560_v42 = vand.u32 4294901760, %v13202_v30  ;;  %v13229_v7 = vpack.c.bf16 %v13029_v46, %v13027_v20 }
 0x4ac   : > { %v6554_v48 = vsub.f32 %v13183_v49, %v13687_v63  ;;  %v6548_v52 = vand.u32 4294901760, %v6547_v45 }
 0x4ad   : > { %10504 = vmatpush3.bf16.msra.mxu1 %v12277_v62  ;;  %v6567_v4 = vand.u32 4294901760, %v13207_v5  ;;  %v6561_v58 = vsub.f32 %v13202_v30, %v6560_v42 }
 0x4ae   : > { %10505 = vmatprep.subr.bf16.mxu1 %v13727_v61  ;;  %v6555_v16 = vand.u32 4294901760, %v6554_v48 }
 0x4af   : > { %v6568_v13 = vsub.f32 %v13207_v5, %v6567_v4  ;;  %v6562_v45 = vand.u32 4294901760, %v6561_v58  ;;  %v13245_v58 = vpack.c.bf16 %v13090_v1, %v13085_v60 }
 0x4b0   : > { %v13213_v63 = vpack.c.bf16 %v6555_v16, %v6548_v52  ;;  %v13769_v52 = vand.u32 4294901760, %v12909_v57  ;;  %v13239_v16 = vpack.c.bf16 %v13070_v37, %v13058_v55  ;;  %v13775_v57 = vand.u32 4294901760, %v13090_v1 }
 0x4b1   : > { %10507 = vmatpush3.bf16.msra.mxu1 %v12287_v0  ;;  %v6569_v48 = vand.u32 4294901760, %v6568_v13  ;;  %v13779_v1 = vand.u32 4294901760, %v13141_v12 }
 0x4b2   : > { %10508 = vmatprep.subr.bf16.mxu1 %v13727_v61 }
 0x4b3   : > { %v13223_v24 = vpack.c.bf16 %v6569_v48, %v6562_v45 }
 0x4b5   : > { %10510 = vmatpush3.bf16.msra.mxu1 %v12302_v33 }
 0x4b6   : > { %10511 = vmatprep.subr.bf16.mxu1 %v13727_v61 }
 0x4b9   : > { %10513 = vmatpush3.bf16.msra.mxu1 %v12309_v15 }
 0x4ba   : > { %10514 = vmatprep.subr.bf16.mxu1 %v13727_v61 }
 0x4bd   : > { %10516 = vmatpush3.bf16.msra.mxu1 %v12319_v21 }
 0x4be   : > { %10517 = vmatprep.subr.bf16.mxu1 %v13727_v61 }
 0x4c0   : > { %9497 = vmatmul.mubr.f32.vlgmr.msra.gmra.mrb[16].mxu1 %v13769_v52 }
 0x4c1   : > { %10519 = vmatpush3.bf16.msra.mxu1 %v12628_v6  ;;  %9531 = vmatprep.mubr.msk.f32.mxu1 %vm11316_vm0, %v13728_v29  ;;  %v13251_v6 = vpack.c.bf16 %v13117_v34, %v13112_v35 }
 0x4c2   : > { %10520 = vmatprep.subr.bf16.mxu1 %v13727_v61 }
 0x4c5   : > { %10522 = vmatpush3.bf16.msra.mxu1 %v12638_v53  ;;  %v13257_v53 = vpack.c.bf16 %v13141_v12, %v13136_v19 }
 0x4c6   : > { %10523 = vmatprep.subr.bf16.mxu1 %v13727_v61 }
 0x4c9   : > { %10525 = vmatpush3.bf16.msra.mxu1 %v12653_v56  ;;  %v13263_v56 = vpack.c.bf16 %v13160_v59, %v13155_v23 }
 0x4ca   : > { %10526 = vmatprep.subr.bf16.mxu1 %v13727_v61 }
 0x4cd   : > { %10528 = vmatpush3.bf16.msra.mxu1 %v12661_v11  ;;  %v13269_v11 = vpack.c.bf16 %v13183_v49, %v13178_v9 }
 0x4ce   : > { %10529 = vmatprep.subr.bf16.mxu1 %v13727_v61 }
 0x4d1   : > { %10531 = vmatpush3.bf16.msra.mxu1 %v12674_v43  ;;  %v13275_v43 = vpack.c.bf16 %v13207_v5, %v13202_v30 }
 0x4d2   : > { %10532 = vmatprep.subr.bf16.mxu1 %v13727_v61 }
 0x4d5   : > { %10534 = vmatpush3.bf16.msra.mxu1 %v12682_v47  ;;  %v13772_v47 = vand.u32 4294901760, %v13058_v55  ;;  %v13776_v55 = vand.u32 4294901760, %v13112_v35  ;;  %v13780_v35 = vand.u32 4294901760, %v13155_v23  ;;  %v13443_v23 = vpack.c.bf16 %v6567_v4, %v6560_v42 }
 0x4d6   : > { %10535 = vmatprep.subr.bf16.mxu1 %v13727_v61 }
 0x4d9   : > { %10537 = vmatpush3.bf16.msra.mxu1 %v12695_v28  ;;  %v13773_v28 = vand.u32 4294901760, %v13070_v37 }
 0x4da   : > { %10538 = vmatprep.subr.bf16.mxu1 %v13727_v61 }
 0x4dd   : > { %10540 = vmatpush3.bf16.msra.mxu1 %v12703_v27  ;;  %v13393_v27 = vpack.c.bf16 %v13773_v28, %v13772_v47 }
 0x4de   : > { %10541 = vmatprep.subr.bf16.mxu1 %v13727_v61 }
 0x4e0   : > { %9532 = vmatmul.mubr.f32.vlgmr.msra.gmra.mrb[16].mxu1 %v12905_v32 }
 0x4e1   : > { %10543 = vmatpush3.bf16.msra.mxu1 %v12232_v54  ;;  %9566 = vmatprep.mubr.msk.f32.mxu1 %vm11316_vm0, %v13728_v29  ;;  %v13309_v54 = vand.u32 4294901760, %v12894_v31 }
 0x4e2   : > { %10544 = vmatprep.subr.bf16.mxu1 %v13727_v61 }
 0x4e5   : > { %10546 = vmatpush3.bf16.msra.mxu1 %v12247_v41  ;;  %v13315_v41 = vsub.f32 %v12894_v31, %v13309_v54 }
 0x4e6   : > { %10547 = vmatprep.subr.bf16.mxu1 %v13727_v61 }
 0x4e9   : > { %10549 = vmatpush3.bf16.msra.mxu1 %v12263_v26  ;;  %v7092_v26 = vand.u32 4294901760, %v13315_v41 }
 0x4ea   : > { %10550 = vmatprep.subr.bf16.mxu1 %v13727_v61 }
 0x4ed   : > { %10552 = vmatpush3.bf16.msra.mxu1 %v12277_v62  ;;  %v7093_v62 = vsub.f32 %v13315_v41, %v7092_v26 }
 0x4ee   : > { %10553 = vmatprep.subr.bf16.mxu1 %v13727_v61 }
 0x4f1   : > { %10555 = vmatpush3.bf16.msra.mxu1 %v12287_v0  ;;  %v7094_v0 = vand.u32 4294901760, %v7093_v62 }
 0x4f2   : > { %10556 = vmatprep.subr.bf16.mxu1 %v13727_v61 }
 0x4f5   : > { %10558 = vmatpush3.bf16.msra.mxu1 %v12302_v33  ;;  %v13770_v33 = vand.u32 4294901760, %v13027_v20 }
 0x4f6   : > { %10559 = vmatprep.subr.bf16.mxu1 %v13727_v61 }
 0x4f9   : > { %10561 = vmatpush3.bf16.msra.mxu1 %v12309_v15  ;;  %v13771_v15 = vand.u32 4294901760, %v13029_v46  ;;  %v13777_v46 = vand.u32 4294901760, %v13117_v34  ;;  %v13781_v34 = vand.u32 4294901760, %v13160_v59 }
 0x4fa   : > { %10562 = vmatprep.subr.bf16.mxu1 %v13727_v61 }
 0x4fb   : > { %v13411_v37 = vpack.c.bf16 %v13777_v46, %v13776_v55  ;;  %v13427_v45 = vpack.c.bf16 %v13781_v34, %v13780_v35 }
 0x4fd   : > { %10564 = vmatpush3.bf16.msra.mxu1 %v12319_v21  ;;  %v13385_v21 = vpack.c.bf16 %v13771_v15, %v13770_v33 }
 0x4fe   : > { %10709 = vmatprep.subr.bf16.mxu1 %v13727_v61 }
 0x500   : > { %9567 = vmatmul.mubr.f32.vlgmr.msra.gmra.mrb[16].mxu1 %v12905_v32  ;;  %v13774_v32 = vand.u32 4294901760, %v13085_v60  ;;  %v13778_v60 = vand.u32 4294901760, %v13136_v19  ;;  %v13782_v19 = vand.u32 4294901760, %v13183_v49 }
 0x501   : > { %10711 = vmatpush3.bf16.msra.mxu1 %v12934_v17  ;;  %9811 = vmatprep.mubr.msk.f32.mxu1 %vm11316_vm0, %v13728_v29 }
 0x502   : > { %10712 = vmatprep.subr.bf16.mxu1 %v13727_v61  ;;  %v13403_v20 = vpack.c.bf16 %v13775_v57, %v13774_v32  ;;  %v13419_v13 = vpack.c.bf16 %v13779_v1, %v13778_v60  ;;  %v13435_v12 = vpack.c.bf16 %v13782_v19, %v6546_v40  ;;  %v6364_v40 = vmax.f32 %v12894_v31, 1.0 }
 0x504   : > { %11080 = vrcp.f32 %v6364_v40 }
 0x505   : > { %10714 = vmatpush3.bf16.msra.mxu1 %v12952_v44 }
 0x506   : > { %10715 = vmatprep.subr.bf16.mxu1 %v13727_v61 }
 0x509   : > { %10717 = vmatpush3.bf16.msra.mxu1 %v12968_v38 }
 0x50a   : > { %10718 = vmatprep.subr.bf16.mxu1 %v13727_v61 }
 0x50d   : > { %10720 = vmatpush3.bf16.msra.mxu1 %v12984_v25 }
 0x50e   : > { %10721 = vmatprep.subr.bf16.mxu1 %v13727_v61  ;;  %v11081_v49 = vpop.eup %11080 }
 0x511   : > { %10723 = vmatpush3.bf16.msra.mxu1 %v13000_v3 }
 0x512   : > { %10724 = vmatprep.subr.bf16.mxu1 %v13727_v61 }
 0x515   : > { %10726 = vmatpush3.bf16.msra.mxu1 %v13016_v2 }
 0x516   : > { %10727 = vmatprep.subr.bf16.mxu1 %v13727_v61 }
 0x519   : > { %10729 = vmatpush3.bf16.msra.mxu1 %v13036_v8 }
 0x51a   : > { %10730 = vmatprep.subr.bf16.mxu1 %v13727_v61 }
 0x51d   : > { %10732 = vmatpush3.bf16.msra.mxu1 %v13065_v50 }
 0x51e   : > { %10733 = vmatprep.subr.bf16.mxu1 %v13727_v61 }
 0x520   : > { %9812 = vmatmul.mubr.f32.vlgmr.msra.gmra.mrb[18].mxu1 %v7094_v0 }
 0x521   : > { %10735 = vmatpush3.bf16.msra.mxu1 %v13077_v18  ;;  %9846 = vmatprep.mubr.msk.f32.mxu1 %vm11316_vm0, %v13728_v29 }
 0x522   : > { %10736 = vmatprep.subr.bf16.mxu1 %v13727_v61 }
 0x525   : > { %10738 = vmatpush3.bf16.msra.mxu1 %v13119_v14 }
 0x526   : > { %10739 = vmatprep.subr.bf16.mxu1 %v13727_v61 }
 0x529   : > { %10741 = vmatpush3.bf16.msra.mxu1 %v13125_v51 }
 0x52a   : > { %10742 = vmatprep.subr.bf16.mxu1 %v13727_v61 }
 0x52d   : > { %10744 = vmatpush3.bf16.msra.mxu1 %v13147_v22 }
 0x52e   : > { %10745 = vmatprep.subr.bf16.mxu1 %v13727_v61 }
 0x531   : > { %10747 = vmatpush3.bf16.msra.mxu1 %v13185_v10 }
 0x532   : > { %10748 = vmatprep.subr.bf16.mxu1 %v13727_v61 }
 0x535   : > { %10750 = vmatpush3.bf16.msra.mxu1 %v13191_v39 }
 0x536   : > { %10751 = vmatprep.subr.bf16.mxu1 %v13727_v61 }
 0x539   : > { %10753 = vmatpush3.bf16.msra.mxu1 %v13213_v63 }
 0x53a   : > { %10754 = vmatprep.subr.bf16.mxu1 %v13727_v61 }
 0x53d   : > { %10756 = vmatpush3.bf16.msra.mxu1 %v13223_v24 }
 0x53e   : > { %10757 = vmatprep.subr.bf16.mxu1 %v13727_v61 }
 0x540   : > { %9847 = vmatmul.mubr.f32.vlgmr.msra.gmra.mrb[18].mxu1 %v13309_v54 }
 0x541   : > { %10759 = vmatpush3.bf16.msra.mxu1 %v13229_v7  ;;  %9881 = vmatprep.mubr.msk.f32.mxu1 %vm11316_vm0, %v13728_v29 }
 0x542   : > { %10760 = vmatprep.subr.bf16.mxu1 %v13727_v61 }
 0x545   : > { %10762 = vmatpush3.bf16.msra.mxu1 %v13239_v16 }
 0x546   : > { %10763 = vmatprep.subr.bf16.mxu1 %v13727_v61 }
 0x549   : > { %10765 = vmatpush3.bf16.msra.mxu1 %v13245_v58 }
 0x54a   : > { %10766 = vmatprep.subr.bf16.mxu1 %v13727_v61 }
 0x54d   : > { %10768 = vmatpush3.bf16.msra.mxu1 %v13251_v6 }
 0x54e   : > { %10769 = vmatprep.subr.bf16.mxu1 %v13727_v61 }
 0x551   : > { %10771 = vmatpush3.bf16.msra.mxu1 %v13257_v53 }
 0x552   : > { %10772 = vmatprep.subr.bf16.mxu1 %v13727_v61 }
 0x555   : > { %10774 = vmatpush3.bf16.msra.mxu1 %v13263_v56 }
 0x556   : > { %10775 = vmatprep.subr.bf16.mxu1 %v13727_v61 }
 0x559   : > { %10777 = vmatpush3.bf16.msra.mxu1 %v13269_v11 }
 0x55a   : > { %10778 = vmatprep.subr.bf16.mxu1 %v13727_v61 }
 0x55d   : > { %10780 = vmatpush3.bf16.msra.mxu1 %v13275_v43 }
 0x55e   : > { %10781 = vmatprep.subr.bf16.mxu1 %v13727_v61 }
 0x560   : > { %9882 = vmatmul.mubr.f32.vlgmr.msra.gmra.mrb[18].mxu1 %v13315_v41 }
 0x561   : > { %10783 = vmatpush3.bf16.msra.mxu1 %v12934_v17  ;;  %9916 = vmatprep.mubr.msk.f32.mxu1 %vm11316_vm0, %v13728_v29 }
 0x562   : > { %10784 = vmatprep.subr.bf16.mxu1 %v13727_v61 }
 0x565   : > { %10786 = vmatpush3.bf16.msra.mxu1 %v12952_v44 }
 0x566   : > { %10787 = vmatprep.subr.bf16.mxu1 %v13727_v61 }
 0x569   : > { %10789 = vmatpush3.bf16.msra.mxu1 %v12968_v38 }
 0x56a   : > { %10790 = vmatprep.subr.bf16.mxu1 %v13727_v61 }
 0x56d   : > { %10792 = vmatpush3.bf16.msra.mxu1 %v12984_v25 }
 0x56e   : > { %10793 = vmatprep.subr.bf16.mxu1 %v13727_v61 }
 0x571   : > { %10795 = vmatpush3.bf16.msra.mxu1 %v13000_v3 }
 0x572   : > { %10796 = vmatprep.subr.bf16.mxu1 %v13727_v61 }
 0x575   : > { %10798 = vmatpush3.bf16.msra.mxu1 %v13016_v2 }
 0x576   : > { %10799 = vmatprep.subr.bf16.mxu1 %v13727_v61 }
 0x579   : > { %10801 = vmatpush3.bf16.msra.mxu1 %v13036_v8 }
 0x57a   : > { %10802 = vmatprep.subr.bf16.mxu1 %v13727_v61 }
 0x57d   : > { %10804 = vmatpush3.bf16.msra.mxu1 %v13065_v50 }
 0x57e   : > { %10805 = vmatprep.subr.bf16.mxu1 %v13727_v61 }
 0x580   : > { %9917 = vmatmul.mubr.f32.vlgmr.msra.gmra.mrb[18].mxu1 %v7092_v26 }
 0x581   : > { %10807 = vmatpush3.bf16.msra.mxu1 %v13385_v21  ;;  %9951 = vmatprep.mubr.msk.f32.mxu1 %vm11316_vm0, %v13728_v29 }
 0x582   : > { %10808 = vmatprep.subr.bf16.mxu1 %v13727_v61 }
 0x585   : > { %10810 = vmatpush3.bf16.msra.mxu1 %v13393_v27 }
 0x586   : > { %10811 = vmatprep.subr.bf16.mxu1 %v13727_v61 }
 0x589   : > { %10813 = vmatpush3.bf16.msra.mxu1 %v13403_v20 }
 0x58a   : > { %10814 = vmatprep.subr.bf16.mxu1 %v13727_v61 }
 0x58d   : > { %10816 = vmatpush3.bf16.msra.mxu1 %v13411_v37 }
 0x58e   : > { %10817 = vmatprep.subr.bf16.mxu1 %v13727_v61 }
 0x591   : > { %10819 = vmatpush3.bf16.msra.mxu1 %v13419_v13 }
 0x592   : > { %10820 = vmatprep.subr.bf16.mxu1 %v13727_v61 }
 0x595   : > { %10822 = vmatpush3.bf16.msra.mxu1 %v13427_v45 }
 0x596   : > { %10823 = vmatprep.subr.bf16.mxu1 %v13727_v61 }
 0x599   : > { %10825 = vmatpush3.bf16.msra.mxu1 %v13435_v12 }
 0x59a   : > { %10826 = vmatprep.subr.bf16.mxu1 %v13727_v61 }
 0x59d   : > { %10828 = vmatpush3.bf16.msra.mxu1 %v13443_v23 }
 0x59e   : > { %10829 = vmatprep.subr.bf16.mxu1 %v13727_v61 }
 0x5a0   : > { %9952 = vmatmul.mubr.f32.vlgmr.msra.gmra.mrb[18].mxu1 %v13309_v54 }
 0x5a1   : > { %10831 = vmatpush3.bf16.msra.mxu1 %v12934_v17  ;;  %9986 = vmatprep.mubr.msk.f32.mxu1 %vm11316_vm0, %v13728_v29 }
 0x5a2   : > { %10832 = vmatprep.subr.bf16.mxu1 %v13727_v61 }
 0x5a5   : > { %10834 = vmatpush3.bf16.msra.mxu1 %v12952_v44 }
 0x5a6   : > { %10835 = vmatprep.subr.bf16.mxu1 %v13727_v61 }
 0x5a9   : > { %10837 = vmatpush3.bf16.msra.mxu1 %v12968_v38 }
 0x5aa   : > { %10838 = vmatprep.subr.bf16.mxu1 %v13727_v61 }
 0x5ad   : > { %10840 = vmatpush3.bf16.msra.mxu1 %v12984_v25 }
 0x5ae   : > { %10841 = vmatprep.subr.bf16.mxu1 %v13727_v61 }
 0x5b1   : > { %10843 = vmatpush3.bf16.msra.mxu1 %v13000_v3 }
 0x5b2   : > { %10844 = vmatprep.subr.bf16.mxu1 %v13727_v61 }
 0x5b5   : > { %10846 = vmatpush3.bf16.msra.mxu1 %v13016_v2 }
 0x5b6   : > { %10847 = vmatprep.subr.bf16.mxu1 %v13727_v61 }
 0x5b9   : > { %10849 = vmatpush3.bf16.msra.mxu1 %v13036_v8 }
 0x5ba   : > { %10850 = vmatprep.subr.bf16.mxu1 %v13727_v61 }
 0x5bd   : > { %10852 = vmatpush3.bf16.msra.mxu1 %v13065_v50 }
 0x5c0   : > { %9987 = vmatmul.mubr.f32.vlgmr.msra.gmra.mrb[18].mxu1 %v13309_v54 }
 0x5d3   : > { %v6359_v9 = vpop.f32.mrb[16].mxu1 }
 0x5d4   : > { %v6366_v59 = vmul.f32 %v11081_v49, %v6359_v9  ;;  %v9568_v30 = vpop.f32.mrb[17].mxu1 }
 0x5d6   : > { %v6367_v5 = vsel %vm6363_vm7, %v6366_v59, 0.0 }
 0x5d7   : > { %v13469_v42 = vand.u32 4294901760, %v6367_v5 }
 0x5d9   : > { %v6450_v4 = vsub.f32 %v6367_v5, %v13469_v42 }
 0x5db   : > { %v6451_v48 = vand.u32 4294901760, %v6450_v4 }
 0x5dd   : > { %v6452_v52 = vsub.f32 %v6450_v4, %v6451_v48 }
 0x5df   : > { %v6453_v41 = vand.u32 4294901760, %v6452_v52 }
 0x5e1   : > { %9602 = vmatmul.mubr.f32.vlgmr.msra.gmra.mrb[4].mxu0 %v6453_v41 }
 0x5e2   : > { %10591 = vmatpush3.bf16.msra.mxu0 %v13077_v18  ;;  %9636 = vmatprep.mubr.msk.f32.mxu0 %vm11316_vm0, %v13728_v29 }
 0x5e3   : > { %10592 = vmatprep.subr.bf16.mxu0 %v13727_v61 }
 0x5e6   : > { %10594 = vmatpush3.bf16.msra.mxu0 %v13119_v14 }
 0x5e7   : > { %10595 = vmatprep.subr.bf16.mxu0 %v13727_v61 }
 0x5ea   : > { %10597 = vmatpush3.bf16.msra.mxu0 %v13125_v51 }
 0x5eb   : > { %10598 = vmatprep.subr.bf16.mxu0 %v13727_v61 }
 0x5ee   : > { %10600 = vmatpush3.bf16.msra.mxu0 %v13147_v22 }
 0x5ef   : > { %10601 = vmatprep.subr.bf16.mxu0 %v13727_v61 }
 0x5f2   : > { %10603 = vmatpush3.bf16.msra.mxu0 %v13185_v10 }
 0x5f3   : > { %10604 = vmatprep.subr.bf16.mxu0 %v13727_v61 }
 0x5f6   : > { %10606 = vmatpush3.bf16.msra.mxu0 %v13191_v39 }
 0x5f7   : > { %10607 = vmatprep.subr.bf16.mxu0 %v13727_v61 }
 0x5fa   : > { %10609 = vmatpush3.bf16.msra.mxu0 %v13213_v63 }
 0x5fb   : > { %10610 = vmatprep.subr.bf16.mxu0 %v13727_v61 }
 0x5fe   : > { %10612 = vmatpush3.bf16.msra.mxu0 %v13223_v24 }
 0x5ff   : > { %10613 = vmatprep.subr.bf16.mxu0 %v13727_v61 }
 0x601   : > { %9637 = vmatmul.mubr.f32.vlgmr.msra.gmra.mrb[4].mxu0 %v13469_v42 }
 0x602   : > { %10615 = vmatpush3.bf16.msra.mxu0 %v13229_v7  ;;  %9671 = vmatprep.mubr.msk.f32.mxu0 %vm11316_vm0, %v13728_v29  ;;  %v13783_v7 = vlaneseq }
 0x603   : > { %10616 = vmatprep.subr.bf16.mxu0 %v13727_v61 }
 0x606   : > { %10618 = vmatpush3.bf16.msra.mxu0 %v13239_v16  ;;  %v7675_v16 = vand.u32 127, %v13783_v7 }
 0x607   : > { %10619 = vmatprep.subr.bf16.mxu0 %v13727_v61 }
 0x608   : > { %vm7679_vm10 = vcmp.eq.s32.totalorder %v7675_v16, 1  ;;  %vm7676_vm11 = vcmp.eq.s32.totalorder %v7675_v16, 0  ;;  %vm7683_vm13 = vcmp.eq.s32.totalorder %v7675_v16, 2 }
 0x60a   : > { %10621 = vmatpush3.bf16.msra.mxu0 %v13245_v58  ;;  %v7677_v58 = vstv %s10986_s1 }
 0x60b   : > { %10622 = vmatprep.subr.bf16.mxu0 %v13727_v61 }
 0x60e   : > { %10624 = vmatpush3.bf16.msra.mxu0 %v13251_v6 }
 0x60f   : > { %10625 = vmatprep.subr.bf16.mxu0 %v13727_v61 }
 0x612   : > { %10627 = vmatpush3.bf16.msra.mxu0 %v13257_v53  ;;  %v7678_v53 = vsel %vm7676_vm11, %v7677_v58, 0.0 }
 0x613   : > { %10628 = vmatprep.subr.bf16.mxu0 %v13727_v61 }
 0x616   : > { %10630 = vmatpush3.bf16.msra.mxu0 %v13263_v56 }
 0x617   : > { %10631 = vmatprep.subr.bf16.mxu0 %v13727_v61 }
 0x61a   : > { %10633 = vmatpush3.bf16.msra.mxu0 %v13269_v11 }
 0x61b   : > { %10634 = vmatprep.subr.bf16.mxu0 %v13727_v61 }
 0x61e   : > { %10636 = vmatpush3.bf16.msra.mxu0 %v13275_v43 }
 0x61f   : > { %10637 = vmatprep.subr.bf16.mxu0 %v13727_v61 }
 0x621   : > { %9672 = vmatmul.mubr.f32.vlgmr.msra.gmra.mrb[4].mxu0 %v6450_v4 }
 0x622   : > { %10639 = vmatpush3.bf16.msra.mxu0 %v12934_v17  ;;  %9706 = vmatprep.mubr.msk.f32.mxu0 %vm11316_vm0, %v13728_v29 }
 0x623   : > { %10640 = vmatprep.subr.bf16.mxu0 %v13727_v61 }
 0x626   : > { %10642 = vmatpush3.bf16.msra.mxu0 %v12952_v44 }
 0x627   : > { %10643 = vmatprep.subr.bf16.mxu0 %v13727_v61 }
 0x62a   : > { %10645 = vmatpush3.bf16.msra.mxu0 %v12968_v38 }
 0x62b   : > { %10646 = vmatprep.subr.bf16.mxu0 %v13727_v61 }
 0x62e   : > { %10648 = vmatpush3.bf16.msra.mxu0 %v12984_v25 }
 0x62f   : > { %10649 = vmatprep.subr.bf16.mxu0 %v13727_v61 }
 0x632   : > { %10651 = vmatpush3.bf16.msra.mxu0 %v13000_v3 }
 0x633   : > { %10652 = vmatprep.subr.bf16.mxu0 %v13727_v61 }
 0x636   : > { %10654 = vmatpush3.bf16.msra.mxu0 %v13016_v2 }
 0x637   : > { %10655 = vmatprep.subr.bf16.mxu0 %v13727_v61 }
 0x63a   : > { %10657 = vmatpush3.bf16.msra.mxu0 %v13036_v8 }
 0x63b   : > { %10658 = vmatprep.subr.bf16.mxu0 %v13727_v61 }
 0x63e   : > { %10660 = vmatpush3.bf16.msra.mxu0 %v13065_v50 }
 0x63f   : > { %10661 = vmatprep.subr.bf16.mxu0 %v13727_v61 }
 0x641   : > { %9707 = vmatmul.mubr.f32.vlgmr.msra.gmra.mrb[4].mxu0 %v6451_v48 }
 0x642   : > { %10663 = vmatpush3.bf16.msra.mxu0 %v13385_v21  ;;  %9741 = vmatprep.mubr.msk.f32.mxu0 %vm11316_vm0, %v13728_v29 }
 0x643   : > { %10664 = vmatprep.subr.bf16.mxu0 %v13727_v61 }
 0x646   : > { %10666 = vmatpush3.bf16.msra.mxu0 %v13393_v27 }
 0x647   : > { %10667 = vmatprep.subr.bf16.mxu0 %v13727_v61 }
 0x64a   : > { %10669 = vmatpush3.bf16.msra.mxu0 %v13403_v20 }
 0x64b   : > { %10670 = vmatprep.subr.bf16.mxu0 %v13727_v61 }
 0x64e   : > { %10672 = vmatpush3.bf16.msra.mxu0 %v13411_v37 }
 0x64f   : > { %10673 = vmatprep.subr.bf16.mxu0 %v13727_v61 }
 0x652   : > { %10675 = vmatpush3.bf16.msra.mxu0 %v13419_v13 }
 0x653   : > { %10676 = vmatprep.subr.bf16.mxu0 %v13727_v61 }
 0x656   : > { %10678 = vmatpush3.bf16.msra.mxu0 %v13427_v45 }
 0x657   : > { %10679 = vmatprep.subr.bf16.mxu0 %v13727_v61 }
 0x65a   : > { %10681 = vmatpush3.bf16.msra.mxu0 %v13435_v12 }
 0x65b   : > { %10682 = vmatprep.subr.bf16.mxu0 %v13727_v61 }
 0x65e   : > { %10684 = vmatpush3.bf16.msra.mxu0 %v13443_v23 }
 0x65f   : > { %10685 = vmatprep.subr.bf16.mxu0 %v13727_v61 }
 0x661   : > { %9742 = vmatmul.mubr.f32.vlgmr.msra.gmra.mrb[4].mxu0 %v13469_v42 }
 0x662   : > { %10687 = vmatpush3.bf16.msra.mxu0 %v12934_v17  ;;  %9776 = vmatprep.mubr.msk.f32.mxu0 %vm11316_vm0, %v13728_v29  ;;  %vm7662_vm0 = vcmask 1040384  }
 0x663   : > { %10688 = vmatprep.subr.bf16.mxu0 %v13727_v61 }
 0x666   : > { %10690 = vmatpush3.bf16.msra.mxu0 %v12952_v44 }
 0x667   : > { %10691 = vmatprep.subr.bf16.mxu0 %v13727_v61 }
 0x66a   : > { %10693 = vmatpush3.bf16.msra.mxu0 %v12968_v38 }
 0x66b   : > { %10694 = vmatprep.subr.bf16.mxu0 %v13727_v61 }
 0x66e   : > { %10696 = vmatpush3.bf16.msra.mxu0 %v12984_v25 }
 0x66f   : > { %10697 = vmatprep.subr.bf16.mxu0 %v13727_v61 }
 0x672   : > { %10699 = vmatpush3.bf16.msra.mxu0 %v13000_v3 }
 0x673   : > { %10700 = vmatprep.subr.bf16.mxu0 %v13727_v61 }
 0x676   : > { %10702 = vmatpush3.bf16.msra.mxu0 %v13016_v2 }
 0x677   : > { %10703 = vmatprep.subr.bf16.mxu0 %v13727_v61 }
 0x67a   : > { %10705 = vmatpush3.bf16.msra.mxu0 %v13036_v8 }
 0x67b   : > { %10706 = vmatprep.subr.bf16.mxu0 %v13727_v61 }
 0x67e   : > { %10708 = vmatpush3.bf16.msra.mxu0 %v13065_v50 }
 0x681   : > { %9777 = vmatmul.mubr.f32.vlgmr.msra.gmra.mrb[4].mxu0 %v13469_v42 }
 0x693   : > { %v7646_v29 = vpop.f32.mrb[18].mxu1 }
 0x694   : > { %v9988_v31 = vpop.f32.mrb[19].mxu1  ;;  %v7650_v17 = vmax.f32 %v7646_v29, 1.0 }
 0x696   : > { %11082 = vrcp.f32 %v7650_v17 }
 0x6a0   : > { %v11083_v2 = vpop.eup %11082 }
 0x754   : > { %v7005_v44 = vpop.f32.mrb[4].mxu0 }
 0x755   : > { %v7652_v38 = vsub.f32 %v12902_v36, %v7005_v44  ;;  %v9778_v25 = vpop.f32.mrb[5].mxu0  ;;  %v7680_v36 = vstv %s10984_s28  ;;  %s11232_s28 = sshll.u32 %s11320_s25, 4  ;;  %s11233_s28 = int_to_ptr.vmem [resolvable:$false] %s11232_s28 }
 0x756   : > { %v7681_v6 = vsel %vm7679_vm10, %v7680_v36, 0.0  ;;  %s11234_s1 = scalar_lea.vmem %s11233_s28, 32  ;;  %p11235_p6 = scmp.lt.s32.totalorder %s13574_s26, %s11233_s28 }
 0x757   : > { %v7653_v3 = vmul.f32 %v7652_v38, %v7652_v38  ;;  %v7682_v56 = vadd.f32 %v7681_v6, %v7678_v53  ;;  %p11236_p10 = scmp.lt.s32.totalorder %s11234_s1, %s11228_s15 }
 0x759   : > { %v7655_v18 = vmul.f32 0.5, %v7653_v3  ;;  %p11237_p13 = por %p11236_p10, %p11235_p6 }
 0x75b   : > { %v7657_v39 = vmul.f32 %v11083_v2, %v7655_v18  ;;  %p11238_p5 = pnand %p11237_p13, %p11231_p8 }
 0x75d   : > { %v7658_v61 = vsel %vm7651_vm8, %v7657_v39, 0.0 }
 0x75e   : > { %v7663_v8 = vsel %vm7662_vm0, %v7658_v61, 0.0 }
 0x75f   : > { %7664 = vadd.xlane.f32.xlu1 %v7663_v8 }
 0x7ec   : > { %v7665_v50 = vpop.xlane.xlu1 %7664 }
 0x7ed   : > { %v7666_v51 = vrot.slane %v7665_v50, 4 }
 0x7ef   : > { %v7667_v10 = vadd.f32 %v7666_v51, %v7665_v50 }
 0x7f1   : > { %v7668_v14 = vrot.slane %v7667_v10, 2 }
 0x7f3   : > { %v7669_v22 = vadd.f32 %v7668_v14, %v7667_v10 }
 0x7f5   : > { %v7670_v63 = vrot.slane %v7669_v22, 1 }
 0x7f7   : > { %v7671_v24 = vadd.f32 %v7670_v63, %v7669_v22 }
 0x7f9   : > { %10987 = vpush %v7671_v24 }
 0x82a   : > { %s10988_s18 = spop %10987 }
 0x82b   : > { %s7673_s20 = smul.f32 %s10988_s18, %s7661_s13 }
 0x82d   : > { %v7684_v11 = vstv %s7673_s20 }
 0x82e   : > { %v7685_v43 = vsel %vm7683_vm13, %v7684_v11, 0.0 }
 0x82f   : > { %v7686_v54 = vadd.f32 %v7685_v43, %v7682_v56 }
 0x831   : > { %7687 = vst [vmem:[%s559_s19] sm:$0x1] %v7686_v54 }
 0x832   : > { %11241 = shalt.err (!%p11238_p5)
}
 0x833   : > { %s11242_s0 = scalar_lea.hbm %s13572_s5, 16  ;;  %s11246_s18 = scalar_lea.hbm %s13784_s17, 32 }
 0x834   : > { %p11243_p11 = scmp.ne.s32.totalorder %s13572_s5, %s11242_s0  ;;  %p11247_p7 = scmp.lt.u32.totalorder %s13572_s5, %s13784_s17 }
 0x835   : > { %p11248_p12 = scmp.lt.u32.totalorder %s11246_s18, %s11242_s0  ;;  %p11250_p2 = scmp.lt.u32.totalorder %s11242_s0, %s13572_s5 }
 0x836   : > { %p11244_p9 = pnand %p11243_p11, %p13785_p4 }
 0x837   : > { %p11249_p1 = por %p11248_p12, %p11247_p7 }
 0x838   : > { %p11245_p3 = pneg %p11244_p9 }
 0x839   : > { %p11251_p0 = por %p11250_p2, %p11249_p1 }
 0x83b   : > { %p11252_p8 = pnand %p11251_p0, %p11245_p3 }
 0x83d   : > { %11255 = shalt.err (!%p11252_p8)
}
 0x83e   : > { %11005 = dma.vmem_to_hbm [thread:$0]  (%p13785_p4), %s13574_s26, 16, %s13572_s5, %s7689_s27  }
 0x83f PF: > { %s13786_s19 = sld [smem:[#allocation17_spill]]  ;;  %s13787_s16 = sld [smem:[#allocation18_spill]] }
 0x840   : > { %p13789_p10 = scmp.ge.s32.totalorder %s11306_s24, 2 }
 0x845   : > { %s7713_s30 = sand.u32 1, %s13786_s19   ;;  %p13788_p6 = scmp.ne.s32.totalorder %s13787_s16, 0 }
 0x846   : > { %s7714_s15 = scalar_lea.sflag [#allocation4], %s7713_s30 }
 0x847   : > { %p11025_p13 = pnand %p13789_p10, %p13788_p6 }
 0x849   : > { %11289 = dma.done.wait (!%p11025_p13), %s7714_s15, 16  }
 0x84a   : > { %11291 = vsyncadd (!%p11025_p13), %s7714_s15, 4294967280  ;;  %s13790_s25 = smov %s11526_s21  ;;  %p29_p5 = scmp.ge.s32.totalorder %s11526_s21, 4  }
 0x84b   : > { %s13791_s21 = smov %s11298_s22  ;;  %s13792_s22 = smov %s11302_s23 }
 0x84c   : > { %s13793_s23 = smov %s11536_s9  ;;  %s13794_s24 = smov %s13790_s25 }
 0x84d   :  { %31 = sbr.rel (!%p29_p5) target bundleno = 14 (0xe), region = 153 }
 0x854   :  { %7718 = vsyncpa [#allocation3], 1 }
 0x855   :  { %7720 = vsyncpa [#allocation3 + $0x1], 1 }
 0x856   :  { %7721 = vsyncpa [#allocation6], 1 }
 0x857   :  { %7723 = vsyncpa [#allocation6 + $0x1], 1 }
 0x858   :  { %7724 = vsyncpa [#allocation9], 1 }
 0x859   :  { %7725 = vsyncpa [#allocation4], 1 }
 0x85a   :  { %7727 = vsyncpa [#allocation4 + $0x1], 1 }

</bundles_post_ra>
